<compile_context>
chip_gen: v6e
topology: v6e:2x2x1
jax: 0.10.0
libtpu: 0.0.40
codegen_flags: <defaults>
</compile_context>

<pallas_src>
import jax
import jax.numpy as jnp
from jax import lax
from jax.experimental import pallas as pl
from jax.experimental.pallas import tpu as pltpu
import numpy as np

TILE_N = 16   # samples per grid step; multiple of 8, keep <= 32 for v7x VMEM.


# ------------------------------ fused kernel --------------------------------

def _make_lenet5_kernel(tn):
    R1 = tn * 28          # conv1 rows kept (2 garbage rows/sample masked by s1*)
    R2 = tn * 13 - 2      # conv2 raw rows (valid i in [0, 11) per sample)
    R3 = tn * 5 - 4       # conv3 raw rows (valid i == 0 per sample)

    def kernel(xc_ref, w1_ref, b1_ref, s1e_ref, s1o_ref, t1e_ref, t1o_ref,
               w2_ref, b2_ref, s2e_ref, s2o_ref, t2e_ref, t2o_ref,
               w3_ref, b3_ref, s3_ref, fw1_ref, fb1_ref, fw2_ref, fb2_ref,
               o_ref):
        f32, bf16 = jnp.float32, jnp.bfloat16

        def dot(a, b):                      # bf16 x bf16 -> f32 MXU matmul
            return jnp.dot(a, b, preferred_element_type=f32)

        # ---- conv1 (1->6, 3x3) + ReLU: single fused-K (K=84) matmul ---------
        # Row taps were im2col'd into lanes outside the kernel.
        z1 = jnp.maximum(dot(xc_ref[...], w1_ref[...]) + b1_ref[...], 0.0)
        z1b = z1.astype(bf16)                                   # (R1, 156)

        # ---- maxpool1 2x2/2: even/odd row + even/odd column 0/1 selections --
        r1 = jnp.maximum(dot(s1e_ref[...], z1b), dot(s1o_ref[...], z1b))
        r1b = r1.astype(bf16)                                   # (tn*13, 156)
        a1b = jnp.maximum(dot(r1b, t1e_ref[...]),
                          dot(r1b, t1o_ref[...])).astype(bf16)  # (tn*13, 128)

        # ---- conv2 (6->16, 3x3) + ReLU: 3 row taps lane-concat -> one matmul -
        a1c = jnp.concatenate([a1b[0:R2, :], a1b[1:1 + R2, :],
                               a1b[2:2 + R2, :]], axis=1)       # (R2, 384)
        z2 = jnp.maximum(dot(a1c, w2_ref[...]) + b2_ref[...], 0.0)
        z2b = z2.astype(bf16)                                   # (R2, 176)

        # ---- maxpool2 --------------------------------------------------------
        r2 = jnp.maximum(dot(s2e_ref[...], z2b), dot(s2o_ref[...], z2b))
        r2b = r2.astype(bf16)                                   # (tn*5, 176)
        a2b = jnp.maximum(dot(r2b, t2e_ref[...]),
                          dot(r2b, t2o_ref[...])).astype(bf16)  # (tn*5, 128)

        # ---- conv3 (16->120, 5x5 -> 1x1) + ReLU: 5 taps -> one matmul --------
        a2c = jnp.concatenate([a2b[k:k + R3, :] for k in range(5)],
                              axis=1)                           # (R3, 640)
        z3 = jnp.maximum(dot(a2c, w3_ref[...]) + b3_ref[...], 0.0)

        # ---- pick per-sample feature row (row 5n); 0/1 selection matmul ------
        # (matmul fallback kept; strided sublane slicing is the riskier lowering)
        feat = dot(s3_ref[...], z3.astype(bf16))                # (tn, 120)

        # ---- FC head: Linear(120,84)+ReLU, Linear(84,47->128), LogSoftmax ----
        h = jnp.maximum(dot(feat.astype(bf16), fw1_ref[...]) + fb1_ref[...],
                        0.0)
        z = dot(h.astype(bf16), fw2_ref[...]) + fb2_ref[...]    # (tn, 128)
        m = jnp.max(z, axis=-1, keepdims=True)
        lse = jnp.log(jnp.sum(jnp.exp(z - m), axis=-1, keepdims=True))
        o_ref[...] = (z - m - lse).astype(o_ref.dtype)

    return kernel


# ----------------------- host-side parameter repacking ----------------------

def prepare_kernel_params(tp, tile_n):
    """Repack PyTorch-shaped parameters for the fused, batch-tiled kernel.

    Activations use a 2-D (rows, W*C) layout.  Each conv becomes one matmul
    against a stacked (fused row-tap) weight matrix; each 2x2 max-pool becomes
    exact 0/1 even/odd selection matmuls plus element-wise max.  Pooled
    activations are padded to 128 lanes so the in-kernel tap concatenation is
    lane-aligned; the matching stacked-weight rows are zero.
    """
    tn = tile_n
    f32 = np.float32

    # conv1: w (6,1,3,3) -> W1[28*ki + (j+kj), 6*j+co] = w[co,0,ki,kj]
    c1 = np.asarray(tp["c1w"], f32)
    w1 = np.zeros((3 * 28, 26 * 6), f32)
    for ki in range(3):
        for kj in range(3):
            for j in range(26):
                w1[28 * ki + j + kj, 6 * j:6 * j + 6] = c1[:, 0, ki, kj]
    b1 = np.tile(np.asarray(tp["c1b"], f32), 26).reshape(1, 156)

    # conv2: w (16,6,3,3) -> W2[128*ki + 6*(j+kj)+ci, 16*j+co] = w[co,ci,ki,kj]
    c2 = np.asarray(tp["c2w"], f32)
    w2 = np.zeros((3 * 128, 11 * 16), f32)
    for ki in range(3):
        for kj in range(3):
            blk = c2[:, :, ki, kj].T                       # (Cin=6, Cout=16)
            for j in range(11):
                r0 = 128 * ki + 6 * (j + kj)
                w2[r0:r0 + 6, 16 * j:16 * j + 16] = blk
    b2 = np.tile(np.asarray(tp["c2b"], f32), 11).reshape(1, 176)

    # conv3: w (120,16,5,5) -> W3[128*ki + 16*kj + ci, co] = w[co,ci,ki,kj]
    c3 = np.asarray(tp["c3w"], f32)
    w3 = np.zeros((5 * 128, 120), f32)
    for ki in range(5):
        for kj in range(5):
            r0 = 128 * ki + 16 * kj
            w3[r0:r0 + 16, :] = c3[:, :, ki, kj].T
    b3 = np.asarray(tp["c3b"], f32).reshape(1, 120)

    # pool1 row/column 0/1 selections (sized per batch tile; exact in bf16)
    s1e = np.zeros((tn * 13, tn * 28), f32)
    s1o = np.zeros((tn * 13, tn * 28), f32)
    for n in range(tn):
        for p in range(13):
            s1e[13 * n + p, 28 * n + 2 * p] = 1.0
            s1o[13 * n + p, 28 * n + 2 * p + 1] = 1.0
    t1e = np.zeros((26 * 6, 128), f32)        # output padded to 128 lanes
    t1o = np.zeros((26 * 6, 128), f32)
    for q in range(13):
        for c in range(6):
            t1e[6 * (2 * q) + c, 6 * q + c] = 1.0
            t1o[6 * (2 * q + 1) + c, 6 * q + c] = 1.0

    # pool2
    R2 = tn * 13 - 2
    s2e = np.zeros((tn * 5, R2), f32)
    s2o = np.zeros((tn * 5, R2), f32)
    for n in range(tn):
        for p in range(5):
            s2e[5 * n + p, 13 * n + 2 * p] = 1.0
            s2o[5 * n + p, 13 * n + 2 * p + 1] = 1.0
    t2e = np.zeros((11 * 16, 128), f32)
    t2o = np.zeros((11 * 16, 128), f32)
    for q in range(5):
        for c in range(16):
            t2e[16 * (2 * q) + c, 16 * q + c] = 1.0
            t2o[16 * (2 * q + 1) + c, 16 * q + c] = 1.0

    # conv3 valid-row selection (row 5n per sample)
    R3 = tn * 5 - 4
    s3 = np.zeros((tn, R3), f32)
    for n in range(tn):
        s3[n, 5 * n] = 1.0

    # FC head; pad classes 47 -> 128 lanes (padded logits get -1e30 bias).
    fw1 = np.asarray(tp["f1w"], f32).T                      # (120, 84)
    fb1 = np.asarray(tp["f1b"], f32).reshape(1, 84)
    fw2 = np.zeros((84, 128), f32)
    fw2[:, :47] = np.asarray(tp["f2w"], f32).T
    fb2 = np.full((1, 128), -1e30, f32)
    fb2[0, :47] = np.asarray(tp["f2b"], f32)

    bf = lambda a: jnp.asarray(a, dtype=jnp.bfloat16)       # matmul operands
    ff = lambda a: jnp.asarray(a, dtype=jnp.float32)        # biases (f32 adds)
    return dict(
        w1=bf(w1), b1=ff(b1), s1e=bf(s1e), s1o=bf(s1o), t1e=bf(t1e), t1o=bf(t1o),
        w2=bf(w2), b2=ff(b2), s2e=bf(s2e), s2o=bf(s2o), t2e=bf(t2e), t2o=bf(t2o),
        w3=bf(w3), b3=ff(b3), s3=bf(s3),
        fw1=bf(fw1), fb1=ff(fb1), fw2=bf(fw2), fb2=ff(fb2),
    )


# ------------------------------- forward pass --------------------------------

_WEIGHT_ORDER = ["w1", "b1", "s1e", "s1o", "t1e", "t1o",
                 "w2", "b2", "s2e", "s2o", "t2e", "t2o",
                 "w3", "b3", "s3", "fw1", "fb1", "fw2", "fb2"]


def _const_spec(shape):
    # Full-array block with a constant index_map: fetched once, stays resident
    # in VMEM across all batch-tile grid steps.
    return pl.BlockSpec(tuple(int(d) for d in shape), lambda i: (0, 0))


def lenet5_forward(x_nchw, kp):
    """x_nchw: (N, 1, 28, 28) float32 -> log-probabilities (N, 47)."""
    tn = TILE_N
    N = x_nchw.shape[0]
    n_tiles = -(-N // tn)
    Np = n_tiles * tn

    x2d = x_nchw.astype(jnp.float32).reshape(N * 28, 28)    # C=1: NCHW->(N*H,W)
    if Np != N:
        x2d = jnp.pad(x2d, ((0, (Np - N) * 28), (0, 0)))
    # Host/XLA-side row-tap im2col for conv1 (fuses its 3 row taps into K=84).
    xp = jnp.pad(x2d, ((0, 2), (0, 0)))
    xc = jnp.concatenate([xp[0:-2, :], xp[1:-1, :], xp[2:, :]],
                         axis=1).astype(jnp.bfloat16)        # (Np*28, 84)

    weights = [kp[k] for k in _WEIGHT_ORDER]
    in_specs = [pl.BlockSpec((tn * 28, 84), lambda i: (i, 0))]
    in_specs += [_const_spec(w.shape) for w in weights]

    out = pl.pallas_call(
        _make_lenet5_kernel(tn),
        grid=(n_tiles,),
        in_specs=in_specs,
        out_specs=pl.BlockSpec((tn, 128), lambda i: (i, 0)),
        out_shape=jax.ShapeDtypeStruct((Np, 128), jnp.float32),
        compiler_params=pltpu.CompilerParams(
            dimension_semantics=("parallel",),          # shard tiles on v7x TCs
            vmem_limit_bytes=32 * 1024 * 1024),
    )(xc, *weights)
    return out[:N, :47]                                  # drop pad rows / lanes


# --------------------------- reference (pure JAX) ----------------------------

def ref_forward(x, tp):
    dn = ("NCHW", "OIHW", "NCHW")
    hp = lax.Precision.HIGHEST

    def conv_relu(z, w, b):
        z = lax.conv_general_dilated(z, w, (1, 1), "VALID",
                                     dimension_numbers=dn, precision=hp)
        return jnp.maximum(z + b[None, :, None, None], 0.0)

    def pool(z):
        return lax.reduce_window(z, -jnp.inf, lax.max,
                                 (1, 1, 2, 2), (1, 1, 2, 2), "VALID")

    y = pool(conv_relu(x, tp["c1w"], tp["c1b"]))
    y = pool(conv_relu(y, tp["c2w"], tp["c2b"]))
    y = conv_relu(y, tp["c3w"], tp["c3b"])
    y = y.reshape(-1, 120)
    y = jnp.maximum(jnp.dot(y, tp["f1w"].T, precision=hp) + tp["f1b"], 0.0)
    y = jnp.dot(y, tp["f2w"].T, precision=hp) + tp["f2b"]
    return jax.nn.log_softmax(y, axis=-1)


# ----------------------------------- main ------------------------------------

if __name__ == "__main__":
    key = jax.random.PRNGKey(0)
    ks = jax.random.split(key, 11)

    # Deterministic synthetic parameters in PyTorch shapes.
    tp = {
        "c1w": 0.20 * jax.random.normal(ks[0], (6, 1, 3, 3), jnp.float32),
        "c1b": 0.05 * jax.random.normal(ks[1], (6,), jnp.float32),
        "c2w": 0.10 * jax.random.normal(ks[2], (16, 6, 3, 3), jnp.float32),
        "c2b": 0.05 * jax.random.normal(ks[3], (16,), jnp.float32),
        "c3w": 0.05 * jax.random.normal(ks[4], (120, 16, 5, 5), jnp.float32),
        "c3b": 0.05 * jax.random.normal(ks[5], (120,), jnp.float32),
        "f1w": 0.08 * jax.random.normal(ks[6], (84, 120), jnp.float32),
        "f1b": 0.05 * jax.random.normal(ks[7], (84,), jnp.float32),
        "f2w": 0.10 * jax.random.normal(ks[8], (47, 84), jnp.float32),
        "f2b": 0.05 * jax.random.normal(ks[9], (47,), jnp.float32),
    }

    # LeNet-5/EMNIST input: 1 channel, 28x28.  batch=32 -> 2 batch-tile grid
    # steps of TILE_N=16 (exercises the tiled grid + resident weights).
    batch = 32
    x = jax.random.normal(ks[10], (batch, 1, 28, 28), jnp.float32)

    kp = prepare_kernel_params(tp, tile_n=TILE_N)

    out = jax.jit(lenet5_forward)(x, kp)
    out = jax.block_until_ready(out)

    ref = jax.block_until_ready(ref_forward(x, tp))

    assert out.shape == (batch, 47) and out.dtype == jnp.float32
    # bf16 matmul inputs (f32 accumulation) vs. a full-f32 reference.
    if not np.allclose(np.asarray(out), np.asarray(ref), atol=2e-2, rtol=2e-2):
        raise AssertionError(
            "Pallas output mismatch vs reference; max abs err = "
            f"{float(np.max(np.abs(np.asarray(out) - np.asarray(ref))))}")

    print("KERNEL_OK")
</pallas_src>

<mosaic_0001>
module attributes {stable_mosaic.version = 11 : i64} {
  func.func @kernel(%arg0: i32, %arg1: memref<448x84xbf16, #tpu.memory_space<vmem>>, %arg2: memref<84x156xbf16, #tpu.memory_space<vmem>>, %arg3: memref<1x156xf32, #tpu.memory_space<vmem>>, %arg4: memref<208x448xbf16, #tpu.memory_space<vmem>>, %arg5: memref<208x448xbf16, #tpu.memory_space<vmem>>, %arg6: memref<156x128xbf16, #tpu.memory_space<vmem>>, %arg7: memref<156x128xbf16, #tpu.memory_space<vmem>>, %arg8: memref<384x176xbf16, #tpu.memory_space<vmem>>, %arg9: memref<1x176xf32, #tpu.memory_space<vmem>>, %arg10: memref<80x206xbf16, #tpu.memory_space<vmem>>, %arg11: memref<80x206xbf16, #tpu.memory_space<vmem>>, %arg12: memref<176x128xbf16, #tpu.memory_space<vmem>>, %arg13: memref<176x128xbf16, #tpu.memory_space<vmem>>, %arg14: memref<640x120xbf16, #tpu.memory_space<vmem>>, %arg15: memref<1x120xf32, #tpu.memory_space<vmem>>, %arg16: memref<16x76xbf16, #tpu.memory_space<vmem>>, %arg17: memref<120x84xbf16, #tpu.memory_space<vmem>>, %arg18: memref<1x84xf32, #tpu.memory_space<vmem>>, %arg19: memref<84x128xbf16, #tpu.memory_space<vmem>>, %arg20: memref<1x128xf32, #tpu.memory_space<vmem>>, %arg21: memref<16x128xf32, #tpu.memory_space<vmem>>) attributes {dimension_semantics = [#tpu.dimension_semantics<parallel>], iteration_bounds = array<i64: 2>, scalar_prefetch = 0 : i64, scratch_operands = 0 : i64, tpu.core_type = #tpu.core_type<tc>, window_params = [{transform_indices = @transform_0, window_bounds = array<i64: 448, 84>}, {pipeline_mode = #tpu.pipeline_mode<synchronous>, transform_indices = @transform_1, window_bounds = array<i64: 84, 156>}, {pipeline_mode = #tpu.pipeline_mode<synchronous>, transform_indices = @transform_2, window_bounds = array<i64: 1, 156>}, {pipeline_mode = #tpu.pipeline_mode<synchronous>, transform_indices = @transform_3, window_bounds = array<i64: 208, 448>}, {pipeline_mode = #tpu.pipeline_mode<synchronous>, transform_indices = @transform_4, window_bounds = array<i64: 208, 448>}, {pipeline_mode = #tpu.pipeline_mode<synchronous>, transform_indices = @transform_5, window_bounds = array<i64: 156, 128>}, {pipeline_mode = #tpu.pipeline_mode<synchronous>, transform_indices = @transform_6, window_bounds = array<i64: 156, 128>}, {pipeline_mode = #tpu.pipeline_mode<synchronous>, transform_indices = @transform_7, window_bounds = array<i64: 384, 176>}, {pipeline_mode = #tpu.pipeline_mode<synchronous>, transform_indices = @transform_8, window_bounds = array<i64: 1, 176>}, {pipeline_mode = #tpu.pipeline_mode<synchronous>, transform_indices = @transform_9, window_bounds = array<i64: 80, 206>}, {pipeline_mode = #tpu.pipeline_mode<synchronous>, transform_indices = @transform_10, window_bounds = array<i64: 80, 206>}, {pipeline_mode = #tpu.pipeline_mode<synchronous>, transform_indices = @transform_11, window_bounds = array<i64: 176, 128>}, {pipeline_mode = #tpu.pipeline_mode<synchronous>, transform_indices = @transform_12, window_bounds = array<i64: 176, 128>}, {pipeline_mode = #tpu.pipeline_mode<synchronous>, transform_indices = @transform_13, window_bounds = array<i64: 640, 120>}, {pipeline_mode = #tpu.pipeline_mode<synchronous>, transform_indices = @transform_14, window_bounds = array<i64: 1, 120>}, {pipeline_mode = #tpu.pipeline_mode<synchronous>, transform_indices = @transform_15, window_bounds = array<i64: 16, 76>}, {pipeline_mode = #tpu.pipeline_mode<synchronous>, transform_indices = @transform_16, window_bounds = array<i64: 120, 84>}, {pipeline_mode = #tpu.pipeline_mode<synchronous>, transform_indices = @transform_17, window_bounds = array<i64: 1, 84>}, {pipeline_mode = #tpu.pipeline_mode<synchronous>, transform_indices = @transform_18, window_bounds = array<i64: 84, 128>}, {pipeline_mode = #tpu.pipeline_mode<synchronous>, transform_indices = @transform_19, window_bounds = array<i64: 1, 128>}, {transform_indices = @transform_20, window_bounds = array<i64: 16, 128>}]} {
    %c0 = arith.constant 0 : index
    %c0_0 = arith.constant 0 : index
    %0 = vector.load %arg1[%c0, %c0_0] : memref<448x84xbf16, #tpu.memory_space<vmem>>, vector<448x84xbf16>
    %c0_1 = arith.constant 0 : index
    %c0_2 = arith.constant 0 : index
    %1 = vector.load %arg2[%c0_1, %c0_2] : memref<84x156xbf16, #tpu.memory_space<vmem>>, vector<84x156xbf16>
    %cst = arith.constant dense<0.000000e+00> : vector<448x156xf32>
    %2 = tpu.matmul %0, %1, %cst {dimension_numbers = #tpu.dot_dimension_numbers<[1], [0], [0], [1], [0, 0, 1, 1], [], []>} : vector<448x84xbf16>, vector<84x156xbf16>, vector<448x156xf32> -> vector<448x156xf32>
    %c0_3 = arith.constant 0 : index
    %c0_4 = arith.constant 0 : index
    %3 = vector.load %arg3[%c0_3, %c0_4] : memref<1x156xf32, #tpu.memory_space<vmem>>, vector<1x156xf32>
    %4 = vector.broadcast %3 : vector<1x156xf32> to vector<448x156xf32>
    %5 = arith.addf %2, %4 : vector<448x156xf32>
    %cst_5 = arith.constant 0.000000e+00 : f32
    %6 = vector.broadcast %cst_5 : f32 to vector<448x156xf32>
    %7 = arith.maximumf %5, %6 : vector<448x156xf32>
    %8 = arith.truncf %7 : vector<448x156xf32> to vector<448x156xbf16>
    %c0_6 = arith.constant 0 : index
    %c0_7 = arith.constant 0 : index
    %9 = vector.load %arg4[%c0_6, %c0_7] : memref<208x448xbf16, #tpu.memory_space<vmem>>, vector<208x448xbf16>
    %cst_8 = arith.constant dense<0.000000e+00> : vector<208x156xf32>
    %10 = tpu.matmul %9, %8, %cst_8 {dimension_numbers = #tpu.dot_dimension_numbers<[1], [0], [0], [1], [0, 0, 1, 1], [], []>} : vector<208x448xbf16>, vector<448x156xbf16>, vector<208x156xf32> -> vector<208x156xf32>
    %c0_9 = arith.constant 0 : index
    %c0_10 = arith.constant 0 : index
    %11 = vector.load %arg5[%c0_9, %c0_10] : memref<208x448xbf16, #tpu.memory_space<vmem>>, vector<208x448xbf16>
    %cst_11 = arith.constant dense<0.000000e+00> : vector<208x156xf32>
    %12 = tpu.matmul %11, %8, %cst_11 {dimension_numbers = #tpu.dot_dimension_numbers<[1], [0], [0], [1], [0, 0, 1, 1], [], []>} : vector<208x448xbf16>, vector<448x156xbf16>, vector<208x156xf32> -> vector<208x156xf32>
    %13 = arith.maximumf %10, %12 : vector<208x156xf32>
    %14 = arith.truncf %13 : vector<208x156xf32> to vector<208x156xbf16>
    %c0_12 = arith.constant 0 : index
    %c0_13 = arith.constant 0 : index
    %15 = vector.load %arg6[%c0_12, %c0_13] : memref<156x128xbf16, #tpu.memory_space<vmem>>, vector<156x128xbf16>
    %cst_14 = arith.constant dense<0.000000e+00> : vector<208x128xf32>
    %16 = tpu.matmul %14, %15, %cst_14 {dimension_numbers = #tpu.dot_dimension_numbers<[1], [0], [0], [1], [0, 0, 1, 1], [], []>} : vector<208x156xbf16>, vector<156x128xbf16>, vector<208x128xf32> -> vector<208x128xf32>
    %c0_15 = arith.constant 0 : index
    %c0_16 = arith.constant 0 : index
    %17 = vector.load %arg7[%c0_15, %c0_16] : memref<156x128xbf16, #tpu.memory_space<vmem>>, vector<156x128xbf16>
    %cst_17 = arith.constant dense<0.000000e+00> : vector<208x128xf32>
    %18 = tpu.matmul %14, %17, %cst_17 {dimension_numbers = #tpu.dot_dimension_numbers<[1], [0], [0], [1], [0, 0, 1, 1], [], []>} : vector<208x156xbf16>, vector<156x128xbf16>, vector<208x128xf32> -> vector<208x128xf32>
    %19 = arith.maximumf %16, %18 : vector<208x128xf32>
    %20 = arith.truncf %19 : vector<208x128xf32> to vector<208x128xbf16>
    %21 = vector.extract_strided_slice %20 {offsets = [0, 0], sizes = [206, 128], strides = [1, 1]} : vector<208x128xbf16> to vector<206x128xbf16>
    %22 = vector.extract_strided_slice %20 {offsets = [1, 0], sizes = [206, 128], strides = [1, 1]} : vector<208x128xbf16> to vector<206x128xbf16>
    %23 = vector.extract_strided_slice %20 {offsets = [2, 0], sizes = [206, 128], strides = [1, 1]} : vector<208x128xbf16> to vector<206x128xbf16>
    %24 = tpu.concatenate %21, %22, %23 in 1 : vector<206x128xbf16>, vector<206x128xbf16>, vector<206x128xbf16> -> vector<206x384xbf16>
    %c0_18 = arith.constant 0 : index
    %c0_19 = arith.constant 0 : index
    %25 = vector.load %arg8[%c0_18, %c0_19] : memref<384x176xbf16, #tpu.memory_space<vmem>>, vector<384x176xbf16>
    %cst_20 = arith.constant dense<0.000000e+00> : vector<206x176xf32>
    %26 = tpu.matmul %24, %25, %cst_20 {dimension_numbers = #tpu.dot_dimension_numbers<[1], [0], [0], [1], [0, 0, 1, 1], [], []>} : vector<206x384xbf16>, vector<384x176xbf16>, vector<206x176xf32> -> vector<206x176xf32>
    %c0_21 = arith.constant 0 : index
    %c0_22 = arith.constant 0 : index
    %27 = vector.load %arg9[%c0_21, %c0_22] : memref<1x176xf32, #tpu.memory_space<vmem>>, vector<1x176xf32>
    %28 = vector.broadcast %27 : vector<1x176xf32> to vector<206x176xf32>
    %29 = arith.addf %26, %28 : vector<206x176xf32>
    %cst_23 = arith.constant 0.000000e+00 : f32
    %30 = vector.broadcast %cst_23 : f32 to vector<206x176xf32>
    %31 = arith.maximumf %29, %30 : vector<206x176xf32>
    %32 = arith.truncf %31 : vector<206x176xf32> to vector<206x176xbf16>
    %c0_24 = arith.constant 0 : index
    %c0_25 = arith.constant 0 : index
    %33 = vector.load %arg10[%c0_24, %c0_25] : memref<80x206xbf16, #tpu.memory_space<vmem>>, vector<80x206xbf16>
    %cst_26 = arith.constant dense<0.000000e+00> : vector<80x176xf32>
    %34 = tpu.matmul %33, %32, %cst_26 {dimension_numbers = #tpu.dot_dimension_numbers<[1], [0], [0], [1], [0, 0, 1, 1], [], []>} : vector<80x206xbf16>, vector<206x176xbf16>, vector<80x176xf32> -> vector<80x176xf32>
    %c0_27 = arith.constant 0 : index
    %c0_28 = arith.constant 0 : index
    %35 = vector.load %arg11[%c0_27, %c0_28] : memref<80x206xbf16, #tpu.memory_space<vmem>>, vector<80x206xbf16>
    %cst_29 = arith.constant dense<0.000000e+00> : vector<80x176xf32>
    %36 = tpu.matmul %35, %32, %cst_29 {dimension_numbers = #tpu.dot_dimension_numbers<[1], [0], [0], [1], [0, 0, 1, 1], [], []>} : vector<80x206xbf16>, vector<206x176xbf16>, vector<80x176xf32> -> vector<80x176xf32>
    %37 = arith.maximumf %34, %36 : vector<80x176xf32>
    %38 = arith.truncf %37 : vector<80x176xf32> to vector<80x176xbf16>
    %c0_30 = arith.constant 0 : index
    %c0_31 = arith.constant 0 : index
    %39 = vector.load %arg12[%c0_30, %c0_31] : memref<176x128xbf16, #tpu.memory_space<vmem>>, vector<176x128xbf16>
    %cst_32 = arith.constant dense<0.000000e+00> : vector<80x128xf32>
    %40 = tpu.matmul %38, %39, %cst_32 {dimension_numbers = #tpu.dot_dimension_numbers<[1], [0], [0], [1], [0, 0, 1, 1], [], []>} : vector<80x176xbf16>, vector<176x128xbf16>, vector<80x128xf32> -> vector<80x128xf32>
    %c0_33 = arith.constant 0 : index
    %c0_34 = arith.constant 0 : index
    %41 = vector.load %arg13[%c0_33, %c0_34] : memref<176x128xbf16, #tpu.memory_space<vmem>>, vector<176x128xbf16>
    %cst_35 = arith.constant dense<0.000000e+00> : vector<80x128xf32>
    %42 = tpu.matmul %38, %41, %cst_35 {dimension_numbers = #tpu.dot_dimension_numbers<[1], [0], [0], [1], [0, 0, 1, 1], [], []>} : vector<80x176xbf16>, vector<176x128xbf16>, vector<80x128xf32> -> vector<80x128xf32>
    %43 = arith.maximumf %40, %42 : vector<80x128xf32>
    %44 = arith.truncf %43 : vector<80x128xf32> to vector<80x128xbf16>
    %45 = vector.extract_strided_slice %44 {offsets = [0, 0], sizes = [76, 128], strides = [1, 1]} : vector<80x128xbf16> to vector<76x128xbf16>
    %46 = vector.extract_strided_slice %44 {offsets = [1, 0], sizes = [76, 128], strides = [1, 1]} : vector<80x128xbf16> to vector<76x128xbf16>
    %47 = vector.extract_strided_slice %44 {offsets = [2, 0], sizes = [76, 128], strides = [1, 1]} : vector<80x128xbf16> to vector<76x128xbf16>
    %48 = vector.extract_strided_slice %44 {offsets = [3, 0], sizes = [76, 128], strides = [1, 1]} : vector<80x128xbf16> to vector<76x128xbf16>
    %49 = vector.extract_strided_slice %44 {offsets = [4, 0], sizes = [76, 128], strides = [1, 1]} : vector<80x128xbf16> to vector<76x128xbf16>
    %50 = tpu.concatenate %45, %46, %47, %48, %49 in 1 : vector<76x128xbf16>, vector<76x128xbf16>, vector<76x128xbf16>, vector<76x128xbf16>, vector<76x128xbf16> -> vector<76x640xbf16>
    %c0_36 = arith.constant 0 : index
    %c0_37 = arith.constant 0 : index
    %51 = vector.load %arg14[%c0_36, %c0_37] : memref<640x120xbf16, #tpu.memory_space<vmem>>, vector<640x120xbf16>
    %cst_38 = arith.constant dense<0.000000e+00> : vector<76x120xf32>
    %52 = tpu.matmul %50, %51, %cst_38 {dimension_numbers = #tpu.dot_dimension_numbers<[1], [0], [0], [1], [0, 0, 1, 1], [], []>} : vector<76x640xbf16>, vector<640x120xbf16>, vector<76x120xf32> -> vector<76x120xf32>
    %c0_39 = arith.constant 0 : index
    %c0_40 = arith.constant 0 : index
    %53 = vector.load %arg15[%c0_39, %c0_40] : memref<1x120xf32, #tpu.memory_space<vmem>>, vector<1x120xf32>
    %54 = vector.broadcast %53 : vector<1x120xf32> to vector<76x120xf32>
    %55 = arith.addf %52, %54 : vector<76x120xf32>
    %cst_41 = arith.constant 0.000000e+00 : f32
    %56 = vector.broadcast %cst_41 : f32 to vector<76x120xf32>
    %57 = arith.maximumf %55, %56 : vector<76x120xf32>
    %c0_42 = arith.constant 0 : index
    %c0_43 = arith.constant 0 : index
    %58 = vector.load %arg16[%c0_42, %c0_43] : memref<16x76xbf16, #tpu.memory_space<vmem>>, vector<16x76xbf16>
    %59 = arith.truncf %57 : vector<76x120xf32> to vector<76x120xbf16>
    %cst_44 = arith.constant dense<0.000000e+00> : vector<16x120xf32>
    %60 = tpu.matmul %58, %59, %cst_44 {dimension_numbers = #tpu.dot_dimension_numbers<[1], [0], [0], [1], [0, 0, 1, 1], [], []>} : vector<16x76xbf16>, vector<76x120xbf16>, vector<16x120xf32> -> vector<16x120xf32>
    %61 = arith.truncf %60 : vector<16x120xf32> to vector<16x120xbf16>
    %c0_45 = arith.constant 0 : index
    %c0_46 = arith.constant 0 : index
    %62 = vector.load %arg17[%c0_45, %c0_46] : memref<120x84xbf16, #tpu.memory_space<vmem>>, vector<120x84xbf16>
    %cst_47 = arith.constant dense<0.000000e+00> : vector<16x84xf32>
    %63 = tpu.matmul %61, %62, %cst_47 {dimension_numbers = #tpu.dot_dimension_numbers<[1], [0], [0], [1], [0, 0, 1, 1], [], []>} : vector<16x120xbf16>, vector<120x84xbf16>, vector<16x84xf32> -> vector<16x84xf32>
    %c0_48 = arith.constant 0 : index
    %c0_49 = arith.constant 0 : index
    %64 = vector.load %arg18[%c0_48, %c0_49] : memref<1x84xf32, #tpu.memory_space<vmem>>, vector<1x84xf32>
    %65 = vector.broadcast %64 : vector<1x84xf32> to vector<16x84xf32>
    %66 = arith.addf %63, %65 : vector<16x84xf32>
    %cst_50 = arith.constant 0.000000e+00 : f32
    %67 = vector.broadcast %cst_50 : f32 to vector<16x84xf32>
    %68 = arith.maximumf %66, %67 : vector<16x84xf32>
    %69 = arith.truncf %68 : vector<16x84xf32> to vector<16x84xbf16>
    %c0_51 = arith.constant 0 : index
    %c0_52 = arith.constant 0 : index
    %70 = vector.load %arg19[%c0_51, %c0_52] : memref<84x128xbf16, #tpu.memory_space<vmem>>, vector<84x128xbf16>
    %cst_53 = arith.constant dense<0.000000e+00> : vector<16x128xf32>
    %71 = tpu.matmul %69, %70, %cst_53 {dimension_numbers = #tpu.dot_dimension_numbers<[1], [0], [0], [1], [0, 0, 1, 1], [], []>} : vector<16x84xbf16>, vector<84x128xbf16>, vector<16x128xf32> -> vector<16x128xf32>
    %c0_54 = arith.constant 0 : index
    %c0_55 = arith.constant 0 : index
    %72 = vector.load %arg20[%c0_54, %c0_55] : memref<1x128xf32, #tpu.memory_space<vmem>>, vector<1x128xf32>
    %73 = vector.broadcast %72 : vector<1x128xf32> to vector<16x128xf32>
    %74 = arith.addf %71, %73 : vector<16x128xf32>
    %cst_56 = arith.constant dense<0xFF800000> : vector<16xf32>
    %75 = vector.multi_reduction <maximumf>, %74, %cst_56 [1] : vector<16x128xf32> to vector<16xf32>
    %76 = vector.shape_cast %75 : vector<16xf32> to vector<16x1xf32>
    %77 = vector.broadcast %76 : vector<16x1xf32> to vector<16x128xf32>
    %78 = arith.subf %74, %77 : vector<16x128xf32>
    %79 = math.exp %78 : vector<16x128xf32>
    %cst_57 = arith.constant dense<0.000000e+00> : vector<16xf32>
    %80 = vector.multi_reduction <add>, %79, %cst_57 [1] : vector<16x128xf32> to vector<16xf32>
    %81 = vector.shape_cast %80 : vector<16xf32> to vector<16x1xf32>
    %82 = math.log %81 : vector<16x1xf32>
    %83 = vector.broadcast %76 : vector<16x1xf32> to vector<16x128xf32>
    %84 = arith.subf %74, %83 : vector<16x128xf32>
    %85 = vector.broadcast %82 : vector<16x1xf32> to vector<16x128xf32>
    %86 = arith.subf %84, %85 : vector<16x128xf32>
    %c0_58 = arith.constant 0 : index
    %c0_59 = arith.constant 0 : index
    %87 = vector.load %arg21[%c0_58, %c0_59] : memref<16x128xf32, #tpu.memory_space<vmem>>, vector<16x128xf32>
    tpu.vector_store %arg21[%c0_58, %c0_59], %86 {strides = array<i32>} : memref<16x128xf32, #tpu.memory_space<vmem>>, vector<16x128xf32>,
    return
  }
  func.func @transform_0(%arg0: i32) -> (i32, i32) {
    %c0_i32 = arith.constant 0 : i32
    %c0_i32_0 = arith.constant 0 : i32
    return %arg0, %c0_i32 : i32, i32
  }
  func.func @transform_1(%arg0: i32) -> (i32, i32) {
    %c0_i32 = arith.constant 0 : i32
    %c0_i32_0 = arith.constant 0 : i32
    %c0_i32_1 = arith.constant 0 : i32
    return %c0_i32, %c0_i32_0 : i32, i32
  }
  func.func @transform_2(%arg0: i32) -> (i32, i32) {
    %c0_i32 = arith.constant 0 : i32
    %c0_i32_0 = arith.constant 0 : i32
    %c0_i32_1 = arith.constant 0 : i32
    return %c0_i32, %c0_i32_0 : i32, i32
  }
  func.func @transform_3(%arg0: i32) -> (i32, i32) {
    %c0_i32 = arith.constant 0 : i32
    %c0_i32_0 = arith.constant 0 : i32
    %c0_i32_1 = arith.constant 0 : i32
    return %c0_i32, %c0_i32_0 : i32, i32
  }
  func.func @transform_4(%arg0: i32) -> (i32, i32) {
    %c0_i32 = arith.constant 0 : i32
    %c0_i32_0 = arith.constant 0 : i32
    %c0_i32_1 = arith.constant 0 : i32
    return %c0_i32, %c0_i32_0 : i32, i32
  }
  func.func @transform_5(%arg0: i32) -> (i32, i32) {
    %c0_i32 = arith.constant 0 : i32
    %c0_i32_0 = arith.constant 0 : i32
    %c0_i32_1 = arith.constant 0 : i32
    return %c0_i32, %c0_i32_0 : i32, i32
  }
  func.func @transform_6(%arg0: i32) -> (i32, i32) {
    %c0_i32 = arith.constant 0 : i32
    %c0_i32_0 = arith.constant 0 : i32
    %c0_i32_1 = arith.constant 0 : i32
    return %c0_i32, %c0_i32_0 : i32, i32
  }
  func.func @transform_7(%arg0: i32) -> (i32, i32) {
    %c0_i32 = arith.constant 0 : i32
    %c0_i32_0 = arith.constant 0 : i32
    %c0_i32_1 = arith.constant 0 : i32
    return %c0_i32, %c0_i32_0 : i32, i32
  }
  func.func @transform_8(%arg0: i32) -> (i32, i32) {
    %c0_i32 = arith.constant 0 : i32
    %c0_i32_0 = arith.constant 0 : i32
    %c0_i32_1 = arith.constant 0 : i32
    return %c0_i32, %c0_i32_0 : i32, i32
  }
  func.func @transform_9(%arg0: i32) -> (i32, i32) {
    %c0_i32 = arith.constant 0 : i32
    %c0_i32_0 = arith.constant 0 : i32
    %c0_i32_1 = arith.constant 0 : i32
    return %c0_i32, %c0_i32_0 : i32, i32
  }
  func.func @transform_10(%arg0: i32) -> (i32, i32) {
    %c0_i32 = arith.constant 0 : i32
    %c0_i32_0 = arith.constant 0 : i32
    %c0_i32_1 = arith.constant 0 : i32
    return %c0_i32, %c0_i32_0 : i32, i32
  }
  func.func @transform_11(%arg0: i32) -> (i32, i32) {
    %c0_i32 = arith.constant 0 : i32
    %c0_i32_0 = arith.constant 0 : i32
    %c0_i32_1 = arith.constant 0 : i32
    return %c0_i32, %c0_i32_0 : i32, i32
  }
  func.func @transform_12(%arg0: i32) -> (i32, i32) {
    %c0_i32 = arith.constant 0 : i32
    %c0_i32_0 = arith.constant 0 : i32
    %c0_i32_1 = arith.constant 0 : i32
    return %c0_i32, %c0_i32_0 : i32, i32
  }
  func.func @transform_13(%arg0: i32) -> (i32, i32) {
    %c0_i32 = arith.constant 0 : i32
    %c0_i32_0 = arith.constant 0 : i32
    %c0_i32_1 = arith.constant 0 : i32
    return %c0_i32, %c0_i32_0 : i32, i32
  }
  func.func @transform_14(%arg0: i32) -> (i32, i32) {
    %c0_i32 = arith.constant 0 : i32
    %c0_i32_0 = arith.constant 0 : i32
    %c0_i32_1 = arith.constant 0 : i32
    return %c0_i32, %c0_i32_0 : i32, i32
  }
  func.func @transform_15(%arg0: i32) -> (i32, i32) {
    %c0_i32 = arith.constant 0 : i32
    %c0_i32_0 = arith.constant 0 : i32
    %c0_i32_1 = arith.constant 0 : i32
    return %c0_i32, %c0_i32_0 : i32, i32
  }
  func.func @transform_16(%arg0: i32) -> (i32, i32) {
    %c0_i32 = arith.constant 0 : i32
    %c0_i32_0 = arith.constant 0 : i32
    %c0_i32_1 = arith.constant 0 : i32
    return %c0_i32, %c0_i32_0 : i32, i32
  }
  func.func @transform_17(%arg0: i32) -> (i32, i32) {
    %c0_i32 = arith.constant 0 : i32
    %c0_i32_0 = arith.constant 0 : i32
    %c0_i32_1 = arith.constant 0 : i32
    return %c0_i32, %c0_i32_0 : i32, i32
  }
  func.func @transform_18(%arg0: i32) -> (i32, i32) {
    %c0_i32 = arith.constant 0 : i32
    %c0_i32_0 = arith.constant 0 : i32
    %c0_i32_1 = arith.constant 0 : i32
    return %c0_i32, %c0_i32_0 : i32, i32
  }
  func.func @transform_19(%arg0: i32) -> (i32, i32) {
    %c0_i32 = arith.constant 0 : i32
    %c0_i32_0 = arith.constant 0 : i32
    %c0_i32_1 = arith.constant 0 : i32
    return %c0_i32, %c0_i32_0 : i32, i32
  }
  func.func @transform_20(%arg0: i32) -> (i32, i32) {
    %c0_i32 = arith.constant 0 : i32
    %c0_i32_0 = arith.constant 0 : i32
    return %arg0, %c0_i32 : i32, i32
  }
}

</mosaic_0001>

<bundles_post_ra>
// kernel: lenet5_forward.1
= control target key start
LH: loop header
LB: loop body
LE: loop exit
PB: predicated region body
PF: predicated region fallthrough
CT: control target
= control target key end

     0   :  { %s9660_s0 = inlined_call_operand.vmem [shape: bf16[896,84], index: 0, kind: input, shape index: {}]   ;;  %s9661_s1 = inlined_call_operand.vmem [shape: bf16[84,156], index: 1, kind: input, shape index: {}]   ;;  %s9662_s2 = inlined_call_operand.vmem [shape: f32[1,156], index: 2, kind: input, shape index: {}]   ;;  %s9663_s3 = inlined_call_operand.vmem [shape: bf16[208,448], index: 3, kind: input, shape index: {}]   ;;  %s9664_s4 = inlined_call_operand.vmem [shape: bf16[208,448], index: 4, kind: input, shape index: {}]   ;;  %s9665_s5 = inlined_call_operand.vmem [shape: bf16[156,128], index: 5, kind: input, shape index: {}]   ;;  %s9666_s6 = inlined_call_operand.vmem [shape: bf16[156,128], index: 6, kind: input, shape index: {}]   ;;  %s9667_s7 = inlined_call_operand.vmem [shape: bf16[384,176], index: 7, kind: input, shape index: {}]   ;;  %s9668_s8 = inlined_call_operand.vmem [shape: f32[1,176], index: 8, kind: input, shape index: {}]   ;;  %s9669_s9 = inlined_call_operand.vmem [shape: bf16[80,206], index: 9, kind: input, shape index: {}]   ;;  %s9670_s10 = inlined_call_operand.vmem [shape: bf16[80,206], index: 10, kind: input, shape index: {}]   ;;  %s9671_s11 = inlined_call_operand.vmem [shape: bf16[176,128], index: 11, kind: input, shape index: {}]   ;;  %s9672_s12 = inlined_call_operand.vmem [shape: bf16[176,128], index: 12, kind: input, shape index: {}]   ;;  %s9673_s13 = inlined_call_operand.vmem [shape: bf16[640,120], index: 13, kind: input, shape index: {}]   ;;  %s9674_s14 = inlined_call_operand.vmem [shape: f32[1,120], index: 14, kind: input, shape index: {}]   ;;  %s9675_s15 = inlined_call_operand.vmem [shape: bf16[16,76], index: 15, kind: input, shape index: {}]   ;;  %s9676_s16 = inlined_call_operand.vmem [shape: bf16[120,84], index: 16, kind: input, shape index: {}]   ;;  %s9677_s17 = inlined_call_operand.vmem [shape: f32[1,84], index: 17, kind: input, shape index: {}]   ;;  %s9678_s18 = inlined_call_operand.vmem [shape: bf16[84,128], index: 18, kind: input, shape index: {}]   ;;  %s9679_s19 = inlined_call_operand.vmem [shape: f32[1,128], index: 19, kind: input, shape index: {}]   ;;  %s9680_s20 = inlined_call_operand.hbm [shape: f32[32,128], index: 20, kind: output, shape index: {}]  }
   0x1   :  { %9701 = sst [smem:[#allocation92_spill]] %s9660_s0 }
   0x2   :  { %9702 = sst [smem:[#allocation93_spill]] %s9661_s1 }
   0x3   :  { %9703 = sst [smem:[#allocation94_spill]] %s9662_s2 }
   0x4   :  { %9704 = sst [smem:[#allocation95_spill]] %s9663_s3 }
   0x5   :  { %9705 = sst [smem:[#allocation96_spill]] %s9664_s4 }
   0x6   :  { %9706 = sst [smem:[#allocation97_spill]] %s9665_s5 }
   0x7   :  { %9707 = sst [smem:[#allocation98_spill]] %s9666_s6 }
   0x8   :  { %9708 = sst [smem:[#allocation99_spill]] %s9680_s20 }
   0x9   :  { %25 = vsyncpa [#allocation3], 0 }
   0xa   :  { %27 = vsyncpa [#allocation3 + $0x1], 0  ;;  %s7277_s1 = smov 0   ;;  %s7279_s22 = smov 0  }
   0xb   :  { %s7281_s23 = smov 0   ;;  %s7283_s24 = smov 0  }
   0xc LB: > { %9709 = sst [smem:[#allocation5_spill]] %s7152_s1  ;;  %s7298_s2 = sadd.s32 4294967295, %s7164_s24   ;;  %s7164_s24 = sphi %s7283_s24, %s9909_s24   ;;  %s7160_s23 = sphi %s7281_s23, %s9911_s23   ;;  %s7156_s22 = sphi %s7279_s22, %s9913_s22   ;;  %s7152_s1 = sphi %s7277_s1, %s9912_s1  }
   0xd   : > { %9710 = sst [smem:[#allocation6_spill]] %s7160_s23  ;;  %s6009_s25 = sadd.s32 4294967294, %s7164_s24  }
   0xe   : > { %9711 = sst [smem:[#allocation7_spill]] %s7164_s24  ;;  %s7302_s3 = sadd.s32 1, %s7164_s24  }
   0xf   : > { %9712 = sst [smem:[#allocation8_spill]] %s7302_s3  ;;  %s465_s26 = sadd.s32 1, %s7160_s23 }
  0x10   : > { %s462_s27 = ssub.s32 %s7164_s24, %s7302_s3  ;;  %p475_p0 = scmp.ne.s32.totalorder %s7160_s23, %s7156_s22 }
  0x11   : > { %p463_p1 = scmp.eq.s32.totalorder %s462_s27, 0  ;;  %p476_p2 = scmp.eq.s32.totalorder %s7298_s2, 1 }
  0x12   : > { %p481_p3 = scmp.ne.s32.totalorder %s7156_s22, %s7152_s1  ;;  %p482_p4 = scmp.eq.s32.totalorder %s6009_s25, 1 }
  0x13   : > { %s7313_s28 = scalar_select %p463_p1, %s7160_s23, %s465_s26  }
  0x14   : > { %p7315_p5 = por %p476_p2, %p475_p0  ;;  %p7319_p6 = por %p482_p4, %p481_p3 }
  0x15   : > { %9713 = sst [smem:[#allocation9_spill]] %s7313_s28  ;;  %p6012_p7 = scmp.ge.s32.totalorder %s7164_s24, 1 }
  0x16   : > { %s9715_s29 = scalar_select %p7319_p6, 1, 0 }
  0x17   : > { %p566_p8 = scmp.lt.s32.totalorder %s7164_s24, 3 }
  0x18   : > { %9716 = sst [smem:[#allocation10_spill]] %s9715_s29 }
  0x19   : > { %p567_p9 = pnand %p6012_p7, %p566_p8 }
  0x1b   : > { %570 = sbr.rel (%p567_p9) target bundleno = 3015 (0xbc7), region = 100 }
  0x20   : > { %s9717_s21 = sld [smem:[#allocation93_spill]]  ;;  %vm991_vm0 = vcmask 1041408   ;;  %v9693_v4 = vmov 0   ;;  %s624_s27 = smul.u32 56, %s7298_s2  ;;  %vm906_vm1 = vcmask 687104   ;;  %v701_v38 = vlaneseq }
  0x21   : > { %1030 = vmatprep.mubr.bf16.mxu0 %v9693_v4  ;;  %s9718_s24 = sld [smem:[#allocation92_spill]]  ;;  %vm1778_vm2 = vcmask 523264   ;;  %vm3005_vm3 = vcmask 1045504   ;;  %vm2965_vm4 = vcmask 228352   ;;  %vm3534_vm5 = vcmask 1046528   ;;  %s6438_s26 = sshll.u32 %s7298_s2, 8 }
  0x22   : > { %p625_p10 = scmp.lt.s32.totalorder %s624_s27, 111  ;;  %v7437_v40 = vshrl.u32 %v701_v38, 7  ;;  %s9720_s28 = sld [smem:[#allocation94_spill]]  ;;  %vm3404_vm6 = vsmask.f32 7424  ;;  %vm4332_vm7 = vcmask 637952  }
  0x23   : > { %s9721_s1 = sld [smem:[#allocation95_spill]]  ;;  %vm4709_vm8 = vcmask 392192   ;;  %vm5037_vm9 = vsmask.f32 6400  ;;  %vm7168_vm10 = vmmov 0   ;;  %vm5765_vm11 = vcmask 1043456  }
  0x24   : > { %s9915_s27 = smov (!%p625_p10, %s624_s27), 111  ;;  %9719 = vst [vmem:[#allocation11_spill] sm:$0xff] %v7437_v40  ;;  %v9692_v41 = vsub.s32 0, %v7437_v40  ;;  %s9723_s25 = sld [smem:[#allocation96_spill]]  ;;  %vm5645_vm12 = vcmask 621568   ;;  %vm5761_vm13 = vcmask 982016  }
  0x25   : > { %s6014_s3 = sshll.u32 %s9915_s27, 2  ;;  %s9725_s5 = sld [smem:[#allocation97_spill]] }
  0x26   : > { %v698_v0 = vld [vmem:[%s9717_s21 + $0x50] sm:$0x33]  ;;  %v6698_v3 = vld [vmem:[%s9717_s21 + $0x44] ss:$8 sps:$4 sm:$0xff]   ;;  %v6700_v6 = vld [vmem:[%s9717_s21 + $0x40] ss:$8 sps:$4 sm:$0xff]  }
  0x27   : > { %v6054_v1 = vcombine.high %v698_v0, %v698_v0  ;;  %v6053_v2 = vcombine.low %v698_v0, %v698_v0  ;;  %v6701_v7 = vld [vmem:[%s9717_s21 + $0x34] ss:$8 sps:$4 sm:$0xff]   ;;  %v6703_v8 = vld [vmem:[%s9717_s21 + $0x30] ss:$8 sps:$4 sm:$0xff]   ;;  %s7347_s20 = scalar_lea.vmem %s9718_s24, %s6014_s3  ;;  %v6704_v9 = vld [vmem:[%s9717_s21 + $0x24] ss:$8 sps:$4 sm:$0xff]  }
  0x28   : > { %v6706_v10 = vld [vmem:[%s9717_s21 + $0x20] ss:$8 sps:$4 sm:$0xff]   ;;  %v6707_v11 = vld [vmem:[%s9717_s21 + $0x14] ss:$8 sps:$4 sm:$0xff]   ;;  %v6709_v12 = vld [vmem:[%s9717_s21 + $0x10] ss:$8 sps:$4 sm:$0xff]  }
  0x29   : > { %6055 = vmatprep.subr.msk.bf16.mxu0 %vm991_vm0, %v6054_v1  ;;  %v993_v5 = vsel %vm991_vm0, %v6053_v2, 0  ;;  %v6710_v13 = vld [vmem:[%s9717_s21 + $0x4] ss:$8 sps:$4 sm:$0xff]   ;;  %v6712_v14 = vld [vmem:[%s9717_s21] ss:$8 sps:$4 sm:$0xff]   ;;  %v6715_v17 = vld [vmem:[%s7347_s20 + $0x10] sm:$0xff]   ;;  %s9722_s3 = smov %s9721_s1 }
  0x2a   : > { %1003 = vmatpush1.bf16.msra.mxu0 %v993_v5  ;;  %v6713_v15 = vld [vmem:[%s7347_s20] sm:$0xff]   ;;  %v6714_v16 = vld [vmem:[%s7347_s20 + $0x8] sm:$0xff]   ;;  %v6716_v18 = vld [vmem:[%s7347_s20 + $0x18] sm:$0xff]   ;;  %s9726_s6 = sld [smem:[#allocation98_spill]]  ;;  %s621_s24 = sand.u32 1, %s7156_s22  }
  0x2b   : > { %1004 = vmatprep.subr.bf16.mxu0 %v6698_v3  ;;  %v6717_v19 = vld [vmem:[%s7347_s20 + $0x20] sm:$0xff]   ;;  %v6718_v20 = vld [vmem:[%s7347_s20 + $0x28] sm:$0xff]   ;;  %v6719_v21 = vld [vmem:[%s7347_s20 + $0x30] sm:$0xff]   ;;  %s6013_s29 = sshll.u32 %s621_s24, 4  ;;  %s9905_s27 = sld [smem:[#allocation99_spill]] }
  0x2c   : > { %v6720_v22 = vld [vmem:[%s7347_s20 + $0x38] sm:$0xff]   ;;  %v6721_v23 = vld [vmem:[%s7347_s20 + $0x40] sm:$0xff]   ;;  %v6722_v24 = vld [vmem:[%s7347_s20 + $0x48] sm:$0xff]   ;;  %s623_s30 = scalar_lea.vmem [#allocation2], %s6013_s29  ;;  %s7169_s29 = smov [#allocation2]  }
  0x2d   : > { %v6723_v25 = vld [vmem:[%s7347_s20 + $0x50] sm:$0xff]   ;;  %v6724_v26 = vld [vmem:[%s7347_s20 + $0x58] sm:$0xff]   ;;  %v6725_v27 = vld [vmem:[%s7347_s20 + $0x60] sm:$0xff]   ;;  %s5947_s0 = sshll.u32 %s623_s30, 4  ;;  %s9618_s0 = int_to_ptr.vmem [resolvable:$true] %s5947_s0 }
  0x2e   : > { %1005 = vmatpush1.bf16.msra.mxu0 %v6700_v6  ;;  %v6726_v28 = vld [vmem:[%s7347_s20 + $0x68] sm:$0xff]   ;;  %v6727_v29 = vld [vmem:[%s7347_s20 + $0x70] sm:$0xff]   ;;  %v6728_v30 = vld [vmem:[%s7347_s20 + $0x78] sm:$0xff]   ;;  %s7104_s2 = scalar_lea.vmem %s9618_s0, 256 }
  0x2f   : > { %1006 = vmatprep.subr.bf16.mxu0 %v6701_v7  ;;  %v6729_v31 = vld [vmem:[%s7347_s20 + $0x80] sm:$0xff]   ;;  %v6730_v32 = vld [vmem:[%s7347_s20 + $0x88] sm:$0xff]   ;;  %v6731_v33 = vld [vmem:[%s7347_s20 + $0x90] sm:$0xff]   ;;  %p7105_p11 = scmp.ne.s32.totalorder %s9618_s0, %s7104_s2 }
  0x30   : > { %v6732_v34 = vld [vmem:[%s7347_s20 + $0x98] sm:$0xff]   ;;  %v6733_v35 = vld [vmem:[%s7347_s20 + $0xa0] sm:$0xff]   ;;  %v6734_v36 = vld [vmem:[%s7347_s20 + $0xa8] sm:$0xff]  }
  0x31   : > { %v6735_v37 = vld [vmem:[%s7347_s20 + $0xb0] sm:$0xff]   ;;  %v6736_v39 = vld [vmem:[%s7347_s20 + $0xb8] sm:$0xff]   ;;  %v699_v42 = vld [vmem:[%s9720_s28] sm:$0x3]  ;;  %p7106_p12 = pnand %p7105_p11, %p7315_p5 }
  0x32   : > { %1007 = vmatpush1.bf16.msra.mxu0 %v6703_v8  ;;  %v6737_v43 = vld [vmem:[%s7347_s20 + $0xc0] sm:$0xff]   ;;  %v7448_v44 = vrot.slane %v699_v42, %v9692_v41  ;;  %v6738_v49 = vld [vmem:[%s7347_s20 + $0xc8] sm:$0xff]   ;;  %v6739_v59 = vld [vmem:[%s7347_s20 + $0xd0] sm:$0xff]  }
  0x33   : > { %1008 = vmatprep.subr.bf16.mxu0 %v6704_v9  ;;  %v6740_v5 = vld [vmem:[%s7347_s20 + $0xd8] sm:$0xff]   ;;  %s9620_s20 = scalar_lea.sflag [#allocation3], %s621_s24  ;;  %p7107_p13 = pneg %p7106_p12 }
  0x36   : > { %1009 = vmatpush1.bf16.msra.mxu0 %v6706_v10 }
  0x37   : > { %1010 = vmatprep.subr.bf16.mxu0 %v6707_v11 }
  0x3a   : > { %1011 = vmatpush1.bf16.msra.mxu0 %v6709_v12 }
  0x3b   : > { %1012 = vmatprep.subr.bf16.mxu0 %v6710_v13  ;;  %v6743_v13 = vld [vmem:[%s9721_s1 + $0x4] ss:$16 sps:$4 sm:$0xff]   ;;  %s9616_s1 = scalar_lea.hbm %s9905_s27, %s6438_s26 }
  0x3c   : > { %1850 = vmatprep.mubr.bf16.mxu1 %v6743_v13 }
  0x3e   : > { %1013 = vmatpush1.bf16.msra.mxu0 %v6712_v14 }
  0x41   : > { %6056 = vmatmul.mubr.msk.bf16.vlgmr.msra.gmra.mxu0 %vm906_vm1, %v6713_v15 }
  0x42   : > { %1040 = vmatprep.mubr.bf16.mxu0 %v9693_v4 }
  0x49   : > { %6057 = vmatmul.mubr.msk.bf16.gmra.mxu0 %vm906_vm1, %v6714_v16 }
  0x4a   : > { %1050 = vmatprep.mubr.bf16.mxu0 %v9693_v4 }
  0x51   : > { %6058 = vmatmul.mubr.msk.bf16.gmra.mxu0 %vm906_vm1, %v6715_v17 }
  0x52   : > { %1060 = vmatprep.mubr.bf16.mxu0 %v9693_v4 }
  0x59   : > { %6059 = vmatmul.mubr.msk.bf16.gmra.mxu0 %vm906_vm1, %v6716_v18 }
  0x5a   : > { %1070 = vmatprep.mubr.bf16.mxu0 %v9693_v4 }
  0x61   : > { %6060 = vmatmul.mubr.msk.bf16.gmra.mxu0 %vm906_vm1, %v6717_v19 }
  0x62   : > { %1080 = vmatprep.mubr.bf16.mxu0 %v9693_v4 }
  0x69   : > { %6061 = vmatmul.mubr.msk.bf16.gmra.mxu0 %vm906_vm1, %v6718_v20 }
  0x6a   : > { %1090 = vmatprep.mubr.bf16.mxu0 %v9693_v4 }
  0x71   : > { %6062 = vmatmul.mubr.msk.bf16.gmra.mxu0 %vm906_vm1, %v6719_v21 }
  0x72   : > { %1100 = vmatprep.mubr.bf16.mxu0 %v9693_v4 }
  0x79   : > { %6063 = vmatmul.mubr.msk.bf16.gmra.mxu0 %vm906_vm1, %v6720_v22 }
  0x7a   : > { %1110 = vmatprep.mubr.bf16.mxu0 %v9693_v4 }
  0x81   : > { %6064 = vmatmul.mubr.msk.bf16.gmra.mxu0 %vm906_vm1, %v6721_v23 }
  0x82   : > { %1120 = vmatprep.mubr.bf16.mxu0 %v9693_v4 }
  0x89   : > { %6065 = vmatmul.mubr.msk.bf16.gmra.mxu0 %vm906_vm1, %v6722_v24  ;;  %v9691_v24 = vsub.s32 1, %v7437_v40 }
  0x8a   : > { %1130 = vmatprep.mubr.bf16.mxu0 %v9693_v4 }
  0x91   : > { %6066 = vmatmul.mubr.msk.bf16.gmra.mxu0 %vm906_vm1, %v6723_v25 }
  0x92   : > { %1140 = vmatprep.mubr.bf16.mxu0 %v9693_v4 }
  0x99   : > { %6067 = vmatmul.mubr.msk.bf16.gmra.mxu0 %vm906_vm1, %v6724_v26 }
  0x9a   : > { %1150 = vmatprep.mubr.bf16.mxu0 %v9693_v4 }
  0xa1   : > { %6068 = vmatmul.mubr.msk.bf16.gmra.mxu0 %vm906_vm1, %v6725_v27  ;;  %v7500_v27 = vrot.slane %v699_v42, %v9691_v24 }
  0xa2   : > { %1160 = vmatprep.mubr.bf16.mxu0 %v9693_v4 }
  0xa9   : > { %6069 = vmatmul.mubr.msk.bf16.gmra.mxu0 %vm906_vm1, %v6726_v28 }
  0xaa   : > { %1170 = vmatprep.mubr.bf16.mxu0 %v9693_v4 }
  0xb1   : > { %6070 = vmatmul.mubr.msk.bf16.gmra.mxu0 %vm906_vm1, %v6727_v29 }
  0xb2   : > { %1180 = vmatprep.mubr.bf16.mxu0 %v9693_v4 }
  0xb9   : > { %6071 = vmatmul.mubr.msk.bf16.gmra.mxu0 %vm906_vm1, %v6728_v30 }
  0xba   : > { %1190 = vmatprep.mubr.bf16.mxu0 %v9693_v4 }
  0xc1   : > { %6072 = vmatmul.mubr.msk.bf16.gmra.mxu0 %vm906_vm1, %v6729_v31 }
  0xc2   : > { %1200 = vmatprep.mubr.bf16.mxu0 %v9693_v4 }
  0xc9   : > { %6073 = vmatmul.mubr.msk.bf16.gmra.mxu0 %vm906_vm1, %v6730_v32 }
  0xca   : > { %1210 = vmatprep.mubr.bf16.mxu0 %v9693_v4 }
  0xd1   : > { %6074 = vmatmul.mubr.msk.bf16.gmra.mxu0 %vm906_vm1, %v6731_v33 }
  0xd2   : > { %1220 = vmatprep.mubr.bf16.mxu0 %v9693_v4 }
  0xd9   : > { %6075 = vmatmul.mubr.msk.bf16.gmra.mxu0 %vm906_vm1, %v6732_v34 }
  0xda   : > { %1230 = vmatprep.mubr.bf16.mxu0 %v9693_v4 }
  0xe1   : > { %6076 = vmatmul.mubr.msk.bf16.gmra.mxu0 %vm906_vm1, %v6733_v35 }
  0xe2   : > { %1240 = vmatprep.mubr.bf16.mxu0 %v9693_v4 }
  0xe9   : > { %6077 = vmatmul.mubr.msk.bf16.gmra.mxu0 %vm906_vm1, %v6734_v36 }
  0xea   : > { %1250 = vmatprep.mubr.bf16.mxu0 %v9693_v4 }
  0xf1   : > { %6078 = vmatmul.mubr.msk.bf16.gmra.mxu0 %vm906_vm1, %v6735_v37 }
  0xf2   : > { %1260 = vmatprep.mubr.bf16.mxu0 %v9693_v4 }
  0xf9   : > { %6079 = vmatmul.mubr.msk.bf16.gmra.mxu0 %vm906_vm1, %v6736_v39 }
  0xfa   : > { %1270 = vmatprep.mubr.bf16.mxu0 %v9693_v4 }
 0x101   : > { %v1032_v45 = vpop.f32.mrf.mxu0  ;;  %6080 = vmatmul.mubr.msk.bf16.gmra.mxu0 %vm906_vm1, %v6737_v43 }
 0x102   : > { %1280 = vmatprep.mubr.bf16.mxu0 %v9693_v4  ;;  %v1033_v47 = vadd.f32 %v1032_v45, %v7448_v44 }
 0x103   : > { %v7452_v46 = vpop.f32.mrf.mxu0 }
 0x104   : > { %v1311_v52 = vmax.f32 %v1033_v47, 0.0 }
 0x105   : > { %v1036_v48 = vpop.f32.mrf.mxu0 }
 0x106   : > { %v1037_v50 = vadd.f32 %v1036_v48, %v7448_v44 }
 0x107   : > { %v7457_v51 = vpop.f32.mrf.mxu0 }
 0x108   : > { %v1313_v53 = vmax.f32 %v1037_v50, 0.0 }
 0x109   : > { %v1042_v54 = vpop.f32.mrf.mxu0  ;;  %6081 = vmatmul.mubr.msk.bf16.gmra.mxu0 %vm906_vm1, %v6738_v49 }
 0x10a   : > { %v7460_v55 = vpack.c.bf16 %v1313_v53, %v1311_v52  ;;  %1290 = vmatprep.mubr.bf16.mxu0 %v9693_v4  ;;  %v1043_v57 = vadd.f32 %v1042_v54, %v7448_v44 }
 0x10b   : > { %v7463_v56 = vpop.f32.mrf.mxu0 }
 0x10c   : > { %v1315_v62 = vmax.f32 %v1043_v57, 0.0 }
 0x10d   : > { %v1046_v58 = vpop.f32.mrf.mxu0 }
 0x10e   : > { %v1047_v60 = vadd.f32 %v1046_v58, %v7448_v44 }
 0x10f   : > { %v7468_v61 = vpop.f32.mrf.mxu0 }
 0x110   : > { %v1317_v63 = vmax.f32 %v1047_v60, 0.0 }
 0x111   : > { %v7470_v0 = vpop.f32.mrf.mxu0  ;;  %6082 = vmatmul.mubr.msk.bf16.gmra.mxu0 %vm906_vm1, %v6739_v59 }
 0x112   : > { %v7473_v1 = vpack.c.bf16 %v1317_v63, %v1315_v62  ;;  %1300 = vmatprep.mubr.bf16.mxu0 %v9693_v4 }
 0x113   : > { %v7476_v2 = vpop.f32.mrf.mxu0 }
 0x115   : > { %v7478_v3 = vpop.f32.mrf.mxu0 }
 0x117   : > { %v7481_v6 = vpop.f32.mrf.mxu0 }
 0x119   : > { %v7483_v7 = vpop.f32.mrf.mxu0  ;;  %6083 = vmatmul.mubr.msk.bf16.gmra.mxu0 %vm906_vm1, %v6740_v5 }
 0x11b   : > { %v7486_v8 = vpop.f32.mrf.mxu0 }
 0x11d   : > { %v7488_v9 = vpop.f32.mrf.mxu0 }
 0x11f   : > { %v7490_v10 = vpop.f32.mrf.mxu0 }
 0x121   : > { %v7492_v11 = vpop.f32.mrf.mxu0 }
 0x123   : > { %v1074_v12 = vpop.f32.mrf.mxu0 }
 0x125   : > { %v1076_v14 = vpop.f32.mrf.mxu0 }
 0x127   : > { %v1078_v15 = vpop.f32.mrf.mxu0 }
 0x128   : > { %v1079_v62 = vadd.f32 %v1078_v15, %v7500_v27  ;;  %v1077_v15 = vadd.f32 %v1076_v14, %v7448_v44  ;;  %v1065_v14 = vadd.f32 %v7486_v8, %v7500_v27  ;;  %v1063_v8 = vadd.f32 %v7483_v7, %v7448_v44 }
 0x129   : > { %v1082_v16 = vpop.f32.mrf.mxu0  ;;  %v1049_v7 = vadd.f32 %v7468_v61, %v7500_v27 }
 0x12b   : > { %v1084_v17 = vpop.f32.mrf.mxu0 }
 0x12c   : > { %v1085_v50 = vadd.f32 %v1084_v17, %v7500_v27 }
 0x12d   : > { %v1086_v18 = vpop.f32.mrf.mxu0 }
 0x12e   : > { %v1087_v57 = vadd.f32 %v1086_v18, %v7448_v44  ;;  %v1075_v18 = vadd.f32 %v1074_v12, %v7500_v27  ;;  %v1073_v12 = vadd.f32 %v7492_v11, %v7448_v44  ;;  %v1059_v11 = vadd.f32 %v7481_v6, %v7500_v27 }
 0x12f   : > { %v1088_v19 = vpop.f32.mrf.mxu0  ;;  %v1057_v6 = vadd.f32 %v7478_v3, %v7448_v44  ;;  %v1045_v3 = vadd.f32 %v7463_v56, %v7500_v27  ;;  %v1035_v56 = vadd.f32 %v7452_v46, %v7500_v27 }
 0x130   : > { %v1089_v39 = vadd.f32 %v1088_v19, %v7500_v27  ;;  %v1083_v19 = vadd.f32 %v1082_v16, %v7448_v44  ;;  %v1069_v16 = vadd.f32 %v7490_v10, %v7500_v27  ;;  %v1067_v10 = vadd.f32 %v7488_v9, %v7448_v44 }
 0x131   : > { %v1092_v20 = vpop.f32.mrf.mxu0  ;;  %v1055_v9 = vadd.f32 %v7476_v2, %v7500_v27  ;;  %v1053_v2 = vadd.f32 %v7470_v0, %v7448_v44 }
 0x132   : > { %v1093_v47 = vadd.f32 %v1092_v20, %v7448_v44  ;;  %v1334_v63 = vmax.f32 %v1089_v39, 0.0  ;;  %v1326_v39 = vmax.f32 %v1069_v16, 0.0 }
 0x133   : > { %v1094_v21 = vpop.f32.mrf.mxu0 }
 0x134   : > { %v1095_v34 = vadd.f32 %v1094_v21, %v7500_v27  ;;  %v1335_v17 = vmax.f32 %v1093_v47, 0.0  ;;  %v1332_v21 = vmax.f32 %v1085_v50, 0.0 }
 0x135   : > { %v1096_v22 = vpop.f32.mrf.mxu0 }
 0x136   : > { %v1097_v36 = vadd.f32 %v1096_v22, %v7448_v44  ;;  %v1336_v52 = vmax.f32 %v1095_v34, 0.0  ;;  %v1328_v34 = vmax.f32 %v1075_v18, 0.0  ;;  %v1318_v18 = vmax.f32 %v1049_v7, 0.0 }
 0x137   : > { %v1098_v23 = vpop.f32.mrf.mxu0 }
 0x138   : > { %v1099_v29 = vadd.f32 %v1098_v23, %v7500_v27  ;;  %v1337_v58 = vmax.f32 %v1097_v36, 0.0  ;;  %v1329_v36 = vmax.f32 %v1077_v15, 0.0 }
 0x139   : > { %v1102_v25 = vpop.f32.mrf.mxu0 }
 0x13a   : > { %v1103_v32 = vadd.f32 %v1102_v25, %v7448_v44  ;;  %v1338_v42 = vmax.f32 %v1099_v29, 0.0  ;;  %v1333_v25 = vmax.f32 %v1087_v57, 0.0  ;;  %v1330_v29 = vmax.f32 %v1079_v62, 0.0 }
 0x13b   : > { %v1104_v26 = vpop.f32.mrf.mxu0  ;;  %v1323_v62 = vmax.f32 %v1063_v8, 0.0 }
 0x13c   : > { %v1105_v30 = vadd.f32 %v1104_v26, %v7500_v27  ;;  %v1339_v48 = vmax.f32 %v1103_v32, 0.0  ;;  %v1436_v13 = vpack.c.bf16 %v1338_v42, %v1336_v52  ;;  %v1435_v26 = vpack.c.bf16 %v1337_v58, %v1335_v17 }
 0x13d   : > { %v1106_v28 = vpop.f32.mrf.mxu0  ;;  %v1331_v32 = vmax.f32 %v1083_v19, 0.0  ;;  %v1322_v58 = vmax.f32 %v1059_v11, 0.0  ;;  %v1039_v17 = vadd.f32 %v7457_v51, %v7500_v27  ;;  %v1312_v51 = vmax.f32 %v1035_v56, 0.0 }
 0x13e   : > { %v1107_v31 = vadd.f32 %v1106_v28, %v7448_v44  ;;  %v1340_v43 = vmax.f32 %v1105_v30, 0.0 }
 0x13f   : > { %v1108_v33 = vpop.f32.mrf.mxu0 }
 0x140   : > { %v1109_v35 = vadd.f32 %v1108_v33, %v7500_v27  ;;  %v1341_v37 = vmax.f32 %v1107_v31, 0.0  ;;  %v1434_v31 = vpack.c.bf16 %v1334_v63, %v1332_v21  ;;  %v1319_v21 = vmax.f32 %v1053_v2, 0.0 }
 0x141   : > { %v1112_v38 = vpop.f32.mrf.mxu0 }
 0x142   : > { %v1342_v45 = vmax.f32 %v1109_v35, 0.0  ;;  %v1113_v53 = vadd.f32 %v1112_v38, %v7448_v44  ;;  %v1437_v60 = vpack.c.bf16 %v1341_v37, %v1339_v48  ;;  %v1433_v37 = vpack.c.bf16 %v1333_v25, %v1331_v32 }
 0x143   : > { %v7511_v49 = vpop.f32.mrf.mxu0  ;;  %v1324_v48 = vmax.f32 %v1065_v14, 0.0 }
 0x144   : > { %v1438_v54 = vpack.c.bf16 %v1342_v45, %v1340_v43  ;;  %v1343_v22 = vmax.f32 %v1113_v53, 0.0  ;;  %v1432_v43 = vpack.c.bf16 %v1330_v29, %v1328_v34  ;;  %v1327_v45 = vmax.f32 %v1073_v12, 0.0 }
 0x145   : > { %v1116_v59 = vpop.f32.mrf.mxu0  ;;  %v1325_v53 = vmax.f32 %v1067_v10, 0.0 }
 0x146   : > { %v1117_v5 = vadd.f32 %v1116_v59, %v7448_v44  ;;  %1818 = vmatprep.subr.bf16.mxu1 %v1438_v54  ;;  %2482 = vmatprep.subr.bf16.mxu0 %v1438_v54  ;;  %v1431_v54 = vpack.c.bf16 %v1329_v36, %v1327_v45 }
 0x147   : > { %v7519_v20 = vpop.f32.mrf.mxu0  ;;  %1819 = vmatpush1.bf16.msra.mxu1 %v1437_v60  ;;  %2483 = vmatpush1.bf16.msra.mxu0 %v1437_v60  ;;  %v1430_v60 = vpack.c.bf16 %v1326_v39, %v1324_v48  ;;  %v1429_v61 = vpack.c.bf16 %v1325_v53, %v1323_v62 }
 0x148   : > { %v1345_v23 = vmax.f32 %v1117_v5, 0.0  ;;  %1820 = vmatprep.subr.bf16.mxu1 %v1436_v13  ;;  %2484 = vmatprep.subr.bf16.mxu0 %v1436_v13  ;;  %v1320_v5 = vmax.f32 %v1055_v9, 0.0  ;;  %v1321_v13 = vmax.f32 %v1057_v6, 0.0 }
 0x149   : > { %v1122_v28 = vpop.f32.mrf.mxu0 }
 0x14a   : > { %v7525_v30 = vpack.c.bf16 %v1345_v23, %v1343_v22  ;;  %v1123_v35 = vadd.f32 %v1122_v28, %v7448_v44  ;;  %v1428_v0 = vpack.c.bf16 %v1322_v58, %v1320_v5  ;;  %v1316_v23 = vmax.f32 %v1045_v3, 0.0 }
 0x14b   : > { %v7529_v33 = vpop.f32.mrf.mxu0  ;;  %1821 = vmatpush1.bf16.msra.mxu1 %v1435_v26  ;;  %2485 = vmatpush1.bf16.msra.mxu0 %v1435_v26  ;;  %v1427_v15 = vpack.c.bf16 %v1321_v13, %v1319_v21  ;;  %v1314_v26 = vmax.f32 %v1039_v17, 0.0 }
 0x14c   : > { %1822 = vmatprep.subr.bf16.mxu1 %v1434_v31  ;;  %2486 = vmatprep.subr.bf16.mxu0 %v1434_v31  ;;  %v1347_v50 = vmax.f32 %v1123_v35, 0.0  ;;  %v1426_v28 = vpack.c.bf16 %v1318_v18, %v1316_v23 }
 0x14d   : > { %v1126_v38 = vpop.f32.mrf.mxu0  ;;  %v1424_v31 = vpack.c.bf16 %v1314_v26, %v1312_v51 }
 0x14e   : > { %v1127_v42 = vadd.f32 %v1126_v38, %v7448_v44 }
 0x14f   : > { %v7541_v47 = vpop.f32.mrf.mxu0  ;;  %1823 = vmatpush1.bf16.msra.mxu1 %v1433_v37  ;;  %2487 = vmatpush1.bf16.msra.mxu0 %v1433_v37 }
 0x150   : > { %v1349_v52 = vmax.f32 %v1127_v42, 0.0  ;;  %1824 = vmatprep.subr.bf16.mxu1 %v1432_v43  ;;  %2488 = vmatprep.subr.bf16.mxu0 %v1432_v43 }
 0x151   : > { %v7547_v57 = vpop.f32.mrf.mxu0 }
 0x152   : > { %v7551_v59 = vpack.c.bf16 %v1349_v52, %v1347_v50 }
 0x153   : > { %v7555_v63 = vpop.f32.mrf.mxu0  ;;  %1825 = vmatpush1.bf16.msra.mxu1 %v1431_v54  ;;  %2489 = vmatpush1.bf16.msra.mxu0 %v1431_v54 }
 0x154   : > { %1826 = vmatprep.subr.bf16.mxu1 %v1430_v60  ;;  %2490 = vmatprep.subr.bf16.mxu0 %v1430_v60 }
 0x155   : > { %v7559_v19 = vpop.f32.mrf.mxu0 }
 0x157   : > { %v7563_v22 = vpop.f32.mrf.mxu0  ;;  %1827 = vmatpush1.bf16.msra.mxu1 %v1429_v61  ;;  %2491 = vmatpush1.bf16.msra.mxu0 %v1429_v61 }
 0x158   : > { %1828 = vmatprep.subr.bf16.mxu1 %v1428_v0  ;;  %2492 = vmatprep.subr.bf16.mxu0 %v1428_v0 }
 0x159   : > { %v7567_v25 = vpop.f32.mrf.mxu0 }
 0x15b   : > { %v7569_v16 = vpop.f32.mrf.mxu0  ;;  %1829 = vmatpush1.bf16.msra.mxu1 %v1427_v15  ;;  %2493 = vmatpush1.bf16.msra.mxu0 %v1427_v15 }
 0x15c   : > { %1830 = vmatprep.subr.bf16.mxu1 %v1426_v28  ;;  %2494 = vmatprep.subr.bf16.mxu0 %v1426_v28 }
 0x15d   : > { %v7571_v29 = vpop.f32.mrf.mxu0 }
 0x15f   : > { %v7573_v12 = vpop.f32.mrf.mxu0  ;;  %1831 = vmatpush1.bf16.msra.mxu1 %v7473_v1  ;;  %2495 = vmatpush1.bf16.msra.mxu0 %v7473_v1 }
 0x160   : > { %1832 = vmatprep.subr.bf16.mxu1 %v1424_v31  ;;  %2496 = vmatprep.subr.bf16.mxu0 %v1424_v31 }
 0x161   : > { %v7577_v46 = vpop.f32.mrf.mxu0 }
 0x163   : > { %v1154_v32 = vpop.f32.mrf.mxu0  ;;  %1833 = vmatpush1.bf16.msra.mxu1 %v7460_v55  ;;  %2497 = vmatpush1.bf16.msra.mxu0 %v7460_v55 }
 0x165   : > { %v1156_v14 = vpop.f32.mrf.mxu0 }
 0x167   : > { %v1158_v34 = vpop.f32.mrf.mxu0 }
 0x168   : > { %v1159_v21 = vadd.f32 %v1158_v34, %v7500_v27  ;;  %v1155_v34 = vadd.f32 %v1154_v32, %v7500_v27  ;;  %v1153_v32 = vadd.f32 %v7577_v46, %v7448_v44 }
 0x169   : > { %v1162_v35 = vpop.f32.mrf.mxu0 }
 0x16b   : > { %v1164_v10 = vpop.f32.mrf.mxu0 }
 0x16c   : > { %v1165_v17 = vadd.f32 %v1164_v10, %v7500_v27 }
 0x16d   : > { %v1166_v36 = vpop.f32.mrf.mxu0 }
 0x16e   : > { %v1167_v56 = vadd.f32 %v1166_v36, %v7448_v44  ;;  %v1364_v36 = vmax.f32 %v1165_v17, 0.0  ;;  %v1137_v17 = vadd.f32 %v7559_v19, %v7448_v44  ;;  %v1125_v19 = vadd.f32 %v7529_v33, %v7500_v27 }
 0x16f   : > { %v1168_v37 = vpop.f32.mrf.mxu0  ;;  %v1115_v33 = vadd.f32 %v7511_v49, %v7500_v27 }
 0x170   : > { %v1169_v53 = vadd.f32 %v1168_v37, %v7500_v27 }
 0x171   : > { %v1172_v38 = vpop.f32.mrf.mxu0 }
 0x172   : > { %v1173_v5 = vadd.f32 %v1172_v38, %v7448_v44  ;;  %v1366_v28 = vmax.f32 %v1169_v53, 0.0  ;;  %v1163_v38 = vadd.f32 %v1162_v35, %v7448_v44  ;;  %v1362_v35 = vmax.f32 %v1159_v21, 0.0 }
 0x173   : > { %v1174_v11 = vpop.f32.mrf.mxu0  ;;  %v1147_v53 = vadd.f32 %v7571_v29, %v7448_v44 }
 0x174   : > { %v1175_v52 = vadd.f32 %v1174_v11, %v7500_v27  ;;  %v1367_v11 = vmax.f32 %v1173_v5, 0.0 }
 0x175   : > { %v1176_v39 = vpop.f32.mrf.mxu0 }
 0x176   : > { %v1177_v54 = vadd.f32 %v1176_v39, %v7448_v44  ;;  %v1368_v18 = vmax.f32 %v1175_v52, 0.0 }
 0x177   : > { %v1178_v42 = vpop.f32.mrf.mxu0 }
 0x178   : > { %v1179_v45 = vadd.f32 %v1178_v42, %v7500_v27  ;;  %v1369_v23 = vmax.f32 %v1177_v54, 0.0  ;;  %v1149_v42 = vadd.f32 %v7573_v12, %v7500_v27  ;;  %v1145_v12 = vadd.f32 %v7569_v16, %v7500_v27 }
 0x179   : > { %v1182_v1 = vpop.f32.mrf.mxu0  ;;  %v1143_v16 = vadd.f32 %v7567_v25, %v7448_v44  ;;  %v1129_v25 = vadd.f32 %v7541_v47, %v7500_v27 }
 0x17a   : > { %v1183_v55 = vadd.f32 %v1182_v1, %v7448_v44  ;;  %v1370_v60 = vmax.f32 %v1179_v45, 0.0  ;;  %v1157_v1 = vadd.f32 %v1156_v14, %v7448_v44  ;;  %v1360_v14 = vmax.f32 %v1155_v34, 0.0 }
 0x17b   : > { %v1184_v43 = vpop.f32.mrf.mxu0  ;;  %v1356_v29 = vmax.f32 %v1145_v12, 0.0  ;;  %v6744_v12 = vld [vmem:[%s9722_s3 + $0x24] ss:$16 sps:$4 sm:$0xff]  }
 0x17c   : > { %v1185_v9 = vadd.f32 %v1184_v43, %v7500_v27  ;;  %v1371_v13 = vmax.f32 %v1183_v55, 0.0  ;;  %v1452_v37 = vpack.c.bf16 %v1370_v60, %v1368_v18  ;;  %v1365_v43 = vmax.f32 %v1167_v56, 0.0 }
 0x17d   : > { %v1186_v8 = vpop.f32.mrf.mxu0  ;;  %v1450_v55 = vpack.c.bf16 %v1366_v28, %v1364_v36  ;;  %v1361_v54 = vmax.f32 %v1157_v1, 0.0  ;;  %v1357_v18 = vmax.f32 %v1147_v53, 0.0  ;;  %v6746_v53 = vld [vmem:[%s9722_s3 + $0x20] ss:$16 sps:$4 sm:$0xff]  }
 0x17e   : > { %v1187_v48 = vadd.f32 %v1186_v8, %v7448_v44  ;;  %v1372_v2 = vmax.f32 %v1185_v9, 0.0  ;;  %v1451_v8 = vpack.c.bf16 %v1369_v23, %v1367_v11  ;;  %v1350_v11 = vmax.f32 %v1129_v25, 0.0 }
 0x17f   : > { %v1188_v50 = vpop.f32.mrf.mxu0 }
 0x180   : > { %v1189_v6 = vadd.f32 %v1188_v50, %v7500_v27  ;;  %v1373_v7 = vmax.f32 %v1187_v48, 0.0  ;;  %v1363_v50 = vmax.f32 %v1163_v38, 0.0  ;;  %v1119_v38 = vadd.f32 %v7519_v20, %v7500_v27 }
 0x181   : > { %v1192_v58 = vpop.f32.mrf.mxu0  ;;  %v1344_v20 = vmax.f32 %v1115_v33, 0.0 }
 0x182   : > { %v1374_v62 = vmax.f32 %v1189_v6, 0.0  ;;  %v1193_v3 = vadd.f32 %v1192_v58, %v7448_v44  ;;  %v1453_v15 = vpack.c.bf16 %v1373_v7, %v1371_v13  ;;  %v1139_v6 = vadd.f32 %v7563_v22, %v7500_v27 }
 0x183   : > { %v7591_v61 = vpop.f32.mrf.mxu0  ;;  %v1449_v7 = vpack.c.bf16 %v1365_v43, %v1363_v50  ;;  %v1358_v58 = vmax.f32 %v1149_v42, 0.0  ;;  %v1135_v22 = vadd.f32 %v7555_v63, %v7500_v27  ;;  %v1133_v63 = vadd.f32 %v7547_v57, %v7448_v44 }
 0x184   : > { %v1454_v0 = vpack.c.bf16 %v1374_v62, %v1372_v2  ;;  %v1375_v51 = vmax.f32 %v1193_v3, 0.0  ;;  %v1448_v62 = vpack.c.bf16 %v1362_v35, %v1360_v14  ;;  %v1359_v3 = vmax.f32 %v1153_v32, 0.0  ;;  %v6741_v32 = vld [vmem:[%s9722_s3] ss:$16 sps:$4 sm:$0xff]  }
 0x185   : > { %v1196_v26 = vpop.f32.mrf.mxu0  ;;  %v1354_v56 = vmax.f32 %v1139_v6, 0.0  ;;  %v1351_v34 = vmax.f32 %v1133_v63, 0.0  ;;  %v1346_v43 = vmax.f32 %v1119_v38, 0.0 }
 0x186   : > { %v1197_v31 = vadd.f32 %v1196_v26, %v7448_v44  ;;  %1834 = vmatprep.subr.bf16.mxu1 %v1454_v0  ;;  %2498 = vmatprep.subr.bf16.mxu0 %v1454_v0  ;;  %v1447_v0 = vpack.c.bf16 %v1361_v54, %v1359_v3  ;;  %v1355_v26 = vmax.f32 %v1143_v16, 0.0 }
 0x187   : > { %v7598_v10 = vpop.f32.mrf.mxu0  ;;  %1835 = vmatpush2.bf16.msra.mxu1 %v1453_v15  ;;  %2499 = vmatpush2.bf16.msra.mxu0 %v1453_v15  ;;  %v1446_v15 = vpack.c.bf16 %v1358_v58, %v1356_v29  ;;  %v6752_v29 = vld [vmem:[%s9722_s3 + $0x60] ss:$16 sps:$4 sm:$0xff]  }
 0x188   : > { %v1377_v39 = vmax.f32 %v1197_v31, 0.0  ;;  %1836 = vmatprep.subr.bf16.mxu1 %v1452_v37  ;;  %2500 = vmatprep.subr.bf16.mxu0 %v1452_v37  ;;  %v1353_v31 = vmax.f32 %v1137_v17, 0.0  ;;  %v1445_v47 = vpack.c.bf16 %v1357_v18, %v1355_v26 }
 0x189   : > { %v1202_v45 = vpop.f32.mrf.mxu0 }
 0x18a   : > { %v7604_v9 = vpack.c.bf16 %v1377_v39, %v1375_v51  ;;  %v1203_v48 = vadd.f32 %v1202_v45, %v7448_v44  ;;  %v1352_v51 = vmax.f32 %v1135_v22, 0.0  ;;  %v1348_v39 = vmax.f32 %v1125_v19, 0.0 }
 0x18b   : > { %v7609_v52 = vpop.f32.mrf.mxu0  ;;  %1837 = vmatpush2.bf16.msra.mxu1 %v1451_v8  ;;  %2501 = vmatpush2.bf16.msra.mxu0 %v1451_v8  ;;  %v1443_v42 = vpack.c.bf16 %v1353_v31, %v1351_v34 }
 0x18c   : > { %1838 = vmatprep.subr.bf16.mxu1 %v1450_v55  ;;  %2502 = vmatprep.subr.bf16.mxu0 %v1450_v55  ;;  %v1379_v60 = vmax.f32 %v1203_v48, 0.0  ;;  %v1444_v57 = vpack.c.bf16 %v1354_v56, %v1352_v51  ;;  %v1442_v8 = vpack.c.bf16 %v1350_v11, %v1348_v39  ;;  %v1440_v48 = vpack.c.bf16 %v1346_v43, %v1344_v20 }
 0x18d   : > { %v1206_v46 = vpop.f32.mrf.mxu0 }
 0x18e   : > { %v1207_v2 = vadd.f32 %v1206_v46, %v7448_v44 }
 0x18f   : > { %v7620_v5 = vpop.f32.mrf.mxu0  ;;  %1839 = vmatpush2.bf16.msra.mxu1 %v1449_v7  ;;  %2503 = vmatpush2.bf16.msra.mxu0 %v1449_v7 }
 0x190   : > { %v1381_v13 = vmax.f32 %v1207_v2, 0.0  ;;  %1840 = vmatprep.subr.bf16.mxu1 %v1448_v62  ;;  %2504 = vmatprep.subr.bf16.mxu0 %v1448_v62  ;;  %v6750_v62 = vld [vmem:[%s9722_s3 + $0x64] ss:$16 sps:$4 sm:$0xff]  }
 0x191   : > { %v7626_v21 = vpop.f32.mrf.mxu0 }
 0x192   : > { %v7630_v23 = vpack.c.bf16 %v1381_v13, %v1379_v60  ;;  %v6749_v60 = vld [vmem:[%s9722_s3 + $0x40] ss:$16 sps:$4 sm:$0xff]  }
 0x193   : > { %v7634_v28 = vpop.f32.mrf.mxu0  ;;  %1841 = vmatpush2.bf16.msra.mxu1 %v1447_v0  ;;  %2505 = vmatpush2.bf16.msra.mxu0 %v1447_v0  ;;  %v6753_v0 = vld [vmem:[%s9722_s3 + $0x84] ss:$16 sps:$4 sm:$0xff]  }
 0x194   : > { %1842 = vmatprep.subr.bf16.mxu1 %v1446_v15  ;;  %2506 = vmatprep.subr.bf16.mxu0 %v1446_v15 }
 0x195   : > { %v7638_v37 = vpop.f32.mrf.mxu0 }
 0x197   : > { %v7642_v36 = vpop.f32.mrf.mxu0  ;;  %1843 = vmatpush2.bf16.msra.mxu1 %v1445_v47  ;;  %2507 = vmatpush2.bf16.msra.mxu0 %v1445_v47 }
 0x198   : > { %1844 = vmatprep.subr.bf16.mxu1 %v1444_v57  ;;  %2508 = vmatprep.subr.bf16.mxu0 %v1444_v57 }
 0x199   : > { %v7646_v1 = vpop.f32.mrf.mxu0 }
 0x19b   : > { %v7648_v45 = vpop.f32.mrf.mxu0  ;;  %1845 = vmatpush2.bf16.msra.mxu1 %v1443_v42  ;;  %2509 = vmatpush2.bf16.msra.mxu0 %v1443_v42 }
 0x19c   : > { %1846 = vmatprep.subr.bf16.mxu1 %v1442_v8  ;;  %2510 = vmatprep.subr.bf16.mxu0 %v1442_v8  ;;  %v6755_v8 = vld [vmem:[%s9722_s3 + $0x80] ss:$16 sps:$4 sm:$0xff]  }
 0x19d   : > { %v7650_v35 = vpop.f32.mrf.mxu0 }
 0x19f   : > { %v7652_v55 = vpop.f32.mrf.mxu0  ;;  %1847 = vmatpush2.bf16.msra.mxu1 %v7551_v59  ;;  %2511 = vmatpush2.bf16.msra.mxu0 %v7551_v59 }
 0x1a0   : > { %1848 = vmatprep.subr.bf16.mxu1 %v1440_v48  ;;  %2512 = vmatprep.subr.bf16.mxu0 %v1440_v48 }
 0x1a1   : > { %v7656_v49 = vpop.f32.mrf.mxu0 }
 0x1a3   : > { %v1234_v50 = vpop.f32.mrf.mxu0  ;;  %1849 = vmatpush2.bf16.msra.mxu1 %v7525_v30  ;;  %2513 = vmatpush2.bf16.msra.mxu0 %v7525_v30  ;;  %v6747_v30 = vld [vmem:[%s9722_s3 + $0x44] ss:$16 sps:$4 sm:$0xff]  }
 0x1a4   : > { %3009 = vmatprep.subr.bf16.mxu0 %v9693_v4 }
 0x1a5   : > { %v7667_v59 = vpop.f32.mrf.mxu0 }
 0x1a6   : > { %1851 = vmatmul.mubr.bf16.vlgmr.msra.gmra.mxu1 %v6741_v32 }
 0x1a7   : > { %v1238_v14 = vpop.f32.mrf.mxu0  ;;  %1860 = vmatprep.mubr.bf16.mxu1 %v6744_v12 }
 0x1a9   : > { %v1242_v6 = vpop.f32.mrf.mxu0 }
 0x1ab   : > { %v1244_v54 = vpop.f32.mrf.mxu0 }
 0x1ac   : > { %v1245_v39 = vadd.f32 %v1244_v54, %v7500_v27 }
 0x1ad   : > { %v1246_v7 = vpop.f32.mrf.mxu0 }
 0x1ae   : > { %1861 = vmatmul.mubr.bf16.gmra.mxu1 %v6746_v53  ;;  %v6756_v53 = vld [vmem:[%s9722_s3 + $0xa4] ss:$16 sps:$4 sm:$0xff]  }
 0x1af   : > { %v1248_v46 = vpop.f32.mrf.mxu0  ;;  %1870 = vmatprep.mubr.bf16.mxu1 %v6747_v30 }
 0x1b0   : > { %v1249_v42 = vadd.f32 %v1248_v46, %v7500_v27  ;;  %v1243_v46 = vadd.f32 %v1242_v6, %v7448_v44  ;;  %v1225_v6 = vadd.f32 %v7648_v45, %v7500_v27  ;;  %v6758_v45 = vld [vmem:[%s9722_s3 + $0xa0] ss:$16 sps:$4 sm:$0xff]  }
 0x1b1   : > { %v1252_v58 = vpop.f32.mrf.mxu0 }
 0x1b2   : > { %v1253_v26 = vadd.f32 %v1252_v58, %v7448_v44  ;;  %v1247_v58 = vadd.f32 %v1246_v7, %v7448_v44  ;;  %v1395_v7 = vmax.f32 %v1243_v46, 0.0 }
 0x1b3   : > { %v1254_v2 = vpop.f32.mrf.mxu0 }
 0x1b4   : > { %v1255_v13 = vadd.f32 %v1254_v2, %v7500_v27  ;;  %v1399_v20 = vmax.f32 %v1253_v26, 0.0  ;;  %v1235_v2 = vadd.f32 %v1234_v50, %v7500_v27  ;;  %v1233_v50 = vadd.f32 %v7656_v49, %v7448_v44  ;;  %v6759_v49 = vld [vmem:[%s9722_s3 + $0xc4] ss:$16 sps:$4 sm:$0xff]  }
 0x1b5   : > { %v1256_v16 = vpop.f32.mrf.mxu0 }
 0x1b6   : > { %1871 = vmatmul.mubr.bf16.gmra.mxu1 %v6749_v60  ;;  %v1400_v19 = vmax.f32 %v1255_v13, 0.0  ;;  %v1257_v51 = vadd.f32 %v1256_v16, %v7448_v44  ;;  %v1396_v16 = vmax.f32 %v1245_v39, 0.0  ;;  %v1397_v13 = vmax.f32 %v1247_v58, 0.0 }
 0x1b7   : > { %v1258_v3 = vpop.f32.mrf.mxu0  ;;  %1880 = vmatprep.mubr.bf16.mxu1 %v6750_v62  ;;  %v1239_v62 = vadd.f32 %v1238_v14, %v7500_v27  ;;  %v1237_v14 = vadd.f32 %v7667_v59, %v7448_v44  ;;  %v1215_v59 = vadd.f32 %v7634_v28, %v7500_v27  ;;  %v1391_v26 = vmax.f32 %v1233_v50, 0.0 }
 0x1b8   : > { %v1259_v25 = vadd.f32 %v1258_v3, %v7500_v27  ;;  %v1401_v48 = vmax.f32 %v1257_v51, 0.0  ;;  %v1398_v3 = vmax.f32 %v1249_v42, 0.0  ;;  %v7754_v51 = vpack.c.bf16 %v1397_v13, %v1395_v7 }
 0x1b9   : > { %v1262_v22 = vpop.f32.mrf.mxu0 }
 0x1ba   : > { %v1263_v17 = vadd.f32 %v1262_v22, %v7448_v44  ;;  %v1402_v38 = vmax.f32 %v1259_v25, 0.0  ;;  %v7720_v22 = vpack.c.bf16 %v1401_v48, %v1399_v20  ;;  %v1394_v25 = vmax.f32 %v1239_v62, 0.0 }
 0x1bb   : > { %v1264_v18 = vpop.f32.mrf.mxu0  ;;  %v1384_v20 = vmax.f32 %v1215_v59, 0.0  ;;  %v6765_v59 = vld [vmem:[%s9722_s3 + $0x104] ss:$16 sps:$4 sm:$0xff]  }
 0x1bc   : > { %v1265_v56 = vadd.f32 %v1264_v18, %v7500_v27  ;;  %v1403_v31 = vmax.f32 %v1263_v17, 0.0  ;;  %v7711_v54 = vpack.c.bf16 %v1402_v38, %v1400_v19  ;;  %v1229_v18 = vadd.f32 %v7652_v55, %v7500_v27 }
 0x1bd   : > { %v1266_v15 = vpop.f32.mrf.mxu0  ;;  %v1223_v55 = vadd.f32 %v7646_v1, %v7448_v44  ;;  %v1393_v19 = vmax.f32 %v1237_v14, 0.0  ;;  %v1388_v38 = vmax.f32 %v1225_v6, 0.0 }
 0x1be   : > { %v1267_v63 = vadd.f32 %v1266_v15, %v7448_v44  ;;  %1881 = vmatmul.mubr.bf16.gmra.mxu1 %v6752_v29  ;;  %v1404_v11 = vmax.f32 %v1265_v56, 0.0  ;;  %v7736_v56 = vpack.c.bf16 %v1398_v3, %v1396_v16  ;;  %v1199_v16 = vadd.f32 %v7598_v10, %v7500_v27  ;;  %v6764_v10 = vld [vmem:[%s9722_s3 + $0xe0] ss:$16 sps:$4 sm:$0xff]  }
 0x1bf   : > { %v1268_v47 = vpop.f32.mrf.mxu0  ;;  %1890 = vmatprep.mubr.bf16.mxu1 %v6753_v0  ;;  %v1392_v0 = vmax.f32 %v1235_v2, 0.0  ;;  %v7772_v42 = vpack.c.bf16 %v1393_v19, %v1391_v26 }
 0x1c0   : > { %v1405_v57 = vmax.f32 %v1267_v63, 0.0  ;;  %v1269_v34 = vadd.f32 %v1268_v47, %v7500_v27  ;;  %v1227_v63 = vadd.f32 %v7650_v35, %v7448_v44  ;;  %v1219_v47 = vadd.f32 %v7642_v36, %v7500_v27 }
 0x1c1   : > { %v7695_v33 = vpop.f32.mrf.mxu0  ;;  %v7760_v28 = vpack.c.bf16 %v1394_v25, %v1392_v0  ;;  %v1205_v35 = vadd.f32 %v7609_v52, %v7500_v27  ;;  %v1217_v36 = vadd.f32 %v7638_v37, %v7448_v44  ;;  %v6761_v52 = vld [vmem:[%s9722_s3 + $0xc0] ss:$16 sps:$4 sm:$0xff]   ;;  %v6762_v37 = vld [vmem:[%s9722_s3 + $0xe4] ss:$16 sps:$4 sm:$0xff]  }
 0x1c2   : > { %v1406_v43 = vmax.f32 %v1269_v34, 0.0  ;;  %v7702_v32 = vpack.c.bf16 %v1405_v57, %v1403_v31  ;;  %v1213_v57 = vadd.f32 %v7626_v21, %v7448_v44  ;;  %v1387_v34 = vmax.f32 %v1223_v55, 0.0 }
 0x1c3   : > { %v7704_v12 = vpop.f32.mrf.mxu0  ;;  %v1389_v39 = vmax.f32 %v1227_v63, 0.0  ;;  %v1386_v48 = vmax.f32 %v1219_v47, 0.0  ;;  %v1385_v58 = vmax.f32 %v1217_v36, 0.0  ;;  %v1380_v3 = vmax.f32 %v1205_v35, 0.0 }
 0x1c4   : > { %v7709_v30 = vpack.c.bf16 %v1406_v43, %v1404_v11  ;;  %v1390_v11 = vmax.f32 %v1229_v18, 0.0  ;;  %v1383_v46 = vmax.f32 %v1213_v57, 0.0  ;;  %v1378_v18 = vmax.f32 %v1199_v16, 0.0 }
 0x1c5   : > { %v7715_v60 = vpop.f32.mrf.mxu0  ;;  %v7788_v2 = vpack.c.bf16 %v1389_v39, %v1387_v34  ;;  %v7792_v50 = vpack.c.bf16 %v1386_v48, %v1384_v20 }
 0x1c6   : > { %1891 = vmatmul.mubr.bf16.gmra.mxu1 %v6755_v8  ;;  %1981 = vmatprep.subr.bf16.mxu1 %v7709_v30  ;;  %v1209_v8 = vadd.f32 %v7620_v5, %v7500_v27  ;;  %v1195_v5 = vadd.f32 %v7591_v61, %v7500_v27  ;;  %v7796_v61 = vpack.c.bf16 %v1385_v58, %v1383_v46  ;;  %v6768_v58 = vld [vmem:[%s9722_s3 + $0x124] ss:$16 sps:$4 sm:$0xff]  }
 0x1c7   : > { %v7722_v29 = vpop.f32.mrf.mxu0  ;;  %1982 = vmatpush1.bf16.msra.mxu1 %v7702_v32  ;;  %1900 = vmatprep.mubr.bf16.mxu1 %v6756_v53  ;;  %v7776_v53 = vpack.c.bf16 %v1390_v11, %v1388_v38 }
 0x1c8   : > { %1983 = vmatprep.subr.bf16.mxu1 %v7711_v54  ;;  %v1382_v6 = vmax.f32 %v1209_v8, 0.0  ;;  %v1376_v13 = vmax.f32 %v1195_v5, 0.0 }
 0x1c9   : > { %v7732_v17 = vpop.f32.mrf.mxu0 }
 0x1ca   : > { %v7798_v0 = vpack.c.bf16 %v1382_v6, %v1380_v3  ;;  %v7813_v47 = vpack.c.bf16 %v1378_v18, %v1376_v13  ;;  %v1275_v3 = vadd.f32 %v7704_v12, %v7500_v27  ;;  %v1279_v6 = vadd.f32 %v7722_v29, %v7500_v27 }
 0x1cb   : > { %v7741_v15 = vpop.f32.mrf.mxu0  ;;  %1984 = vmatpush1.bf16.msra.mxu1 %v7720_v22  ;;  %v1277_v12 = vadd.f32 %v7715_v60, %v7448_v44 }
 0x1cc   : > { %1985 = vmatprep.subr.bf16.mxu1 %v7736_v56  ;;  %v1285_v48 = vadd.f32 %v7741_v15, %v7500_v27  ;;  %v1408_v29 = vmax.f32 %v1275_v3, 0.0  ;;  %v1410_v18 = vmax.f32 %v1279_v6, 0.0  ;;  %v6879_v3 = vld [vmem:[%s9723_s25 + $0x140] ss:$16 sps:$4 sm:$0xff]   ;;  %v6803_v6 = vld [vmem:[%s9722_s3 + $0xe8] ss:$16 sps:$4 sm:$0xff]  }
 0x1cd   : > { %v7756_v31 = vpop.f32.mrf.mxu0 }
 0x1ce   : > { %1901 = vmatmul.mubr.bf16.gmra.mxu1 %v6758_v45  ;;  %v1287_v16 = vadd.f32 %v7756_v31, %v7448_v44 }
 0x1cf   : > { %v7762_v1 = vpop.f32.mrf.mxu0  ;;  %1986 = vmatpush1.bf16.msra.mxu1 %v7754_v51  ;;  %1910 = vmatprep.mubr.bf16.mxu1 %v6759_v49 }
 0x1d0   : > { %1987 = vmatprep.subr.bf16.mxu1 %v7760_v28 }
 0x1d1   : > { %v1292_v43 = vpop.f32.mrf.mxu0 }
 0x1d2   : > { %v1293_v38 = vadd.f32 %v1292_v43, %v7448_v44  ;;  %v1289_v43 = vadd.f32 %v7762_v1, %v7500_v27  ;;  %v1283_v1 = vadd.f32 %v7732_v17, %v7448_v44  ;;  %v1273_v17 = vadd.f32 %v7695_v33, %v7448_v44 }
 0x1d3   : > { %v1294_v21 = vpop.f32.mrf.mxu0  ;;  %1988 = vmatpush1.bf16.msra.mxu1 %v7772_v42 }
 0x1d4   : > { %1989 = vmatprep.subr.bf16.mxu1 %v7776_v53  ;;  %v1295_v25 = vadd.f32 %v1294_v21, %v7500_v27  ;;  %v6767_v21 = vld [vmem:[%s9722_s3 + $0x100] ss:$16 sps:$4 sm:$0xff]   ;;  %v1411_v31 = vmax.f32 %v1283_v1, 0.0  ;;  %v1407_v33 = vmax.f32 %v1273_v17, 0.0  ;;  %v6801_v1 = vld [vmem:[%s9722_s3 + $0xec] ss:$16 sps:$4 sm:$0xff]  }
 0x1d5   : > { %v1296_v62 = vpop.f32.mrf.mxu0  ;;  %v6806_v17 = vld [vmem:[%s9722_s3 + $0x108] ss:$16 sps:$4 sm:$0xff]  }
 0x1d6   : > { %1911 = vmatmul.mubr.bf16.gmra.mxu1 %v6761_v52  ;;  %v1416_v11 = vmax.f32 %v1295_v25, 0.0  ;;  %v1297_v35 = vadd.f32 %v1296_v62, %v7448_v44  ;;  %v6770_v25 = vld [vmem:[%s9722_s3 + $0x120] ss:$16 sps:$4 sm:$0xff]  }
 0x1d7   : > { %v1298_v14 = vpop.f32.mrf.mxu0  ;;  %1990 = vmatpush1.bf16.msra.mxu1 %v7788_v2  ;;  %1920 = vmatprep.mubr.bf16.mxu1 %v6762_v37  ;;  %v1415_v37 = vmax.f32 %v1293_v38, 0.0  ;;  %v6825_v38 = vld [vmem:[%s9723_s25 + $0x20] ss:$16 sps:$4 sm:$0xff]  }
 0x1d8   : > { %1991 = vmatprep.subr.bf16.mxu1 %v7792_v50  ;;  %v1299_v55 = vadd.f32 %v1298_v14, %v7500_v27  ;;  %v1417_v5 = vmax.f32 %v1297_v35, 0.0  ;;  %v1412_v14 = vmax.f32 %v1285_v48, 0.0  ;;  %v6776_v35 = vld [vmem:[%s9722_s3 + $0x160] ss:$16 sps:$4 sm:$0xff]   ;;  %v6780_v48 = vld [vmem:[%s9722_s3 + $0x8] ss:$16 sps:$4 sm:$0xff]  }
 0x1d9   : > { %v1302_v7 = vpop.f32.mrf.mxu0 }
 0x1da   : > { %v1303_v45 = vadd.f32 %v1302_v7, %v7448_v44  ;;  %v1418_v34 = vmax.f32 %v1299_v55, 0.0  ;;  %v1414_v7 = vmax.f32 %v1289_v43, 0.0  ;;  %v7846_v13 = vpack.c.bf16 %v1417_v5, %v1415_v37  ;;  %v6821_v55 = vld [vmem:[%s9723_s25 + $0x4] ss:$16 sps:$4 sm:$0xff]   ;;  %v6783_v43 = vld [vmem:[%s9722_s3 + $0x2c] ss:$16 sps:$4 sm:$0xff]  }
 0x1db   : > { %v1304_v49 = vpop.f32.mrf.mxu0  ;;  %1992 = vmatpush1.bf16.msra.mxu1 %v7796_v61  ;;  %2514 = vmatprep.mubr.bf16.mxu0 %v6821_v55  ;;  %v6785_v37 = vld [vmem:[%s9722_s3 + $0x28] ss:$16 sps:$4 sm:$0xff]   ;;  %v6786_v5 = vld [vmem:[%s9722_s3 + $0x4c] ss:$16 sps:$4 sm:$0xff]  }
 0x1dc   : > { %v1305_v63 = vadd.f32 %v1304_v49, %v7500_v27  ;;  %1993 = vmatprep.subr.bf16.mxu1 %v7798_v0  ;;  %v1419_v57 = vmax.f32 %v1303_v45, 0.0  ;;  %v7835_v15 = vpack.c.bf16 %v1418_v34, %v1416_v11  ;;  %v6771_v45 = vld [vmem:[%s9722_s3 + $0x144] ss:$16 sps:$4 sm:$0xff]   ;;  %v7866_v49 = vpack.c.bf16 %v1410_v18, %v1408_v29  ;;  %v6779_v34 = vld [vmem:[%s9722_s3 + $0x180] ss:$16 sps:$4 sm:$0xff]  }
 0x1dd   : > { %v1306_v26 = vpop.f32.mrf.mxu0  ;;  %v6827_v11 = vld [vmem:[%s9723_s25 + $0x24] ss:$16 sps:$4 sm:$0xff]   ;;  %v6809_v29 = vld [vmem:[%s9722_s3 + $0x128] ss:$16 sps:$4 sm:$0xff]   ;;  %v6810_v18 = vld [vmem:[%s9722_s3 + $0x14c] ss:$16 sps:$4 sm:$0xff]  }
 0x1de   : > { %v1307_v19 = vadd.f32 %v1306_v26, %v7448_v44  ;;  %1921 = vmatmul.mubr.bf16.gmra.mxu1 %v6764_v10  ;;  %v1420_v39 = vmax.f32 %v1305_v63, 0.0  ;;  %v7854_v10 = vpack.c.bf16 %v1414_v7, %v1412_v14  ;;  %v1409_v44 = vmax.f32 %v1277_v12, 0.0  ;;  %v6773_v26 = vld [vmem:[%s9722_s3 + $0x140] ss:$16 sps:$4 sm:$0xff]   ;;  %v6804_v14 = vld [vmem:[%s9722_s3 + $0x10c] ss:$16 sps:$4 sm:$0xff]  }
 0x1df   : > { %v1308_v36 = vpop.f32.mrf.mxu0  ;;  %1994 = vmatpush1.bf16.msra.mxu1 %v7630_v23  ;;  %1930 = vmatprep.mubr.bf16.mxu1 %v6765_v59  ;;  %v6819_v59 = vld [vmem:[%s9723_s25] ss:$16 sps:$4 sm:$0xff]   ;;  %v6887_v7 = vld [vmem:[%s9723_s25 + $0x164] ss:$16 sps:$4 sm:$0xff]   ;;  %v6807_v12 = vld [vmem:[%s9722_s3 + $0x12c] ss:$16 sps:$4 sm:$0xff]  }
 0x1e0   : > { %v1421_v8 = vmax.f32 %v1307_v19, 0.0  ;;  %v1309_v20 = vadd.f32 %v1308_v36, %v7500_v27  ;;  %1995 = vmatprep.subr.bf16.mxu1 %v7813_v47  ;;  %v1413_v27 = vmax.f32 %v1287_v16, 0.0  ;;  %v7876_v63 = vpack.c.bf16 %v1409_v44, %v1407_v33  ;;  %2515 = vmatmul.mubr.bf16.vlgmr.msra.gmra.mxu0 %v6819_v59  ;;  %v6774_v19 = vld [vmem:[%s9722_s3 + $0x164] ss:$16 sps:$4 sm:$0xff]   ;;  %v6816_v33 = vld [vmem:[%s9722_s3 + $0x18c] ss:$16 sps:$4 sm:$0xff]  }
 0x1e1   : > { %2524 = vmatprep.mubr.bf16.mxu0 %v6827_v11  ;;  %v6833_v36 = vld [vmem:[%s9723_s25 + $0x44] ss:$16 sps:$4 sm:$0xff]   ;;  %v6818_v59 = vld [vmem:[%s9722_s3 + $0x188] ss:$16 sps:$4 sm:$0xff]   ;;  %v6824_v55 = vld [vmem:[%s9723_s25 + $0xc] ss:$16 sps:$4 sm:$0xff]  }
 0x1e2   : > { %v1422_v52 = vmax.f32 %v1309_v20, 0.0  ;;  %v7827_v46 = vpack.c.bf16 %v1421_v8, %v1419_v57  ;;  %v7864_v60 = vpack.c.bf16 %v1413_v27, %v1411_v31  ;;  %v6831_v57 = vld [vmem:[%s9723_s25 + $0x40] ss:$16 sps:$4 sm:$0xff]   ;;  %v6839_v20 = vld [vmem:[%s9723_s25 + $0x64] ss:$16 sps:$4 sm:$0xff]  }
 0x1e3   : > { %1996 = vmatpush1.bf16.msra.mxu1 %v7604_v9  ;;  %v6837_v8 = vld [vmem:[%s9723_s25 + $0x60] ss:$16 sps:$4 sm:$0xff]   ;;  %v6881_v16 = vld [vmem:[%s9723_s25 + $0x144] ss:$16 sps:$4 sm:$0xff]   ;;  %v6822_v11 = vld [vmem:[%s9723_s25 + $0x8] ss:$16 sps:$4 sm:$0xff]  }
 0x1e4   : > { %v7833_v62 = vpack.c.bf16 %v1422_v52, %v1420_v39  ;;  %v6782_v39 = vld [vmem:[%s9722_s3 + $0xc] ss:$16 sps:$4 sm:$0xff]   ;;  %v6843_v52 = vld [vmem:[%s9723_s25 + $0x80] ss:$16 sps:$4 sm:$0xff]   ;;  %v6893_v31 = vld [vmem:[%s9723_s25 + $0x184] ss:$16 sps:$4 sm:$0xff]  }
 0x1e5   : > { %v6891_v27 = vld [vmem:[%s9723_s25 + $0x180] ss:$16 sps:$4 sm:$0xff]  }
 0x1e6   : > { %1931 = vmatmul.mubr.bf16.gmra.mxu1 %v6767_v21  ;;  %2005 = vmatprep.subr.bf16.mxu1 %v7833_v62  ;;  %v6845_v21 = vld [vmem:[%s9723_s25 + $0x84] ss:$16 sps:$4 sm:$0xff]  }
 0x1e7   : > { %2006 = vmatpush2.bf16.msra.mxu1 %v7827_v46  ;;  %1940 = vmatprep.mubr.bf16.mxu1 %v6768_v58  ;;  %v6798_v58 = vld [vmem:[%s9722_s3 + $0xcc] ss:$16 sps:$4 sm:$0xff]  }
 0x1e8   : > { %2007 = vmatprep.subr.bf16.mxu1 %v7835_v15  ;;  %2525 = vmatmul.mubr.bf16.gmra.mxu0 %v6825_v38 }
 0x1e9   : > { %2534 = vmatprep.mubr.bf16.mxu0 %v6833_v36 }
 0x1eb   : > { %2008 = vmatpush2.bf16.msra.mxu1 %v7846_v13 }
 0x1ec   : > { %2009 = vmatprep.subr.bf16.mxu1 %v7854_v10 }
 0x1ee   : > { %1941 = vmatmul.mubr.bf16.gmra.mxu1 %v6770_v25  ;;  %v6813_v25 = vld [vmem:[%s9722_s3 + $0x16c] ss:$16 sps:$4 sm:$0xff]  }
 0x1ef   : > { %2010 = vmatpush2.bf16.msra.mxu1 %v7864_v60  ;;  %1950 = vmatprep.mubr.bf16.mxu1 %v6771_v45  ;;  %v6815_v45 = vld [vmem:[%s9722_s3 + $0x168] ss:$16 sps:$4 sm:$0xff]  }
 0x1f0   : > { %2011 = vmatprep.subr.bf16.mxu1 %v7866_v49  ;;  %2535 = vmatmul.mubr.bf16.gmra.mxu0 %v6831_v57 }
 0x1f1   : > { %2544 = vmatprep.mubr.bf16.mxu0 %v6839_v20 }
 0x1f3   : > { %2012 = vmatpush2.bf16.msra.mxu1 %v7876_v63 }
 0x1f4   : > { %2645 = vmatprep.subr.bf16.mxu1 %v7709_v30  ;;  %v6777_v30 = vld [vmem:[%s9722_s3 + $0x184] ss:$16 sps:$4 sm:$0xff]  }
 0x1f6   : > { %1951 = vmatmul.mubr.bf16.gmra.mxu1 %v6773_v26 }
 0x1f7   : > { %1960 = vmatprep.mubr.bf16.mxu1 %v6774_v19 }
 0x1f8   : > { %2545 = vmatmul.mubr.bf16.gmra.mxu0 %v6837_v8  ;;  %v6834_v8 = vld [vmem:[%s9723_s25 + $0x4c] ss:$16 sps:$4 sm:$0xff]  }
 0x1f9   : > { %2554 = vmatprep.mubr.bf16.mxu0 %v6845_v21  ;;  %v6836_v21 = vld [vmem:[%s9723_s25 + $0x48] ss:$16 sps:$4 sm:$0xff]  }
 0x1fe   : > { %1961 = vmatmul.mubr.bf16.gmra.mxu1 %v6776_v35  ;;  %v6828_v35 = vld [vmem:[%s9723_s25 + $0x2c] ss:$16 sps:$4 sm:$0xff]  }
 0x1ff   : > { %1970 = vmatprep.mubr.bf16.mxu1 %v6777_v30 }
 0x200   : > { %2555 = vmatmul.mubr.bf16.gmra.mxu0 %v6843_v52 }
 0x206   : > { %1971 = vmatmul.mubr.bf16.gmra.mxu1 %v6779_v34 }
 0x207   : > { %6136 = vmatprep.mubr.msk.bf16.mxu1 %vm1778_vm2, %v6782_v39  ;;  %v6830_v39 = vld [vmem:[%s9723_s25 + $0x28] ss:$16 sps:$4 sm:$0xff]  }
 0x20e   : > { %2014 = vmatmul.mubr.bf16.vlgmr.msra.gmra.mxu1 %v6780_v48 }
 0x20f   : > { %2646 = vmatpush1.bf16.msra.mxu1 %v7702_v32  ;;  %6137 = vmatprep.mubr.msk.bf16.mxu1 %vm1778_vm2, %v6783_v43  ;;  %v6849_v32 = vld [vmem:[%s9723_s25 + $0xa0] ss:$16 sps:$4 sm:$0xff]  }
 0x210   : > { %2647 = vmatprep.subr.bf16.mxu1 %v7711_v54  ;;  %v6851_v54 = vld [vmem:[%s9723_s25 + $0xa4] ss:$16 sps:$4 sm:$0xff]  }
 0x211   : > { %2564 = vmatprep.mubr.bf16.mxu0 %v6851_v54 }
 0x212   : > { %2565 = vmatmul.mubr.bf16.gmra.mxu0 %v6849_v32 }
 0x213   : > { %2648 = vmatpush1.bf16.msra.mxu1 %v7720_v22  ;;  %v6788_v22 = vld [vmem:[%s9722_s3 + $0x48] ss:$16 sps:$4 sm:$0xff]  }
 0x214   : > { %2649 = vmatprep.subr.bf16.mxu1 %v7736_v56  ;;  %v6789_v56 = vld [vmem:[%s9722_s3 + $0x6c] ss:$16 sps:$4 sm:$0xff]  }
 0x216   : > { %2024 = vmatmul.mubr.bf16.gmra.mxu1 %v6785_v37  ;;  %v6840_v37 = vld [vmem:[%s9723_s25 + $0x6c] ss:$16 sps:$4 sm:$0xff]  }
 0x217   : > { %2650 = vmatpush1.bf16.msra.mxu1 %v7754_v51  ;;  %6138 = vmatprep.mubr.msk.bf16.mxu1 %vm1778_vm2, %v6786_v5  ;;  %v6855_v51 = vld [vmem:[%s9723_s25 + $0xc0] ss:$16 sps:$4 sm:$0xff]  }
 0x218   : > { %2651 = vmatprep.subr.bf16.mxu1 %v7760_v28  ;;  %v6857_v28 = vld [vmem:[%s9723_s25 + $0xc4] ss:$16 sps:$4 sm:$0xff]  }
 0x219   : > { %2574 = vmatprep.mubr.bf16.mxu0 %v6857_v28  ;;  %v6842_v28 = vld [vmem:[%s9723_s25 + $0x68] ss:$16 sps:$4 sm:$0xff]  }
 0x21a   : > { %2575 = vmatmul.mubr.bf16.gmra.mxu0 %v6855_v51 }
 0x21b   : > { %2652 = vmatpush1.bf16.msra.mxu1 %v7772_v42  ;;  %v6791_v42 = vld [vmem:[%s9722_s3 + $0x68] ss:$16 sps:$4 sm:$0xff]  }
 0x21c   : > { %2653 = vmatprep.subr.bf16.mxu1 %v7776_v53  ;;  %v6792_v53 = vld [vmem:[%s9722_s3 + $0x8c] ss:$16 sps:$4 sm:$0xff]  }
 0x21e   : > { %2034 = vmatmul.mubr.bf16.gmra.mxu1 %v6788_v22  ;;  %v6897_v22 = vld [vmem:[%s9725_s5 + $0x38] sm:$0xff]  }
 0x21f   : > { %2654 = vmatpush1.bf16.msra.mxu1 %v7788_v2  ;;  %6139 = vmatprep.mubr.msk.bf16.mxu1 %vm1778_vm2, %v6789_v56  ;;  %v6861_v2 = vld [vmem:[%s9723_s25 + $0xe0] ss:$16 sps:$4 sm:$0xff]   ;;  %v6898_v56 = vld [vmem:[%s9726_s6 + $0x38] sm:$0xff]  }
 0x220   : > { %2655 = vmatprep.subr.bf16.mxu1 %v7792_v50  ;;  %v6863_v50 = vld [vmem:[%s9723_s25 + $0xe4] ss:$16 sps:$4 sm:$0xff]   ;;  %3010 = vmatpush1.bf16.msra.mxu0 %v6897_v22 }
 0x221   : > { %2584 = vmatprep.mubr.bf16.mxu0 %v6863_v50  ;;  %3011 = vmatprep.subr.bf16.mxu0 %v9693_v4 }
 0x222   : > { %2585 = vmatmul.mubr.bf16.gmra.mxu0 %v6861_v2 }
 0x223   : > { %2656 = vmatpush1.bf16.msra.mxu1 %v7796_v61  ;;  %v6794_v61 = vld [vmem:[%s9722_s3 + $0x88] ss:$16 sps:$4 sm:$0xff]  }
 0x224   : > { %2657 = vmatprep.subr.bf16.mxu1 %v7798_v0  ;;  %v6795_v0 = vld [vmem:[%s9722_s3 + $0xac] ss:$16 sps:$4 sm:$0xff]  }
 0x226   : > { %2044 = vmatmul.mubr.bf16.gmra.mxu1 %v6791_v42  ;;  %v6846_v42 = vld [vmem:[%s9723_s25 + $0x8c] ss:$16 sps:$4 sm:$0xff]  }
 0x227   : > { %2658 = vmatpush1.bf16.msra.mxu1 %v7630_v23  ;;  %6140 = vmatprep.mubr.msk.bf16.mxu1 %vm1778_vm2, %v6792_v53  ;;  %v6867_v23 = vld [vmem:[%s9723_s25 + $0x100] ss:$16 sps:$4 sm:$0xff]  }
 0x228   : > { %2659 = vmatprep.subr.bf16.mxu1 %v7813_v47  ;;  %v6869_v47 = vld [vmem:[%s9723_s25 + $0x104] ss:$16 sps:$4 sm:$0xff]  }
 0x229   : > { %2594 = vmatprep.mubr.bf16.mxu0 %v6869_v47 }
 0x22a   : > { %2595 = vmatmul.mubr.bf16.gmra.mxu0 %v6867_v23  ;;  %v6852_v23 = vld [vmem:[%s9723_s25 + $0xac] ss:$16 sps:$4 sm:$0xff]  }
 0x22b   : > { %2660 = vmatpush1.bf16.msra.mxu1 %v7604_v9  ;;  %v6797_v9 = vld [vmem:[%s9722_s3 + $0xa8] ss:$16 sps:$4 sm:$0xff]  }
 0x22c   : > { %2669 = vmatprep.subr.bf16.mxu1 %v7833_v62  ;;  %v6873_v62 = vld [vmem:[%s9723_s25 + $0x120] ss:$16 sps:$4 sm:$0xff]  }
 0x22e   : > { %2054 = vmatmul.mubr.bf16.gmra.mxu1 %v6794_v61 }
 0x22f   : > { %2670 = vmatpush2.bf16.msra.mxu1 %v7827_v46  ;;  %6141 = vmatprep.mubr.msk.bf16.mxu1 %vm1778_vm2, %v6795_v0  ;;  %v6875_v46 = vld [vmem:[%s9723_s25 + $0x124] ss:$16 sps:$4 sm:$0xff]   ;;  %v6848_v0 = vld [vmem:[%s9723_s25 + $0x88] ss:$16 sps:$4 sm:$0xff]  }
 0x230   : > { %2671 = vmatprep.subr.bf16.mxu1 %v7835_v15  ;;  %2604 = vmatprep.mubr.bf16.mxu0 %v6875_v46  ;;  %v6800_v15 = vld [vmem:[%s9722_s3 + $0xc8] ss:$16 sps:$4 sm:$0xff]  }
 0x232   : > { %2605 = vmatmul.mubr.bf16.gmra.mxu0 %v6873_v62 }
 0x233   : > { %2672 = vmatpush2.bf16.msra.mxu1 %v7846_v13  ;;  %2614 = vmatprep.mubr.bf16.mxu0 %v6881_v16  ;;  %v6885_v13 = vld [vmem:[%s9723_s25 + $0x160] ss:$16 sps:$4 sm:$0xff]   ;;  %v6858_v16 = vld [vmem:[%s9723_s25 + $0xcc] ss:$16 sps:$4 sm:$0xff]  }
 0x234   : > { %2673 = vmatprep.subr.bf16.mxu1 %v7854_v10  ;;  %v6812_v10 = vld [vmem:[%s9722_s3 + $0x148] ss:$16 sps:$4 sm:$0xff]   ;;  %s7108_s3 = sshll.u32 %s7169_s29, 4  ;;  %s7109_s3 = int_to_ptr.vmem [resolvable:$false] %s7108_s3 }
 0x235   : > { %s7110_s23 = scalar_lea.vmem %s7109_s3, 512  ;;  %p7111_p0 = scmp.lt.s32.totalorder %s9618_s0, %s7109_s3 }
 0x236   : > { %2064 = vmatmul.mubr.bf16.gmra.mxu1 %v6797_v9  ;;  %v6899_v9 = vld [vmem:[%s9725_s5 + $0x30] sm:$0xff]   ;;  %p7112_p1 = scmp.lt.s32.totalorder %s7110_s23, %s7104_s2 }
 0x237   : > { %2674 = vmatpush2.bf16.msra.mxu1 %v7864_v60  ;;  %6142 = vmatprep.mubr.msk.bf16.mxu1 %vm1778_vm2, %v6798_v58  ;;  %v6900_v58 = vld [vmem:[%s9726_s6 + $0x30] sm:$0xff]  }
 0x238   : > { %2675 = vmatprep.subr.bf16.mxu1 %v7866_v49  ;;  %3012 = vmatpush1.bf16.msra.mxu0 %v6899_v9  ;;  %p7113_p2 = por %p7112_p1, %p7111_p0 }
 0x239   : > { %3013 = vmatprep.subr.bf16.mxu0 %v9693_v4 }
 0x23a   : > { %2615 = vmatmul.mubr.bf16.gmra.mxu0 %v6879_v3  ;;  %p7114_p3 = pnand %p7113_p2, %p7107_p13 }
 0x23b   : > { %2676 = vmatpush2.bf16.msra.mxu1 %v7876_v63  ;;  %2624 = vmatprep.mubr.bf16.mxu0 %v6887_v7  ;;  %v6902_v7 = vld [vmem:[%s9726_s6 + $0x28] sm:$0xff]  }
 0x23c   : > { %3228 = vmatprep.subr.bf16.mxu1 %v9693_v4 }
 0x23e   : > { %2074 = vmatmul.mubr.bf16.gmra.mxu1 %v6800_v15 }
 0x23f   : > { %6143 = vmatprep.mubr.msk.bf16.mxu1 %vm1778_vm2, %v6801_v1  ;;  %v6854_v1 = vld [vmem:[%s9723_s25 + $0xa8] ss:$16 sps:$4 sm:$0xff]  }
 0x242   : > { %2625 = vmatmul.mubr.bf16.gmra.mxu0 %v6885_v13 }
 0x243   : > { %2634 = vmatprep.mubr.bf16.mxu0 %v6893_v31  ;;  %v6864_v31 = vld [vmem:[%s9723_s25 + $0xec] ss:$16 sps:$4 sm:$0xff]  }
 0x246   : > { %2084 = vmatmul.mubr.bf16.gmra.mxu1 %v6803_v6 }
 0x247   : > { %6144 = vmatprep.mubr.msk.bf16.mxu1 %vm1778_vm2, %v6804_v14  ;;  %v6901_v14 = vld [vmem:[%s9725_s5 + $0x28] sm:$0xff]  }
 0x248   : > { %3014 = vmatpush1.bf16.msra.mxu0 %v6901_v14 }
 0x249   : > { %3015 = vmatprep.subr.bf16.mxu0 %v9693_v4 }
 0x24a   : > { %2635 = vmatmul.mubr.bf16.gmra.mxu0 %v6891_v27 }
 0x24e   : > { %2094 = vmatmul.mubr.bf16.gmra.mxu1 %v6806_v17 }
 0x24f   : > { %6145 = vmatprep.mubr.msk.bf16.mxu1 %vm1778_vm2, %v6807_v12  ;;  %v6860_v12 = vld [vmem:[%s9723_s25 + $0xc8] ss:$16 sps:$4 sm:$0xff]  }
 0x256   : > { %2104 = vmatmul.mubr.bf16.gmra.mxu1 %v6809_v29 }
 0x257   : > { %6146 = vmatprep.mubr.msk.bf16.mxu1 %vm1778_vm2, %v6810_v18 }
 0x25e   : > { %2114 = vmatmul.mubr.bf16.gmra.mxu1 %v6812_v10  ;;  %v6903_v10 = vld [vmem:[%s9725_s5 + $0x20] sm:$0xff]  }
 0x25f   : > { %6147 = vmatprep.mubr.msk.bf16.mxu1 %vm1778_vm2, %v6813_v25  ;;  %v6904_v25 = vld [vmem:[%s9726_s6 + $0x20] sm:$0xff]   ;;  %3016 = vmatpush1.bf16.msra.mxu0 %v6903_v10  ;;  %v6914_v10 = vld [vmem:[%s9726_s6 + $0x48] sm:$0x3f]  }
 0x260   : > { %3017 = vmatprep.subr.bf16.mxu0 %v9693_v4 }
 0x266   : > { %v8078_v44 = vpop.f32.mrf.mxu1  ;;  %2124 = vmatmul.mubr.bf16.gmra.mxu1 %v6815_v45 }
 0x267   : > { %6148 = vmatprep.mubr.msk.bf16.mxu1 %vm1778_vm2, %v6816_v33  ;;  %v6866_v33 = vld [vmem:[%s9723_s25 + $0xe8] ss:$16 sps:$4 sm:$0xff]  }
 0x268   : > { %v8081_v60 = vpop.f32.mrf.mxu1 }
 0x26a   : > { %v8083_v49 = vpop.f32.mrf.mxu1 }
 0x26c   : > { %v8091_v63 = vpop.f32.mrf.mxu1 }
 0x26e   : > { %v8093_v26 = vpop.f32.mrf.mxu1  ;;  %2134 = vmatmul.mubr.bf16.gmra.mxu1 %v6818_v59  ;;  %v6870_v59 = vld [vmem:[%s9723_s25 + $0x10c] ss:$16 sps:$4 sm:$0xff]  }
 0x26f   : > { %6201 = vmatprep.mubr.msk.bf16.mxu1 %vm1778_vm2, %v6824_v55 }
 0x270   : > { %v8096_v19 = vpop.f32.mrf.mxu1 }
 0x272   : > { %v8098_v38 = vpop.f32.mrf.mxu1 }
 0x274   : > { %v8106_v30 = vpop.f32.mrf.mxu1 }
 0x276   : > { %v8108_v57 = vpop.f32.mrf.mxu1  ;;  %2678 = vmatmul.mubr.bf16.vlgmr.msra.gmra.mxu1 %v6822_v11  ;;  %v6905_v11 = vld [vmem:[%s9725_s5 + $0x18] sm:$0xff]  }
 0x277   : > { %6202 = vmatprep.mubr.msk.bf16.mxu1 %vm1778_vm2, %v6828_v35  ;;  %3229 = vmatpush1.bf16.msra.mxu1 %v6898_v56  ;;  %v6906_v35 = vld [vmem:[%s9726_s6 + $0x18] sm:$0xff]  }
 0x278   : > { %v8111_v36 = vpop.f32.mrf.mxu1  ;;  %3230 = vmatprep.subr.bf16.mxu1 %v9693_v4  ;;  %3018 = vmatpush1.bf16.msra.mxu0 %v6905_v11  ;;  %v6872_v56 = vld [vmem:[%s9723_s25 + $0x108] ss:$16 sps:$4 sm:$0xff]  }
 0x279   : > { %3019 = vmatprep.subr.bf16.mxu0 %v9693_v4 }
 0x27a   : > { %v8113_v34 = vpop.f32.mrf.mxu1 }
 0x27b   : > { %3231 = vmatpush1.bf16.msra.mxu1 %v6900_v58 }
 0x27c   : > { %v8121_v20 = vpop.f32.mrf.mxu1  ;;  %3232 = vmatprep.subr.bf16.mxu1 %v9693_v4 }
 0x27e   : > { %v8123_v48 = vpop.f32.mrf.mxu1  ;;  %2688 = vmatmul.mubr.bf16.gmra.mxu1 %v6830_v39 }
 0x27f   : > { %6203 = vmatprep.mubr.msk.bf16.mxu1 %vm1778_vm2, %v6834_v8  ;;  %3233 = vmatpush1.bf16.msra.mxu1 %v6902_v7  ;;  %v6878_v7 = vld [vmem:[%s9723_s25 + $0x128] ss:$16 sps:$4 sm:$0xff]  }
 0x280   : > { %v8126_v43 = vpop.f32.mrf.mxu1  ;;  %3234 = vmatprep.subr.bf16.mxu1 %v9693_v4 }
 0x282   : > { %v8128_v52 = vpop.f32.mrf.mxu1 }
 0x283   : > { %3235 = vmatpush1.bf16.msra.mxu1 %v6904_v25 }
 0x284   : > { %v8136_v5 = vpop.f32.mrf.mxu1  ;;  %3236 = vmatprep.subr.bf16.mxu1 %v9693_v4 }
 0x286   : > { %v8138_v32 = vpop.f32.mrf.mxu1  ;;  %2698 = vmatmul.mubr.bf16.gmra.mxu1 %v6836_v21  ;;  %v6907_v21 = vld [vmem:[%s9725_s5 + $0x10] sm:$0xff]  }
 0x287   : > { %6204 = vmatprep.mubr.msk.bf16.mxu1 %vm1778_vm2, %v6840_v37  ;;  %3237 = vmatpush1.bf16.msra.mxu1 %v6906_v35  ;;  %v6908_v37 = vld [vmem:[%s9726_s6 + $0x10] sm:$0xff]  }
 0x288   : > { %v8141_v54 = vpop.f32.mrf.mxu1  ;;  %3238 = vmatprep.subr.bf16.mxu1 %v9693_v4  ;;  %3020 = vmatpush1.bf16.msra.mxu0 %v6907_v21  ;;  %v6915_v21 = vld [vmem:[%s9725_s5 + $0x40] sm:$0xff]  }
 0x289   : > { %9724 = vst [vmem:[#allocation12_spill] sm:$0xff] %v8141_v54  ;;  %3021 = vmatprep.subr.bf16.mxu0 %v9693_v4 }
 0x28a   : > { %v8149_v51 = vpop.f32.mrf.mxu1 }
 0x28b   : > { %9727 = vst [vmem:[#allocation13_spill] sm:$0xff] %v8149_v51  ;;  %3239 = vmatpush1.bf16.msra.mxu1 %v6908_v37  ;;  %v6916_v37 = vld [vmem:[%s9726_s6 + $0x40] sm:$0xff]  }
 0x28c   : > { %v8157_v53 = vpop.f32.mrf.mxu1  ;;  %3240 = vmatprep.subr.bf16.mxu1 %v9693_v4 }
 0x28d   : > { %9728 = vst [vmem:[#allocation14_spill] sm:$0xff] %v8157_v53 }
 0x28e   : > { %v8161_v2 = vpop.f32.mrf.mxu1  ;;  %2708 = vmatmul.mubr.bf16.gmra.mxu1 %v6842_v28  ;;  %v6876_v28 = vld [vmem:[%s9723_s25 + $0x12c] ss:$16 sps:$4 sm:$0xff]  }
 0x28f   : > { %9729 = vst [vmem:[#allocation15_spill] sm:$0xff] %v8161_v2  ;;  %6205 = vmatprep.mubr.msk.bf16.mxu1 %vm1778_vm2, %v6846_v42 }
 0x290   : > { %v8164_v50 = vpop.f32.mrf.mxu1 }
 0x291   : > { %9730 = vst [vmem:[#allocation16_spill] sm:$0xff] %v8164_v50 }
 0x292   : > { %v8166_v61 = vpop.f32.mrf.mxu1 }
 0x293   : > { %9731 = vst [vmem:[#allocation17_spill] sm:$0xff] %v8166_v61 }
 0x294   : > { %v8174_v47 = vpop.f32.mrf.mxu1 }
 0x295   : > { %9732 = vst [vmem:[#allocation18_spill] sm:$0xff] %v8174_v47 }
 0x296   : > { %v8182_v46 = vpop.f32.mrf.mxu1  ;;  %2718 = vmatmul.mubr.bf16.gmra.mxu1 %v6848_v0  ;;  %v6909_v0 = vld [vmem:[%s9725_s5 + $0x8] sm:$0xff]  }
 0x297   : > { %9733 = vst [vmem:[#allocation19_spill] sm:$0xff] %v8182_v46  ;;  %6206 = vmatprep.mubr.msk.bf16.mxu1 %vm1778_vm2, %v6852_v23  ;;  %v6910_v23 = vld [vmem:[%s9726_s6 + $0x8] sm:$0xff]   ;;  %3022 = vmatpush1.bf16.msra.mxu0 %v6909_v0 }
 0x298   : > { %v8185_v62 = vpop.f32.mrf.mxu1  ;;  %3241 = vmatpush1.bf16.msra.mxu1 %v6910_v23  ;;  %3023 = vmatprep.subr.bf16.mxu0 %v9693_v4  ;;  %v6888_v0 = vld [vmem:[%s9723_s25 + $0x16c] ss:$16 sps:$4 sm:$0xff]  }
 0x299   : > { %9734 = vst [vmem:[#allocation20_spill] sm:$0xff] %v8185_v62  ;;  %3242 = vmatprep.subr.bf16.mxu1 %v9693_v4 }
 0x29a   : > { %v8189_v15 = vpop.f32.mrf.mxu1 }
 0x29b   : > { %9735 = vst [vmem:[#allocation21_spill] sm:$0xff] %v8189_v15 }
 0x29c   : > { %v8197_v3 = vpop.f32.mrf.mxu1 }
 0x29d   : > { %9736 = vst [vmem:[#allocation22_spill] sm:$0xff] %v8197_v3 }
 0x29e   : > { %v8199_v6 = vpop.f32.mrf.mxu1  ;;  %2728 = vmatmul.mubr.bf16.gmra.mxu1 %v6854_v1  ;;  %v6911_v1 = vld [vmem:[%s9725_s5] sm:$0xff]  }
 0x29f   : > { %9737 = vst [vmem:[#allocation23_spill] sm:$0xff] %v8199_v6  ;;  %6207 = vmatprep.mubr.msk.bf16.mxu1 %vm1778_vm2, %v6858_v16  ;;  %v6912_v16 = vld [vmem:[%s9726_s6] sm:$0xff]   ;;  %3024 = vmatpush1.bf16.msra.mxu0 %v6911_v1 }
 0x2a0   : > { %v8208_v13 = vpop.f32.mrf.mxu1  ;;  %3243 = vmatpush1.bf16.msra.mxu1 %v6912_v16  ;;  %3037 = vmatprep.subr.bf16.mxu0 %v9693_v4 }
 0x2a1   : > { %9738 = vst [vmem:[#allocation24_spill] sm:$0xff] %v8208_v13  ;;  %3256 = vmatprep.subr.bf16.mxu1 %v9693_v4 }
 0x2a2   : > { %v8210_v17 = vpop.f32.mrf.mxu1 }
 0x2a3   : > { %9739 = vst [vmem:[#allocation25_spill] sm:$0xff] %v8210_v17 }
 0x2a4   : > { %v8220_v27 = vpop.f32.mrf.mxu1 }
 0x2a5   : > { %9740 = vst [vmem:[#allocation26_spill] sm:$0xff] %v8220_v27 }
 0x2a6   : > { %v8222_v29 = vpop.f32.mrf.mxu1  ;;  %2738 = vmatmul.mubr.bf16.gmra.mxu1 %v6860_v12  ;;  %v6882_v12 = vld [vmem:[%s9723_s25 + $0x14c] ss:$16 sps:$4 sm:$0xff]  }
 0x2a7   : > { %9741 = vst [vmem:[#allocation27_spill] sm:$0xff] %v8222_v29  ;;  %6208 = vmatprep.mubr.msk.bf16.mxu1 %vm1778_vm2, %v6864_v31  ;;  %v6913_v31 = vld [vmem:[%s9725_s5 + $0x48] sm:$0x3f]  }
 0x2a8   : > { %v8225_v18 = vpop.f32.mrf.mxu1 }
 0x2a9   : > { %9742 = vst [vmem:[#allocation28_spill] sm:$0xff] %v8225_v18 }
 0x2aa   : > { %v8233_v45 = vpop.f32.mrf.mxu1 }
 0x2ab   : > { %9743 = vst [vmem:[#allocation29_spill] sm:$0xff] %v8233_v45 }
 0x2ac   : > { %v8243_v55 = vpop.f32.mrf.mxu1 }
 0x2ad   : > { %9744 = vst [vmem:[#allocation30_spill] sm:$0xff] %v8243_v55 }
 0x2ae   : > { %v8251_v39 = vpop.f32.mrf.mxu1  ;;  %2748 = vmatmul.mubr.bf16.gmra.mxu1 %v6866_v33  ;;  %v3007_v33 = vsel %vm3005_vm3, %v6913_v31, 0  ;;  %v6894_v31 = vld [vmem:[%s9723_s25 + $0x18c] ss:$16 sps:$4 sm:$0xff]  }
 0x2af   : > { %9745 = vst [vmem:[#allocation31_spill] sm:$0xff] %v8251_v39  ;;  %6209 = vmatprep.mubr.msk.bf16.mxu1 %vm1778_vm2, %v6870_v59  ;;  %v3226_v59 = vsel %vm3005_vm3, %v6914_v10, 0  ;;  %3038 = vmatpush2.bf16.msra.mxu0 %v3007_v33 }
 0x2b0   : > { %v8254_v8 = vpop.f32.mrf.mxu1  ;;  %3257 = vmatpush2.bf16.msra.mxu1 %v3226_v59  ;;  %3039 = vmatprep.subr.bf16.mxu0 %v9693_v4 }
 0x2b1   : > { %9746 = vst [vmem:[#allocation32_spill] sm:$0xff] %v8254_v8  ;;  %3258 = vmatprep.subr.bf16.mxu1 %v9693_v4 }
 0x2b2   : > { %v8264_v22 = vpop.f32.mrf.mxu1 }
 0x2b3   : > { %9747 = vst [vmem:[#allocation33_spill] sm:$0xff] %v8264_v22  ;;  %3040 = vmatpush2.bf16.msra.mxu0 %v6915_v21  ;;  %v8358_v21 = vpop.f32.mrf.mxu0 }
 0x2b4   : > { %v8273_v42 = vpop.f32.mrf.mxu1  ;;  %3259 = vmatpush2.bf16.msra.mxu1 %v6916_v37 }
 0x2b5   : > { %9748 = vst [vmem:[#allocation34_spill] sm:$0xff] %v8273_v42  ;;  %v8367_v24 = vpop.f32.mrf.mxu0 }
 0x2b6   : > { %v8282_v9 = vpop.f32.mrf.mxu1  ;;  %2758 = vmatmul.mubr.bf16.gmra.mxu1 %v6872_v56 }
 0x2b7   : > { %9749 = vst [vmem:[#allocation35_spill] sm:$0xff] %v8282_v9  ;;  %6210 = vmatprep.mubr.msk.bf16.mxu1 %vm1778_vm2, %v6876_v28  ;;  %v6884_v28 = vld [vmem:[%s9723_s25 + $0x148] ss:$16 sps:$4 sm:$0xff]  }
 0x2b8   : > { %v8285_v58 = vpop.f32.mrf.mxu1 }
 0x2b9   : > { %9750 = vst [vmem:[#allocation36_spill] sm:$0xff] %v8285_v58 }
 0x2ba   : > { %v8295_v14 = vpop.f32.mrf.mxu1 }
 0x2bb   : > { %9751 = vst [vmem:[#allocation37_spill] sm:$0xff] %v8295_v14 }
 0x2bc   : > { %v8310_v25 = vpop.f32.mrf.mxu1 }
 0x2bd   : > { %9752 = vst [vmem:[#allocation38_spill] sm:$0xff] %v8310_v25 }
 0x2be   : > { %v8315_v11 = vpop.f32.mrf.mxu1  ;;  %2768 = vmatmul.mubr.bf16.gmra.mxu1 %v6878_v7 }
 0x2bf   : > { %9753 = vst [vmem:[#allocation39_spill] sm:$0xff] %v8315_v11  ;;  %6211 = vmatprep.mubr.msk.bf16.mxu1 %vm1778_vm2, %v6882_v12  ;;  %v6890_v12 = vld [vmem:[%s9723_s25 + $0x168] ss:$16 sps:$4 sm:$0xff]  }
 0x2c0   : > { %v8318_v35 = vpop.f32.mrf.mxu1 }
 0x2c1   : > { %9754 = vst [vmem:[#allocation40_spill] sm:$0xff] %v8318_v35 }
 0x2c2   : > { %v8328_v56 = vpop.f32.mrf.mxu1 }
 0x2c3   : > { %9755 = vst [vmem:[#allocation41_spill] sm:$0xff] %v8328_v56 }
 0x2c4   : > { %v8336_v23 = vpop.f32.mrf.mxu1 }
 0x2c5   : > { %9756 = vst [vmem:[#allocation42_spill] sm:$0xff] %v8336_v23 }
 0x2c6   : > { %v8338_v1 = vpop.f32.mrf.mxu1  ;;  %2778 = vmatmul.mubr.bf16.gmra.mxu1 %v6884_v28  ;;  %v6896_v28 = vld [vmem:[%s9723_s25 + $0x188] ss:$16 sps:$4 sm:$0xff]  }
 0x2c7   : > { %9757 = vst [vmem:[#allocation43_spill] sm:$0xff] %v8338_v1  ;;  %6212 = vmatprep.mubr.msk.bf16.mxu1 %vm1778_vm2, %v6888_v0 }
 0x2c8   : > { %v8341_v16 = vpop.f32.mrf.mxu1 }
 0x2c9   : > { %9758 = vst [vmem:[#allocation44_spill] sm:$0xff] %v8341_v16 }
 0x2ca   : > { %v8343_v7 = vpop.f32.mrf.mxu1 }
 0x2cb   : > { %9759 = vst [vmem:[#allocation45_spill] sm:$0xff] %v8343_v7 }
 0x2cc   : > { %v8351_v10 = vpop.f32.mrf.mxu1 }
 0x2cd   : > { %9760 = vst [vmem:[#allocation46_spill] sm:$0xff] %v8351_v10 }
 0x2ce   : > { %v8353_v33 = vpop.f32.mrf.mxu1  ;;  %2788 = vmatmul.mubr.bf16.gmra.mxu1 %v6890_v12 }
 0x2cf   : > { %6213 = vmatprep.mubr.msk.bf16.mxu1 %vm1778_vm2, %v6894_v31  ;;  %v8373_v31 = vpop.f32.mrf.mxu0 }
 0x2d0   : > { %v8356_v59 = vpop.f32.mrf.mxu1 }
 0x2d1   : > { %v8379_v10 = vpop.f32.mrf.mxu0 }
 0x2d2   : > { %v8360_v37 = vpop.f32.mrf.mxu1 }
 0x2d3   : > { %v8385_v1 = vpop.f32.mrf.mxu0 }
 0x2d4   : > { %v8365_v0 = vpop.f32.mrf.mxu1 }
 0x2d6   : > { %v8369_v41 = vpop.f32.mrf.mxu1  ;;  %2798 = vmatmul.mubr.bf16.gmra.mxu1 %v6896_v28  ;;  %v8391_v28 = vpop.f32.mrf.mxu0 }
 0x2d8   : > { %v8371_v12 = vpop.f32.mrf.mxu1  ;;  %v8397_v25 = vpop.f32.mrf.mxu0 }
 0x2da   : > { %v8375_v4 = vpop.f32.mrf.mxu1  ;;  %v8403_v9 = vpop.f32.mrf.mxu0 }
 0x2dc   : > { %v8377_v40 = vpop.f32.mrf.mxu1  ;;  %v8409_v22 = vpop.f32.mrf.mxu0 }
 0x2de   : > { %v8381_v16 = vpop.f32.mrf.mxu1  ;;  %v8415_v18 = vpop.f32.mrf.mxu0 }
 0x2e0   : > { %v8383_v7 = vpop.f32.mrf.mxu1  ;;  %v8421_v27 = vpop.f32.mrf.mxu0 }
 0x2e2   : > { %v8387_v23 = vpop.f32.mrf.mxu1  ;;  %v8427_v6 = vpop.f32.mrf.mxu0 }
 0x2e4   : > { %v8389_v35 = vpop.f32.mrf.mxu1  ;;  %v8433_v15 = vpop.f32.mrf.mxu0 }
 0x2e6   : > { %v8393_v56 = vpop.f32.mrf.mxu1  ;;  %v8439_v50 = vpop.f32.mrf.mxu0 }
 0x2e8   : > { %v8395_v11 = vpop.f32.mrf.mxu1 }
 0x2ea   : > { %v8399_v58 = vpop.f32.mrf.mxu1 }
 0x2ec   : > { %v8401_v14 = vpop.f32.mrf.mxu1 }
 0x2ee   : > { %v8405_v42 = vpop.f32.mrf.mxu1 }
 0x2f0   : > { %v8407_v8 = vpop.f32.mrf.mxu1 }
 0x2f1   : > { %9761 = vst [vmem:[#allocation47_spill] sm:$0xff] %v8407_v8 }
 0x2f2   : > { %v8411_v39 = vpop.f32.mrf.mxu1 }
 0x2f3   : > { %9762 = vst [vmem:[#allocation48_spill] sm:$0xff] %v8411_v39 }
 0x2f4   : > { %v8413_v55 = vpop.f32.mrf.mxu1 }
 0x2f5   : > { %9763 = vst [vmem:[#allocation49_spill] sm:$0xff] %v8413_v55 }
 0x2f6   : > { %v8417_v45 = vpop.f32.mrf.mxu1 }
 0x2f7   : > { %9764 = vst [vmem:[#allocation50_spill] sm:$0xff] %v8417_v45 }
 0x2f8   : > { %v8419_v29 = vpop.f32.mrf.mxu1 }
 0x2f9   : > { %9765 = vst [vmem:[#allocation51_spill] sm:$0xff] %v8419_v29 }
 0x2fa   : > { %v8423_v13 = vpop.f32.mrf.mxu1 }
 0x2fb   : > { %9766 = vst [vmem:[#allocation52_spill] sm:$0xff] %v8423_v13  ;;  %v8445_v13 = vpop.f32.mrf.mxu0 }
 0x2fc   : > { %v8425_v17 = vpop.f32.mrf.mxu1 }
 0x2fd   : > { %9767 = vst [vmem:[#allocation53_spill] sm:$0xff] %v8425_v17 }
 0x2fe   : > { %v8429_v3 = vpop.f32.mrf.mxu1 }
 0x2ff   : > { %9768 = vst [vmem:[#allocation54_spill] sm:$0xff] %v8429_v3  ;;  %v8451_v3 = vpop.f32.mrf.mxu0 }
 0x300   : > { %v8431_v62 = vpop.f32.mrf.mxu1 }
 0x301   : > { %9769 = vst [vmem:[#allocation55_spill] sm:$0xff] %v8431_v62 }
 0x302   : > { %v8435_v46 = vpop.f32.mrf.mxu1 }
 0x303   : > { %9770 = vst [vmem:[#allocation56_spill] sm:$0xff] %v8435_v46  ;;  %v8457_v46 = vpop.f32.mrf.mxu0 }
 0x304   : > { %v8437_v47 = vpop.f32.mrf.mxu1 }
 0x305   : > { %9771 = vst [vmem:[#allocation57_spill] sm:$0xff] %v8437_v47 }
 0x306   : > { %v8441_v29 = vpop.f32.mrf.mxu1 }
 0x307   : > { %9772 = vst [vmem:[#allocation58_spill] sm:$0xff] %v8441_v29  ;;  %v8463_v29 = vpop.f32.mrf.mxu0 }
 0x308   : > { %v8443_v61 = vpop.f32.mrf.mxu1  ;;  %9780 = vst [vmem:[#allocation66_spill] sm:$0xff] %v8463_v29 }
 0x309   : > { %9773 = vst [vmem:[#allocation59_spill] sm:$0xff] %v8443_v61 }
 0x30a   : > { %v8447_v17 = vpop.f32.mrf.mxu1 }
 0x30b   : > { %9774 = vst [vmem:[#allocation60_spill] sm:$0xff] %v8447_v17  ;;  %v8469_v17 = vpop.f32.mrf.mxu0 }
 0x30c   : > { %v8449_v45 = vpop.f32.mrf.mxu1  ;;  %9783 = vst [vmem:[#allocation69_spill] sm:$0xff] %v8469_v17 }
 0x30d   : > { %9775 = vst [vmem:[#allocation61_spill] sm:$0xff] %v8449_v45 }
 0x30e   : > { %v8453_v62 = vpop.f32.mrf.mxu1 }
 0x30f   : > { %9776 = vst [vmem:[#allocation62_spill] sm:$0xff] %v8453_v62  ;;  %v8475_v62 = vpop.f32.mrf.mxu0 }
 0x310   : > { %v8455_v2 = vpop.f32.mrf.mxu1  ;;  %9786 = vst [vmem:[#allocation72_spill] sm:$0xff] %v8475_v62 }
 0x311   : > { %9777 = vst [vmem:[#allocation63_spill] sm:$0xff] %v8455_v2 }
 0x312   : > { %v8459_v47 = vpop.f32.mrf.mxu1 }
 0x313   : > { %9778 = vst [vmem:[#allocation64_spill] sm:$0xff] %v8459_v47  ;;  %v8481_v47 = vpop.f32.mrf.mxu0 }
 0x314   : > { %v8461_v55 = vpop.f32.mrf.mxu1  ;;  %9789 = vst [vmem:[#allocation75_spill] sm:$0xff] %v8481_v47 }
 0x315   : > { %9779 = vst [vmem:[#allocation65_spill] sm:$0xff] %v8461_v55 }
 0x316   : > { %v8465_v61 = vpop.f32.mrf.mxu1 }
 0x317   : > { %9781 = vst [vmem:[#allocation67_spill] sm:$0xff] %v8465_v61  ;;  %v8487_v61 = vpop.f32.mrf.mxu0 }
 0x318   : > { %v8467_v53 = vpop.f32.mrf.mxu1  ;;  %9792 = vst [vmem:[#allocation78_spill] sm:$0xff] %v8487_v61 }
 0x319   : > { %9782 = vst [vmem:[#allocation68_spill] sm:$0xff] %v8467_v53  ;;  %v6919_v53 = vld [vmem:[%s9667_s7 + $0x74] ss:$8 sps:$4 sm:$0xff]  }
 0x31a   : > { %v8471_v45 = vpop.f32.mrf.mxu1  ;;  %3873 = vmatprep.subr.bf16.mxu0 %v6919_v53 }
 0x31b   : > { %9784 = vst [vmem:[#allocation70_spill] sm:$0xff] %v8471_v45 }
 0x31c   : > { %v8473_v8 = vpop.f32.mrf.mxu1 }
 0x31d   : > { %9785 = vst [vmem:[#allocation71_spill] sm:$0xff] %v8473_v8  ;;  %v6925_v8 = vld [vmem:[%s9667_s7 + $0x174] ss:$8 sps:$4 sm:$0xff]  }
 0x31e   : > { %v8477_v2 = vpop.f32.mrf.mxu1  ;;  %4036 = vmatprep.subr.bf16.mxu1 %v6925_v8 }
 0x31f   : > { %9787 = vst [vmem:[#allocation73_spill] sm:$0xff] %v8477_v2  ;;  %v8499_v2 = vpop.f32.mrf.mxu0 }
 0x320   : > { %v8479_v54 = vpop.f32.mrf.mxu1  ;;  %9795 = vst [vmem:[#allocation81_spill] sm:$0xff] %v8499_v2 }
 0x321   : > { %9788 = vst [vmem:[#allocation74_spill] sm:$0xff] %v8479_v54  ;;  %v8505_v61 = vpop.f32.mrf.mxu0 }
 0x322   : > { %v8483_v55 = vpop.f32.mrf.mxu1  ;;  %9798 = vst [vmem:[#allocation84_spill] sm:$0xff] %v8505_v61 }
 0x323   : > { %9790 = vst [vmem:[#allocation76_spill] sm:$0xff] %v8483_v55  ;;  %v8511_v17 = vpop.f32.mrf.mxu0 }
 0x324   : > { %v8485_v29 = vpop.f32.mrf.mxu1  ;;  %9801 = vst [vmem:[#allocation87_spill] sm:$0xff] %v8511_v17 }
 0x325   : > { %9791 = vst [vmem:[#allocation77_spill] sm:$0xff] %v8485_v29  ;;  %v8517_v8 = vpop.f32.mrf.mxu0 }
 0x326   : > { %v8495_v45 = vpop.f32.mrf.mxu1  ;;  %9804 = vst [vmem:[#allocation90_spill] sm:$0xff] %v8517_v8 }
 0x327   : > { %9793 = vst [vmem:[#allocation79_spill] sm:$0xff] %v8495_v45  ;;  %v8519_v2 = vpop.f32.mrf.mxu0 }
 0x328   : > { %v8497_v54 = vpop.f32.mrf.mxu1  ;;  %9805 = vst [vmem:[#allocation91_spill] sm:$0xff] %v8519_v2 }
 0x329   : > { %9794 = vst [vmem:[#allocation80_spill] sm:$0xff] %v8497_v54  ;;  %v8530_v61 = vpop.f32.mrf.mxu0 }
 0x32a   : > { %v8501_v55 = vpop.f32.mrf.mxu1 }
 0x32b   : > { %9796 = vst [vmem:[#allocation82_spill] sm:$0xff] %v8501_v55 }
 0x32c   : > { %v8503_v29 = vpop.f32.mrf.mxu1 }
 0x32d   : > { %9797 = vst [vmem:[#allocation83_spill] sm:$0xff] %v8503_v29 }
 0x32e   : > { %v8507_v47 = vpop.f32.mrf.mxu1 }
 0x32f   : > { %9799 = vst [vmem:[#allocation85_spill] sm:$0xff] %v8507_v47  ;;  %v2016_v47 = vadd.f32 %v8353_v33, %v8078_v44 }
 0x330   : > { %v8509_v62 = vpop.f32.mrf.mxu1 }
 0x331   : > { %9800 = vst [vmem:[#allocation86_spill] sm:$0xff] %v8509_v62  ;;  %v2020_v62 = vadd.f32 %v8360_v37, %v8083_v49 }
 0x332   : > { %v8513_v39 = vpop.f32.mrf.mxu1 }
 0x333   : > { %9802 = vst [vmem:[#allocation88_spill] sm:$0xff] %v8513_v39 }
 0x334   : > { %v8515_v53 = vpop.f32.mrf.mxu1 }
 0x335   : > { %9803 = vst [vmem:[#allocation89_spill] sm:$0xff] %v8515_v53  ;;  %v2018_v53 = vadd.f32 %v8356_v59, %v8081_v60  ;;  %v6917_v59 = vld [vmem:[%s9667_s7 + $0x70] ss:$8 sps:$4 sm:$0xff]  }
 0x336   : > { %v2679_v54 = vpop.f32.mrf.mxu1 }
 0x337   : > { %v2680_v29 = vadd.f32 %v2679_v54, %v8358_v21  ;;  %v2022_v54 = vadd.f32 %v8365_v0, %v8091_v63  ;;  %v6923_v63 = vld [vmem:[%s9667_s7 + $0x170] ss:$8 sps:$4 sm:$0xff]  }
 0x338   : > { %v2681_v45 = vpop.f32.mrf.mxu1 }
 0x339   : > { %v2682_v17 = vadd.f32 %v2681_v45, %v8367_v24  ;;  %v2808_v21 = vmax.f32 %v2016_v47, %v2680_v29  ;;  %v8535_v45 = vpop.f32.mrf.mxu0  ;;  %v2026_v47 = vadd.f32 %v8369_v41, %v8093_v26  ;;  %v2028_v41 = vadd.f32 %v8371_v12, %v8096_v19  ;;  %v6935_v19 = vld [vmem:[%s9667_s7 + $0x160] ss:$8 sps:$4 sm:$0xff]  }
 0x33a   : > { %v2683_v55 = vpop.f32.mrf.mxu1  ;;  %v2032_v26 = vadd.f32 %v8377_v40, %v8106_v30  ;;  %v6928_v30 = vld [vmem:[%s9667_s7 + $0x54] ss:$8 sps:$4 sm:$0xff]  }
 0x33b   : > { %v2684_v39 = vadd.f32 %v2683_v55, %v8373_v31  ;;  %v2809_v51 = vmax.f32 %v2018_v53, %v2682_v17  ;;  %v2030_v17 = vadd.f32 %v8375_v4, %v8098_v38 }
 0x33c   : > { %v2685_v8 = vpop.f32.mrf.mxu1 }
 0x33d   : > { %v2810_v2 = vmax.f32 %v2020_v62, %v2684_v39  ;;  %v2686_v44 = vadd.f32 %v2685_v8, %v8379_v10  ;;  %v6922_v62 = vld [vmem:[%s9667_s7 + $0x64] ss:$8 sps:$4 sm:$0xff]   ;;  %v8562_v10 = vpop.f32.mrf.mxu0 }
 0x33e   : > { %v2689_v33 = vpop.f32.mrf.mxu1 }
 0x33f   : > { %v2860_v49 = vpack.c.bf16 %v2810_v2, %v2808_v21  ;;  %v2811_v37 = vmax.f32 %v2022_v54, %v2686_v44  ;;  %v2690_v60 = vadd.f32 %v2689_v33, %v8385_v1  ;;  %v8577_v8 = vpop.f32.mrf.mxu0  ;;  %v6926_v44 = vld [vmem:[%s9667_s7 + $0x50] ss:$8 sps:$4 sm:$0xff]  }
 0x340   : > { %v2691_v24 = vpop.f32.mrf.mxu1  ;;  %v6950_v33 = vld [vmem:[%s9667_s7 + $0x150] ss:$8 sps:$4 sm:$0xff]  }
 0x341   : > { %v2861_v55 = vpack.c.bf16 %v2811_v37, %v2809_v51  ;;  %v6937_v51 = vld [vmem:[%s9667_s7 + $0x164] ss:$8 sps:$4 sm:$0xff]   ;;  %v2692_v29 = vadd.f32 %v2691_v24, %v8391_v28  ;;  %v2812_v4 = vmax.f32 %v2026_v47, %v2690_v60 }
 0x342   : > { %v2693_v2 = vpop.f32.mrf.mxu1  ;;  %v6931_v24 = vld [vmem:[%s9667_s7 + $0x44] ss:$8 sps:$4 sm:$0xff]  }
 0x343   : > { %v2694_v39 = vadd.f32 %v2693_v2, %v8397_v25  ;;  %6224 = vmatprep.mubr.msk.bf16.mxu0 %vm2965_vm4, %v2861_v55  ;;  %6247 = vmatprep.mubr.msk.bf16.mxu1 %vm2965_vm4, %v2861_v55  ;;  %v6920_v25 = vld [vmem:[%s9667_s7 + $0x60] ss:$8 sps:$4 sm:$0xff]   ;;  %v2813_v12 = vmax.f32 %v2028_v41, %v2692_v29  ;;  %v2046_v29 = vadd.f32 %v8393_v56, %v8123_v48  ;;  %v6940_v41 = vld [vmem:[%s9667_s7 + $0x24] ss:$8 sps:$4 sm:$0xff]  }
 0x344   : > { %v2695_v1 = vpop.f32.mrf.mxu1  ;;  %3042 = vmatmul.mubr.bf16.vlgmr.msra.gmra.mxu0 %v2860_v49  ;;  %3261 = vmatmul.mubr.bf16.vlgmr.msra.gmra.mxu1 %v2860_v49  ;;  %v2036_v49 = vadd.f32 %v8381_v16, %v8108_v57  ;;  %v2038_v57 = vadd.f32 %v8383_v7, %v8111_v36  ;;  %v2042_v16 = vadd.f32 %v8389_v35, %v8121_v20  ;;  %v6934_v36 = vld [vmem:[%s9667_s7 + $0x34] ss:$8 sps:$4 sm:$0xff]  }
 0x345   : > { %v2814_v38 = vmax.f32 %v2030_v17, %v2694_v39  ;;  %v2696_v0 = vadd.f32 %v2695_v1, %v8403_v9  ;;  %3874 = vmatpush1.bf16.msra.mxu0 %v6917_v59  ;;  %4037 = vmatpush1.bf16.msra.mxu1 %v6923_v63  ;;  %v6952_v9 = vld [vmem:[%s9667_s7 + $0x154] ss:$8 sps:$4 sm:$0xff]   ;;  %v8601_v63 = vpop.f32.mrf.mxu0  ;;  %v6932_v17 = vld [vmem:[%s9667_s7 + $0x30] ss:$8 sps:$4 sm:$0xff]   ;;  %v2048_v48 = vadd.f32 %v8395_v11, %v8126_v43 }
 0x346   : > { %v2699_v40 = vpop.f32.mrf.mxu1  ;;  %3875 = vmatprep.subr.bf16.mxu0 %v6922_v62  ;;  %4038 = vmatprep.subr.bf16.mxu1 %v6937_v51  ;;  %v6943_v43 = vld [vmem:[%s9667_s7 + $0x14] ss:$8 sps:$4 sm:$0xff]  }
 0x347   : > { %v2862_v31 = vpack.c.bf16 %v2814_v38, %v2812_v4  ;;  %v2815_v28 = vmax.f32 %v2032_v26, %v2696_v0  ;;  %v2700_v21 = vadd.f32 %v2699_v40, %v8409_v22  ;;  %v2040_v22 = vadd.f32 %v8387_v23, %v8113_v34  ;;  %v8610_v62 = vpop.f32.mrf.mxu0 }
 0x348   : > { %v2701_v53 = vpop.f32.mrf.mxu1  ;;  %v2050_v26 = vadd.f32 %v8399_v58, %v8128_v52  ;;  %v2052_v38 = vadd.f32 %v8401_v14, %v8136_v5 }
 0x349   : > { %v2863_v54 = vpack.c.bf16 %v2815_v28, %v2813_v12  ;;  %3876 = vmatpush1.bf16.msra.mxu0 %v6920_v25  ;;  %4039 = vmatpush1.bf16.msra.mxu1 %v6935_v19  ;;  %v2702_v55 = vadd.f32 %v2701_v53, %v8415_v18  ;;  %v2816_v34 = vmax.f32 %v2036_v49, %v2700_v21  ;;  %v8629_v4 = vpop.f32.mrf.mxu0  ;;  %v9806_v28 = vld [vmem:[#allocation13_spill] sm:$0xff]  ;;  %v9807_v53 = vld [vmem:[#allocation48_spill] sm:$0xff]  ;;  %v9808_v21 = vld [vmem:[#allocation66_spill] sm:$0xff] }
 0x34a   : > { %v2703_v37 = vpop.f32.mrf.mxu1  ;;  %3877 = vmatprep.subr.bf16.mxu0 %v6928_v30  ;;  %4040 = vmatprep.subr.bf16.mxu1 %v6952_v9  ;;  %v6941_v30 = vld [vmem:[%s9667_s7 + $0x10] ss:$8 sps:$4 sm:$0xff]   ;;  %v2056_v9 = vadd.f32 %v8405_v42, %v8138_v32  ;;  %v9810_v49 = vld [vmem:[#allocation12_spill] sm:$0xff] }
 0x34b   : > { %v2704_v60 = vadd.f32 %v2703_v37, %v8421_v27  ;;  %6225 = vmatprep.mubr.msk.bf16.mxu0 %vm2965_vm4, %v2863_v54  ;;  %6248 = vmatprep.mubr.msk.bf16.mxu1 %vm2965_vm4, %v2863_v54  ;;  %v6929_v27 = vld [vmem:[%s9667_s7 + $0x40] ss:$8 sps:$4 sm:$0xff]   ;;  %v2817_v20 = vmax.f32 %v2038_v57, %v2702_v55  ;;  %v8640_v5 = vpop.f32.mrf.mxu0  ;;  %v2060_v54 = vadd.f32 %v9807_v53, %v9806_v28  ;;  %v9813_v55 = vld [vmem:[#allocation49_spill] sm:$0xff] }
 0x34c   : > { %v2705_v59 = vpop.f32.mrf.mxu1  ;;  %3050 = vmatmul.mubr.bf16.gmra.mxu0 %v2862_v31  ;;  %3269 = vmatmul.mubr.bf16.gmra.mxu1 %v2862_v31  ;;  %v6946_v31 = vld [vmem:[%s9667_s7 + $0x4] ss:$8 sps:$4 sm:$0xff]   ;;  %v6958_v53 = vld [vmem:[%s9667_s7 + $0xd4] ss:$8 sps:$4 sm:$0xff]  }
 0x34d   : > { %v2818_v23 = vmax.f32 %v2040_v22, %v2704_v60  ;;  %v2706_v18 = vadd.f32 %v2705_v59, %v8427_v6  ;;  %3878 = vmatpush1.bf16.msra.mxu0 %v6926_v44  ;;  %4041 = vmatpush1.bf16.msra.mxu1 %v6950_v33  ;;  %v9811_v37 = vld [vmem:[#allocation47_spill] sm:$0xff]  ;;  %v9812_v22 = vld [vmem:[#allocation14_spill] sm:$0xff]  ;;  %v9814_v59 = vld [vmem:[#allocation72_spill] sm:$0xff] }
 0x34e   : > { %v2709_v47 = vpop.f32.mrf.mxu1  ;;  %3879 = vmatprep.subr.bf16.mxu0 %v6931_v24  ;;  %v2058_v32 = vadd.f32 %v9811_v37, %v9810_v49  ;;  %v8659_v24 = vpop.f32.mrf.mxu0  ;;  %v2062_v60 = vadd.f32 %v9813_v55, %v9812_v22  ;;  %v9827_v37 = vld [vmem:[#allocation87_spill] sm:$0xff]  ;;  %v9829_v55 = vld [vmem:[#allocation54_spill] sm:$0xff] }
 0x34f   : > { %v2864_v35 = vpack.c.bf16 %v2818_v23, %v2816_v34  ;;  %v2819_v7 = vmax.f32 %v2042_v16, %v2706_v18  ;;  %v2710_v6 = vadd.f32 %v2709_v47, %v8433_v15  ;;  %v6944_v23 = vld [vmem:[%s9667_s7] ss:$8 sps:$4 sm:$0xff]  }
 0x350   : > { %v2711_v2 = vpop.f32.mrf.mxu1  ;;  %v9828_v22 = vld [vmem:[#allocation19_spill] sm:$0xff] }
 0x351   : > { %v2865_v51 = vpack.c.bf16 %v2819_v7, %v2817_v20  ;;  %3880 = vmatpush1.bf16.msra.mxu0 %v6929_v27  ;;  %v2712_v1 = vadd.f32 %v2711_v2, %v8439_v50  ;;  %v2820_v52 = vmax.f32 %v2046_v29, %v2710_v6  ;;  %v6949_v27 = vld [vmem:[%s9667_s7 + $0xf4] ss:$8 sps:$4 sm:$0xff]   ;;  %v8670_v7 = vpop.f32.mrf.mxu0  ;;  %v9816_v29 = vld [vmem:[#allocation15_spill] sm:$0xff] }
 0x352   : > { %v2713_v39 = vpop.f32.mrf.mxu1  ;;  %3881 = vmatprep.subr.bf16.mxu0 %v6934_v36 }
 0x353   : > { %v2714_v15 = vadd.f32 %v2713_v39, %v8445_v13  ;;  %6226 = vmatprep.mubr.msk.bf16.mxu0 %vm2965_vm4, %v2865_v51  ;;  %6249 = vmatprep.mubr.msk.bf16.mxu1 %vm2965_vm4, %v2865_v51  ;;  %v6938_v13 = vld [vmem:[%s9667_s7 + $0x20] ss:$8 sps:$4 sm:$0xff]   ;;  %v2821_v11 = vmax.f32 %v2048_v48, %v2712_v1  ;;  %v9817_v39 = vld [vmem:[#allocation50_spill] sm:$0xff]  ;;  %v6955_v1 = vld [vmem:[%s9667_s7 + $0xe4] ss:$8 sps:$4 sm:$0xff]  }
 0x354   : > { %v2715_v56 = vpop.f32.mrf.mxu1  ;;  %3058 = vmatmul.mubr.bf16.gmra.mxu0 %v2864_v35  ;;  %3277 = vmatmul.mubr.bf16.gmra.mxu1 %v2864_v35  ;;  %v9815_v51 = vld [vmem:[#allocation75_spill] sm:$0xff]  ;;  %v9819_v48 = vld [vmem:[#allocation52_spill] sm:$0xff] }
 0x355   : > { %v2822_v58 = vmax.f32 %v2050_v26, %v2714_v15  ;;  %v2716_v50 = vadd.f32 %v2715_v56, %v8451_v3  ;;  %3882 = vmatpush1.bf16.msra.mxu0 %v6932_v17  ;;  %v6947_v17 = vld [vmem:[%s9667_s7 + $0xf0] ss:$8 sps:$4 sm:$0xff]  }
 0x356   : > { %v2719_v0 = vpop.f32.mrf.mxu1  ;;  %3883 = vmatprep.subr.bf16.mxu0 %v6940_v41  ;;  %v2066_v41 = vadd.f32 %v9817_v39, %v9816_v29  ;;  %v9818_v15 = vld [vmem:[#allocation17_spill] sm:$0xff] }
 0x357   : > { %v2866_v25 = vpack.c.bf16 %v2822_v58, %v2820_v52  ;;  %v2823_v19 = vmax.f32 %v2052_v38, %v2716_v50  ;;  %v2720_v3 = vadd.f32 %v2719_v0, %v8457_v46  ;;  %v9809_v46 = vld [vmem:[#allocation69_spill] sm:$0xff]  ;;  %v2070_v56 = vadd.f32 %v9819_v48, %v9818_v15  ;;  %v9820_v38 = vld [vmem:[#allocation78_spill] sm:$0xff]  ;;  %v9823_v0 = vld [vmem:[#allocation51_spill] sm:$0xff] }
 0x358   : > { %v2721_v40 = vpop.f32.mrf.mxu1  ;;  %v9821_v58 = vld [vmem:[#allocation81_spill] sm:$0xff] }
 0x359   : > { %v2867_v14 = vpack.c.bf16 %v2823_v19, %v2821_v11  ;;  %3884 = vmatpush1.bf16.msra.mxu0 %v6938_v13  ;;  %v2722_v44 = vadd.f32 %v2721_v40, %v9808_v21  ;;  %v2824_v57 = vmax.f32 %v2056_v9, %v2720_v3  ;;  %v9822_v13 = vld [vmem:[#allocation16_spill] sm:$0xff]  ;;  %v9824_v19 = vld [vmem:[#allocation18_spill] sm:$0xff]  ;;  %v9825_v40 = vld [vmem:[#allocation53_spill] sm:$0xff] }
 0x35a   : > { %v2723_v12 = vpop.f32.mrf.mxu1  ;;  %3885 = vmatprep.subr.bf16.mxu0 %v6943_v43  ;;  %v2068_v43 = vadd.f32 %v9823_v0, %v9822_v13  ;;  %v9826_v9 = vld [vmem:[#allocation84_spill] sm:$0xff]  ;;  %v9838_v13 = vld [vmem:[#allocation23_spill] sm:$0xff]  ;;  %v9839_v0 = vld [vmem:[#allocation58_spill] sm:$0xff] }
 0x35b   : > { %v2724_v33 = vadd.f32 %v2723_v12, %v9809_v46  ;;  %6227 = vmatprep.mubr.msk.bf16.mxu0 %vm2965_vm4, %v2867_v14  ;;  %6250 = vmatprep.mubr.msk.bf16.mxu1 %vm2965_vm4, %v2867_v14  ;;  %v2825_v47 = vmax.f32 %v2058_v32, %v2722_v44  ;;  %v2072_v14 = vadd.f32 %v9825_v40, %v9824_v19  ;;  %v9840_v19 = vld [vmem:[#allocation25_spill] sm:$0xff]  ;;  %v9841_v40 = vld [vmem:[#allocation60_spill] sm:$0xff] }
 0x35c   : > { %v2725_v42 = vpop.f32.mrf.mxu1  ;;  %3066 = vmatmul.mubr.bf16.gmra.mxu0 %v2866_v25  ;;  %3285 = vmatmul.mubr.bf16.gmra.mxu1 %v2866_v25  ;;  %v8689_v25 = vpop.f32.mrf.mxu0 }
 0x35d   : > { %v2826_v16 = vmax.f32 %v2060_v54, %v2724_v33  ;;  %v2726_v34 = vadd.f32 %v2725_v42, %v9814_v59  ;;  %3886 = vmatpush1.bf16.msra.mxu0 %v6941_v30  ;;  %v6956_v42 = vld [vmem:[%s9667_s7 + $0xd0] ss:$8 sps:$4 sm:$0xff]   ;;  %v9831_v59 = vld [vmem:[#allocation56_spill] sm:$0xff] }
 0x35e   : > { %v2729_v18 = vpop.f32.mrf.mxu1  ;;  %3887 = vmatprep.subr.bf16.mxu0 %v6946_v31  ;;  %v6953_v31 = vld [vmem:[%s9667_s7 + $0xe0] ss:$8 sps:$4 sm:$0xff]   ;;  %v8700_v33 = vpop.f32.mrf.mxu0 }
 0x35f   : > { %v2868_v36 = vpack.c.bf16 %v2826_v16, %v2824_v57  ;;  %v2827_v20 = vmax.f32 %v2062_v60, %v2726_v34  ;;  %v2730_v6 = vadd.f32 %v2729_v18, %v9815_v51  ;;  %v2076_v60 = vadd.f32 %v9829_v55, %v9828_v22  ;;  %v9830_v16 = vld [vmem:[#allocation21_spill] sm:$0xff] }
 0x360   : > { %v2731_v35 = vpop.f32.mrf.mxu1  ;;  %v2080_v34 = vadd.f32 %v9831_v59, %v9830_v16  ;;  %v8716_v51 = vpop.f32.mrf.mxu0 }
 0x361   : > { %v2869_v2 = vpack.c.bf16 %v2827_v20, %v2825_v47  ;;  %3888 = vmatpush1.bf16.msra.mxu0 %v6944_v23  ;;  %v2732_v52 = vadd.f32 %v2731_v35, %v9820_v38  ;;  %v2828_v3 = vmax.f32 %v2066_v41, %v2730_v6  ;;  %v9832_v23 = vld [vmem:[#allocation90_spill] sm:$0xff]  ;;  %v9835_v20 = vld [vmem:[#allocation55_spill] sm:$0xff] }
 0x362   : > { %v2733_v26 = vpop.f32.mrf.mxu1  ;;  %3889 = vmatprep.subr.bf16.mxu0 %v6949_v27  ;;  %v9833_v27 = vld [vmem:[#allocation91_spill] sm:$0xff]  ;;  %v9836_v6 = vld [vmem:[#allocation22_spill] sm:$0xff] }
 0x363   : > { %v2734_v50 = vadd.f32 %v2733_v26, %v9821_v58  ;;  %6228 = vmatprep.mubr.msk.bf16.mxu0 %vm2965_vm4, %v2869_v2  ;;  %6251 = vmatprep.mubr.msk.bf16.mxu1 %vm2965_vm4, %v2869_v2  ;;  %v2829_v54 = vmax.f32 %v2068_v43, %v2732_v52  ;;  %v8721_v52 = vpop.f32.mrf.mxu0  ;;  %v2086_v43 = vadd.f32 %v9839_v0, %v9838_v13 }
 0x364   : > { %v2735_v11 = vpop.f32.mrf.mxu1  ;;  %3074 = vmatmul.mubr.bf16.gmra.mxu0 %v2868_v36  ;;  %3293 = vmatmul.mubr.bf16.gmra.mxu1 %v2868_v36  ;;  %v9834_v36 = vld [vmem:[#allocation20_spill] sm:$0xff] }
 0x365   : > { %v2830_v30 = vmax.f32 %v2070_v56, %v2734_v50  ;;  %v2736_v12 = vadd.f32 %v2735_v11, %v9826_v9  ;;  %3890 = vmatpush2.bf16.msra.mxu0 %v6947_v17  ;;  %v2078_v35 = vadd.f32 %v9835_v20, %v9834_v36  ;;  %v9837_v17 = vld [vmem:[#allocation57_spill] sm:$0xff]  ;;  %v9843_v9 = vld [vmem:[#allocation59_spill] sm:$0xff] }
 0x366   : > { %v2739_v28 = vpop.f32.mrf.mxu1  ;;  %3891 = vmatprep.subr.bf16.mxu0 %v6955_v1  ;;  %v2082_v29 = vadd.f32 %v9837_v17, %v9836_v6  ;;  %v9851_v36 = vld [vmem:[#allocation63_spill] sm:$0xff]  ;;  %v9853_v6 = vld [vmem:[#allocation65_spill] sm:$0xff] }
 0x367   : > { %v2870_v21 = vpack.c.bf16 %v2830_v30, %v2828_v3  ;;  %v2831_v44 = vmax.f32 %v2072_v14, %v2736_v12  ;;  %v2740_v32 = vadd.f32 %v2739_v28, %v9827_v37  ;;  %v2090_v14 = vadd.f32 %v9841_v40, %v9840_v19  ;;  %v9842_v30 = vld [vmem:[#allocation24_spill] sm:$0xff]  ;;  %v9844_v28 = vld [vmem:[#allocation26_spill] sm:$0xff] }
 0x368   : > { %v2741_v46 = vpop.f32.mrf.mxu1  ;;  %v2088_v12 = vadd.f32 %v9843_v9, %v9842_v30 }
 0x369   : > { %v2871_v49 = vpack.c.bf16 %v2831_v44, %v2829_v54  ;;  %3892 = vmatpush2.bf16.msra.mxu0 %v6953_v31  ;;  %v2742_v18 = vadd.f32 %v2741_v46, %v9832_v23  ;;  %v2832_v39 = vmax.f32 %v2076_v60, %v2740_v32  ;;  %v9846_v60 = vld [vmem:[#allocation27_spill] sm:$0xff]  ;;  %v9849_v23 = vld [vmem:[#allocation64_spill] sm:$0xff] }
 0x36a   : > { %v2743_v57 = vpop.f32.mrf.mxu1  ;;  %3893 = vmatprep.subr.bf16.mxu0 %v6958_v53  ;;  %v9845_v53 = vld [vmem:[#allocation61_spill] sm:$0xff] }
 0x36b   : > { %v2744_v47 = vadd.f32 %v2743_v57, %v9833_v27  ;;  %6229 = vmatprep.mubr.msk.bf16.mxu0 %vm2965_vm4, %v2871_v49  ;;  %6252 = vmatprep.mubr.msk.bf16.mxu1 %vm2965_vm4, %v2871_v49  ;;  %v2833_v15 = vmax.f32 %v2078_v35, %v2742_v18  ;;  %v2092_v54 = vadd.f32 %v9845_v53, %v9844_v28  ;;  %v9847_v57 = vld [vmem:[#allocation62_spill] sm:$0xff] }
 0x36c   : > { %v2745_v2 = vpop.f32.mrf.mxu1  ;;  %3082 = vmatmul.mubr.bf16.gmra.mxu0 %v2870_v21  ;;  %3301 = vmatmul.mubr.bf16.gmra.mxu1 %v2870_v21  ;;  %v2096_v16 = vadd.f32 %v9847_v57, %v9846_v60  ;;  %v9862_v57 = vld [vmem:[#allocation35_spill] sm:$0xff] }
 0x36d   : > { %v2834_v41 = vmax.f32 %v2080_v34, %v2744_v47  ;;  %v2746_v26 = vadd.f32 %v2745_v2, %v8530_v61  ;;  %3894 = vmatpush2.bf16.msra.mxu0 %v6956_v42  ;;  %v9848_v34 = vld [vmem:[#allocation29_spill] sm:$0xff]  ;;  %v9850_v47 = vld [vmem:[#allocation28_spill] sm:$0xff]  ;;  %v9852_v2 = vld [vmem:[#allocation30_spill] sm:$0xff] }
 0x36e   : > { %v2749_v1 = vpop.f32.mrf.mxu1  ;;  %v2100_v18 = vadd.f32 %v9849_v23, %v9848_v34  ;;  %v2098_v20 = vadd.f32 %v9851_v36, %v9850_v47  ;;  %v2102_v17 = vadd.f32 %v9853_v6, %v9852_v2  ;;  %v6970_v23 = vld [vmem:[%s9667_s7 + $0xb4] ss:$8 sps:$4 sm:$0xff]  }
 0x36f   : > { %v2872_v48 = vpack.c.bf16 %v2834_v41, %v2832_v39  ;;  %v2835_v56 = vmax.f32 %v2082_v29, %v2746_v26  ;;  %v2750_v50 = vadd.f32 %v2749_v1, %v8535_v45  ;;  %v8734_v45 = vpop.f32.mrf.mxu0  ;;  %v9867_v2 = vld [vmem:[#allocation74_spill] sm:$0xff] }
 0x370   : > { %v2751_v38 = vpop.f32.mrf.mxu1 }
 0x371   : > { %v2873_v58 = vpack.c.bf16 %v2835_v56, %v2833_v15  ;;  %v2752_v61 = vadd.f32 %v2751_v38, %v8562_v10  ;;  %v2836_v21 = vmax.f32 %v2086_v43, %v2750_v50  ;;  %v8739_v42 = vpop.f32.mrf.mxu0  ;;  %v9855_v50 = vld [vmem:[#allocation67_spill] sm:$0xff]  ;;  %v9856_v43 = vld [vmem:[#allocation33_spill] sm:$0xff] }
 0x372   : > { %v2753_v11 = vpop.f32.mrf.mxu1 }
 0x373   : > { %v2754_v3 = vadd.f32 %v2753_v11, %v8577_v8  ;;  %6230 = vmatprep.mubr.msk.bf16.mxu0 %vm2965_vm4, %v2873_v58  ;;  %6253 = vmatprep.mubr.msk.bf16.mxu1 %vm2965_vm4, %v2873_v58  ;;  %v2837_v46 = vmax.f32 %v2088_v12, %v2752_v61  ;;  %v9854_v58 = vld [vmem:[#allocation31_spill] sm:$0xff]  ;;  %v9857_v11 = vld [vmem:[#allocation70_spill] sm:$0xff]  ;;  %v9859_v61 = vld [vmem:[#allocation68_spill] sm:$0xff] }
 0x374   : > { %v2755_v31 = vpop.f32.mrf.mxu1  ;;  %3090 = vmatmul.mubr.bf16.gmra.mxu0 %v2872_v48  ;;  %3309 = vmatmul.mubr.bf16.gmra.mxu1 %v2872_v48  ;;  %v2106_v13 = vadd.f32 %v9855_v50, %v9854_v58  ;;  %v2110_v19 = vadd.f32 %v9857_v11, %v9856_v43  ;;  %v9861_v12 = vld [vmem:[#allocation71_spill] sm:$0xff]  ;;  %v6977_v43 = vld [vmem:[%s9667_s7 + $0x110] ss:$8 sps:$4 sm:$0xff]  }
 0x375   : > { %v2838_v44 = vmax.f32 %v2090_v14, %v2754_v3  ;;  %v2756_v10 = vadd.f32 %v2755_v31, %v8601_v63  ;;  %v6961_v14 = vld [vmem:[%s9667_s7 + $0x144] ss:$8 sps:$4 sm:$0xff]  }
 0x376   : > { %v2759_v8 = vpop.f32.mrf.mxu1  ;;  %4042 = vmatprep.subr.bf16.mxu1 %v6961_v14 }
 0x377   : > { %v2874_v49 = vpack.c.bf16 %v2838_v44, %v2836_v21  ;;  %v2839_v37 = vmax.f32 %v2092_v54, %v2756_v10  ;;  %v2760_v55 = vadd.f32 %v2759_v8, %v8610_v62  ;;  %v8752_v62 = vpop.f32.mrf.mxu0  ;;  %v6962_v44 = vld [vmem:[%s9667_s7 + $0xc0] ss:$8 sps:$4 sm:$0xff]   ;;  %v6964_v10 = vld [vmem:[%s9667_s7 + $0xc4] ss:$8 sps:$4 sm:$0xff]  }
 0x378   : > { %v2761_v32 = vpop.f32.mrf.mxu1  ;;  %3895 = vmatprep.subr.bf16.mxu0 %v6964_v10 }
 0x379   : > { %v2875_v22 = vpack.c.bf16 %v2839_v37, %v2837_v46  ;;  %v2762_v27 = vadd.f32 %v2761_v32, %v8629_v4  ;;  %v2840_v29 = vmax.f32 %v2096_v16, %v2760_v55  ;;  %v8757_v48 = vpop.f32.mrf.mxu0  ;;  %v6967_v37 = vld [vmem:[%s9667_s7 + $0x134] ss:$8 sps:$4 sm:$0xff]   ;;  %3896 = vmatpush2.bf16.msra.mxu0 %v6962_v44  ;;  %v9877_v44 = vld [vmem:[#allocation83_spill] sm:$0xff] }
 0x37a   : > { %v2763_v59 = vpop.f32.mrf.mxu1  ;;  %v9863_v16 = vld [vmem:[#allocation73_spill] sm:$0xff]  ;;  %3897 = vmatprep.subr.bf16.mxu0 %v6970_v23 }
 0x37b   : > { %v2764_v63 = vadd.f32 %v2763_v59, %v8640_v5  ;;  %6231 = vmatprep.mubr.msk.bf16.mxu0 %vm2965_vm4, %v2875_v22  ;;  %6254 = vmatprep.mubr.msk.bf16.mxu1 %vm2965_vm4, %v2875_v22  ;;  %v2841_v41 = vmax.f32 %v2098_v20, %v2762_v27  ;;  %v8773_v9 = vpop.f32.mrf.mxu0  ;;  %v6965_v22 = vld [vmem:[%s9667_s7 + $0x130] ss:$8 sps:$4 sm:$0xff]   ;;  %v2116_v59 = vadd.f32 %v9863_v16, %v9862_v57  ;;  %v9865_v27 = vld [vmem:[#allocation76_spill] sm:$0xff] }
 0x37c   : > { %v2765_v35 = vpop.f32.mrf.mxu1  ;;  %3098 = vmatmul.mubr.bf16.gmra.mxu0 %v2874_v49  ;;  %3317 = vmatmul.mubr.bf16.gmra.mxu1 %v2874_v49  ;;  %v6973_v20 = vld [vmem:[%s9667_s7 + $0x124] ss:$8 sps:$4 sm:$0xff]  }
 0x37d   : > { %v2842_v39 = vmax.f32 %v2100_v18, %v2764_v63  ;;  %v2766_v4 = vadd.f32 %v2765_v35, %v8659_v24  ;;  %v9864_v18 = vld [vmem:[#allocation37_spill] sm:$0xff]  ;;  %v9866_v35 = vld [vmem:[#allocation36_spill] sm:$0xff] }
 0x37e   : > { %v2769_v5 = vpop.f32.mrf.mxu1  ;;  %v2120_v63 = vadd.f32 %v9865_v27, %v9864_v18  ;;  %v2118_v6 = vadd.f32 %v9867_v2, %v9866_v35  ;;  %v9878_v27 = vld [vmem:[#allocation43_spill] sm:$0xff] }
 0x37f   : > { %v2876_v26 = vpack.c.bf16 %v2842_v39, %v2840_v29  ;;  %v2843_v1 = vmax.f32 %v2102_v17, %v2766_v4  ;;  %v2770_v38 = vadd.f32 %v2769_v5, %v8670_v7  ;;  %v9858_v7 = vld [vmem:[#allocation32_spill] sm:$0xff]  ;;  %v9868_v17 = vld [vmem:[#allocation38_spill] sm:$0xff]  ;;  %v9869_v29 = vld [vmem:[#allocation77_spill] sm:$0xff] }
 0x380   : > { %v2771_v15 = vpop.f32.mrf.mxu1  ;;  %v2108_v3 = vadd.f32 %v9859_v61, %v9858_v7  ;;  %v6971_v4 = vld [vmem:[%s9667_s7 + $0x120] ss:$8 sps:$4 sm:$0xff]   ;;  %v6982_v61 = vld [vmem:[%s9667_s7 + $0x94] ss:$8 sps:$4 sm:$0xff]  }
 0x381   : > { %v2877_v56 = vpack.c.bf16 %v2843_v1, %v2841_v41  ;;  %v2772_v40 = vadd.f32 %v2771_v15, %v8689_v25  ;;  %v6959_v25 = vld [vmem:[%s9667_s7 + $0x140] ss:$8 sps:$4 sm:$0xff]   ;;  %v2844_v28 = vmax.f32 %v2106_v13, %v2770_v38 }
 0x382   : > { %v2773_v0 = vpop.f32.mrf.mxu1  ;;  %4043 = vmatpush1.bf16.msra.mxu1 %v6959_v25  ;;  %v6974_v15 = vld [vmem:[%s9667_s7 + $0xa0] ss:$8 sps:$4 sm:$0xff]  }
 0x383   : > { %v2774_v24 = vadd.f32 %v2773_v0, %v8700_v33  ;;  %6232 = vmatprep.mubr.msk.bf16.mxu0 %vm2965_vm4, %v2877_v56  ;;  %6255 = vmatprep.mubr.msk.bf16.mxu1 %vm2965_vm4, %v2877_v56  ;;  %v9860_v33 = vld [vmem:[#allocation34_spill] sm:$0xff]  ;;  %v2845_v8 = vmax.f32 %v2108_v3, %v2772_v40  ;;  %v6976_v56 = vld [vmem:[%s9667_s7 + $0xa4] ss:$8 sps:$4 sm:$0xff]   ;;  %v9872_v3 = vld [vmem:[#allocation41_spill] sm:$0xff] }
 0x384   : > { %v2775_v30 = vpop.f32.mrf.mxu1  ;;  %3106 = vmatmul.mubr.bf16.gmra.mxu0 %v2876_v26  ;;  %3325 = vmatmul.mubr.bf16.gmra.mxu1 %v2876_v26  ;;  %v2112_v31 = vadd.f32 %v9861_v12, %v9860_v33  ;;  %v9870_v40 = vld [vmem:[#allocation39_spill] sm:$0xff] }
 0x385   : > { %v2846_v53 = vmax.f32 %v2110_v19, %v2774_v24  ;;  %v2776_v54 = vadd.f32 %v2775_v30, %v8716_v51  ;;  %v2630_v51 = vpop.f32.mrf.mxu0  ;;  %4044 = vmatprep.subr.bf16.mxu1 %v6967_v37  ;;  %v9871_v24 = vld [vmem:[#allocation79_spill] sm:$0xff]  ;;  %v9873_v30 = vld [vmem:[#allocation82_spill] sm:$0xff] }
 0x386   : > { %v2779_v21 = vpop.f32.mrf.mxu1  ;;  %4045 = vmatpush1.bf16.msra.mxu1 %v6965_v22  ;;  %v2126_v14 = vadd.f32 %v9871_v24, %v9870_v40  ;;  %v2130_v25 = vadd.f32 %v9873_v30, %v9872_v3  ;;  %v6986_v22 = vld [vmem:[%s9667_s7 + $0x80] ss:$8 sps:$4 sm:$0xff]  }
 0x387   : > { %v2878_v46 = vpack.c.bf16 %v2846_v53, %v2844_v28  ;;  %v2847_v49 = vmax.f32 %v2112_v31, %v2776_v54  ;;  %v2780_v60 = vadd.f32 %v2779_v21, %v8721_v52  ;;  %v6968_v52 = vld [vmem:[%s9667_s7 + $0xb0] ss:$8 sps:$4 sm:$0xff]   ;;  %4046 = vmatprep.subr.bf16.mxu1 %v6973_v20  ;;  %v6985_v31 = vld [vmem:[%s9667_s7 + $0x104] ss:$8 sps:$4 sm:$0xff]  }
 0x388   : > { %v2781_v32 = vpop.f32.mrf.mxu1  ;;  %3898 = vmatpush2.bf16.msra.mxu0 %v6968_v52  ;;  %v9874_v28 = vld [vmem:[#allocation40_spill] sm:$0xff]  ;;  %v9876_v21 = vld [vmem:[#allocation42_spill] sm:$0xff]  ;;  %v9880_v52 = vld [vmem:[#allocation45_spill] sm:$0xff] }
 0x389   : > { %v2879_v55 = vpack.c.bf16 %v2847_v49, %v2845_v8  ;;  %v2782_v47 = vadd.f32 %v2781_v32, %v8734_v45  ;;  %v2122_v45 = vadd.f32 %v9869_v29, %v9868_v17  ;;  %v2848_v5 = vmax.f32 %v2116_v59, %v2780_v60  ;;  %3899 = vmatprep.subr.bf16.mxu0 %v6976_v56  ;;  %v9875_v53 = vld [vmem:[#allocation80_spill] sm:$0xff]  ;;  %v9883_v29 = vld [vmem:[#allocation86_spill] sm:$0xff] }
 0x38a   : > { %v2783_v34 = vpop.f32.mrf.mxu1  ;;  %4047 = vmatpush1.bf16.msra.mxu1 %v6971_v4  ;;  %v2128_v54 = vadd.f32 %v9875_v53, %v9874_v28  ;;  %v2132_v10 = vadd.f32 %v9877_v44, %v9876_v21  ;;  %v9881_v20 = vld [vmem:[#allocation88_spill] sm:$0xff]  ;;  %v9884_v4 = vld [vmem:[#allocation46_spill] sm:$0xff] }
 0x38b   : > { %v2784_v36 = vadd.f32 %v2783_v34, %v8739_v42  ;;  %6233 = vmatprep.mubr.msk.bf16.mxu0 %vm2965_vm4, %v2879_v55  ;;  %6256 = vmatprep.mubr.msk.bf16.mxu1 %vm2965_vm4, %v2879_v55  ;;  %v2632_v42 = vpop.f32.mrf.mxu0  ;;  %v2849_v38 = vmax.f32 %v2118_v6, %v2782_v47  ;;  %v6988_v55 = vld [vmem:[%s9667_s7 + $0x84] ss:$8 sps:$4 sm:$0xff]   ;;  %v2140_v35 = vadd.f32 %v9881_v20, %v9880_v52 }
 0x38c   : > { %v2785_v39 = vpop.f32.mrf.mxu1  ;;  %3114 = vmatmul.mubr.bf16.gmra.mxu0 %v2878_v46  ;;  %3333 = vmatmul.mubr.bf16.gmra.mxu1 %v2878_v46  ;;  %v6983_v46 = vld [vmem:[%s9667_s7 + $0x100] ss:$8 sps:$4 sm:$0xff]  }
 0x38d   : > { %v2850_v41 = vmax.f32 %v2120_v63, %v2784_v36  ;;  %v2786_v26 = vadd.f32 %v2785_v39, %v8752_v62  ;;  %v6979_v62 = vld [vmem:[%s9667_s7 + $0x114] ss:$8 sps:$4 sm:$0xff]   ;;  %v2636_v0 = vpop.f32.mrf.mxu0  ;;  %3900 = vmatpush2.bf16.msra.mxu0 %v6974_v15  ;;  %v9882_v17 = vld [vmem:[#allocation44_spill] sm:$0xff] }
 0x38e   : > { %v2789_v1 = vpop.f32.mrf.mxu1  ;;  %4048 = vmatprep.subr.bf16.mxu1 %v6979_v62  ;;  %3901 = vmatprep.subr.bf16.mxu0 %v6982_v61  ;;  %v9879_v63 = vld [vmem:[#allocation85_spill] sm:$0xff]  ;;  %v9886_v62 = vmov 0  }
 0x38f   : > { %v2880_v58 = vpack.c.bf16 %v2850_v41, %v2848_v5  ;;  %v2851_v50 = vmax.f32 %v2122_v45, %v2786_v26  ;;  %v2790_v19 = vadd.f32 %v2789_v1, %v8757_v48  ;;  %4049 = vmatpush1.bf16.msra.mxu1 %v6977_v43  ;;  %v6980_v48 = vld [vmem:[%s9667_s7 + $0x90] ss:$8 sps:$4 sm:$0xff]   ;;  %v2638_v8 = vpop.f32.mrf.mxu0  ;;  %v2136_v47 = vadd.f32 %v9879_v63, %v9878_v27 }
 0x390   : > { %v2791_v13 = vpop.f32.mrf.mxu1  ;;  %4050 = vmatprep.subr.bf16.mxu1 %v6985_v31  ;;  %v2138_v45 = vadd.f32 %v9883_v29, %v9882_v17  ;;  %v9885_v5 = vld [vmem:[#allocation89_spill] sm:$0xff] }
 0x391   : > { %v2881_v11 = vpack.c.bf16 %v2851_v50, %v2849_v38  ;;  %v2792_v33 = vadd.f32 %v2791_v13, %v8773_v9  ;;  %v2852_v49 = vmax.f32 %v2126_v14, %v2790_v19  ;;  %3902 = vmatpush2.bf16.msra.mxu0 %v6980_v48  ;;  %v2640_v34 = vpop.f32.mrf.mxu0  ;;  %v2142_v41 = vadd.f32 %v9885_v5, %v9884_v4 }
 0x392   : > { %v2793_v7 = vpop.f32.mrf.mxu1  ;;  %3903 = vmatprep.subr.bf16.mxu0 %v6988_v55 }
 0x393   : > { %v2794_v12 = vadd.f32 %v2793_v7, %v2630_v51  ;;  %6234 = vmatprep.mubr.msk.bf16.mxu0 %vm2965_vm4, %v2881_v11  ;;  %6257 = vmatprep.mubr.msk.bf16.mxu1 %vm2965_vm4, %v2881_v11  ;;  %v2853_v60 = vmax.f32 %v2128_v54, %v2792_v33  ;;  %v2642_v39 = vpop.f32.mrf.mxu0 }
 0x394   : > { %v2795_v9 = vpop.f32.mrf.mxu1  ;;  %3122 = vmatmul.mubr.bf16.gmra.mxu0 %v2880_v58  ;;  %3341 = vmatmul.mubr.bf16.gmra.mxu1 %v2880_v58 }
 0x395   : > { %v2854_v37 = vmax.f32 %v2130_v25, %v2794_v12  ;;  %v2796_v32 = vadd.f32 %v2795_v9, %v2632_v42  ;;  %4051 = vmatpush1.bf16.msra.mxu1 %v6983_v46  ;;  %3904 = vmatpush2.bf16.msra.mxu0 %v6986_v22 }
 0x396   : > { %v2799_v51 = vpop.f32.mrf.mxu1 }
 0x397   : > { %v2882_v57 = vpack.c.bf16 %v2854_v37, %v2852_v49  ;;  %v2855_v16 = vmax.f32 %v2132_v10, %v2796_v32  ;;  %v2800_v18 = vadd.f32 %v2799_v51, %v2636_v0 }
 0x398   : > { %v2801_v59 = vpop.f32.mrf.mxu1 }
 0x399   : > { %v2883_v23 = vpack.c.bf16 %v2855_v16, %v2853_v60  ;;  %v2802_v2 = vadd.f32 %v2801_v59, %v2638_v8  ;;  %v2856_v26 = vmax.f32 %v2136_v47, %v2800_v18 }
 0x39a   : > { %v2803_v36 = vpop.f32.mrf.mxu1 }
 0x39b   : > { %v2804_v6 = vadd.f32 %v2803_v36, %v2640_v34  ;;  %6235 = vmatprep.mubr.msk.bf16.mxu0 %vm2965_vm4, %v2883_v23  ;;  %6258 = vmatprep.mubr.msk.bf16.mxu1 %vm2965_vm4, %v2883_v23  ;;  %v2857_v56 = vmax.f32 %v2138_v45, %v2802_v2 }
 0x39c   : > { %v2805_v42 = vpop.f32.mrf.mxu1  ;;  %3130 = vmatmul.mubr.bf16.gmra.mxu0 %v2882_v57  ;;  %3349 = vmatmul.mubr.bf16.gmra.mxu1 %v2882_v57 }
 0x39d   : > { %v2858_v1 = vmax.f32 %v2140_v35, %v2804_v6  ;;  %v2806_v15 = vadd.f32 %v2805_v42, %v2642_v39 }
 0x39f   : > { %v2884_v38 = vpack.c.bf16 %v2858_v1, %v2856_v26  ;;  %v2859_v58 = vmax.f32 %v2142_v41, %v2806_v15 }
 0x3a1   : > { %v2885_v50 = vpack.c.bf16 %v2859_v58, %v2857_v56 }
 0x3a3   : > { %6236 = vmatprep.mubr.msk.bf16.mxu0 %vm2965_vm4, %v2885_v50  ;;  %6259 = vmatprep.mubr.msk.bf16.mxu1 %vm2965_vm4, %v2885_v50 }
 0x3a4   : > { %3138 = vmatmul.mubr.bf16.gmra.mxu0 %v2884_v38  ;;  %3357 = vmatmul.mubr.bf16.gmra.mxu1 %v2884_v38 }
 0x3a5   : > { %4068 = vmatprep.mubr.bf16.mxu1 %v9886_v62 }
 0x404   : > { %v3043_v13 = vpop.f32.mrf.mxu0  ;;  %v3262_v0 = vpop.f32.mrf.mxu1 }
 0x405   : > { %v3365_v24 = vmax.f32 %v3043_v13, %v3262_v0 }
 0x406   : > { %v3045_v43 = vpop.f32.mrf.mxu0  ;;  %v3264_v11 = vpop.f32.mrf.mxu1 }
 0x408   : > { %v3046_v19 = vpop.f32.mrf.mxu0  ;;  %v3265_v40 = vpop.f32.mrf.mxu1 }
 0x409   : > { %v3366_v14 = vmax.f32 %v3046_v19, %v3265_v40 }
 0x40a   : > { %v3048_v7 = vpop.f32.mrf.mxu0  ;;  %v3267_v61 = vpop.f32.mrf.mxu1 }
 0x40b   : > { %v3391_v3 = vpack.c.bf16 %v3366_v14, %v3365_v24 }
 0x40c   : > { %v3051_v30 = vpop.f32.mrf.mxu0  ;;  %v3270_v25 = vpop.f32.mrf.mxu1 }
 0x40d   : > { %v3408_v48 = vshll.u32 %v3391_v3, 16  ;;  %v3367_v53 = vmax.f32 %v3051_v30, %v3270_v25  ;;  %v3535_v49 = vrot.slane %v3391_v3, 1  ;;  %v3406_v32 = vshrl.u32 %v3391_v3, 16 }
 0x40e   : > { %v3053_v33 = vpop.f32.mrf.mxu0  ;;  %v3272_v12 = vpop.f32.mrf.mxu1 }
 0x40f   : > { %v3410_v9 = vrot.slane %v3408_v48, 1 }
 0x410   : > { %v3054_v31 = vpop.f32.mrf.mxu0  ;;  %v3273_v28 = vpop.f32.mrf.mxu1 }
 0x411   : > { %v3368_v54 = vmax.f32 %v3054_v31, %v3273_v28  ;;  %v3411_v57 = vor.u32 %v3410_v9, %v3406_v32 }
 0x412   : > { %v3056_v21 = vpop.f32.mrf.mxu0  ;;  %v3275_v44 = vpop.f32.mrf.mxu1 }
 0x413   : > { %v3392_v10 = vpack.c.bf16 %v3368_v54, %v3367_v53 }
 0x414   : > { %v3059_v8 = vpop.f32.mrf.mxu0  ;;  %v3278_v46 = vpop.f32.mrf.mxu1 }
 0x415   : > { %v3536_v37 = vrot.slane %v3392_v10, 1  ;;  %v3413_v51 = vshll.u32 %v3392_v10, 16  ;;  %v3369_v23 = vmax.f32 %v3059_v8, %v3278_v46  ;;  %v3417_v2 = vshrl.u32 %v3392_v10, 16 }
 0x416   : > { %v3061_v22 = vpop.f32.mrf.mxu0  ;;  %v3280_v55 = vpop.f32.mrf.mxu1 }
 0x417   : > { %v3537_v60 = vsel %vm3534_vm5, %v3535_v49, %v3536_v37  ;;  %v3415_v16 = vrot.slane %v3413_v51, 1 }
 0x418   : > { %v3062_v59 = vpop.f32.mrf.mxu0  ;;  %v3281_v34 = vpop.f32.mrf.mxu1  ;;  %4069 = vmatmul.mubr.bf16.vlgmr.msra.gmra.mxu1 %v3537_v60 }
 0x419   : > { %v3370_v18 = vmax.f32 %v3062_v59, %v3281_v34  ;;  %v3416_v27 = vsel %vm3404_vm6, %v3411_v57, %v3415_v16  ;;  %4078 = vmatprep.mubr.bf16.mxu1 %v9886_v62  ;;  %v3419_v39 = vor.u32 %v3417_v2, %v3415_v16 }
 0x41a   : > { %v3064_v63 = vpop.f32.mrf.mxu0  ;;  %v3283_v47 = vpop.f32.mrf.mxu1  ;;  %3905 = vmatprep.mubr.bf16.mxu0 %v3416_v27 }
 0x41b   : > { %v3393_v36 = vpack.c.bf16 %v3370_v18, %v3369_v23  ;;  %3906 = vmatmul.mubr.bf16.vlgmr.msra.gmra.mxu0 %v3391_v3 }
 0x41c   : > { %v3067_v52 = vpop.f32.mrf.mxu0  ;;  %v3286_v20 = vpop.f32.mrf.mxu1 }
 0x41d   : > { %v3538_v35 = vrot.slane %v3393_v36, 1  ;;  %v3421_v6 = vshll.u32 %v3393_v36, 16  ;;  %v3371_v41 = vmax.f32 %v3067_v52, %v3286_v20  ;;  %v3425_v0 = vshrl.u32 %v3393_v36, 16 }
 0x41e   : > { %v3069_v17 = vpop.f32.mrf.mxu0  ;;  %v3288_v29 = vpop.f32.mrf.mxu1 }
 0x41f   : > { %v3539_v45 = vsel %vm3534_vm5, %v3536_v37, %v3538_v35  ;;  %v3423_v42 = vrot.slane %v3421_v6, 1 }
 0x420   : > { %v3070_v4 = vpop.f32.mrf.mxu0  ;;  %v3289_v5 = vpop.f32.mrf.mxu1  ;;  %4079 = vmatmul.mubr.bf16.gmra.mxu1 %v3539_v45 }
 0x421   : > { %v3372_v26 = vmax.f32 %v3070_v4, %v3289_v5  ;;  %v3424_v1 = vsel %vm3404_vm6, %v3419_v39, %v3423_v42  ;;  %4088 = vmatprep.mubr.bf16.mxu1 %v9886_v62  ;;  %v3427_v24 = vor.u32 %v3425_v0, %v3423_v42 }
 0x422   : > { %v3072_v15 = vpop.f32.mrf.mxu0  ;;  %v3291_v56 = vpop.f32.mrf.mxu1  ;;  %3915 = vmatprep.mubr.bf16.mxu0 %v3424_v1 }
 0x423   : > { %v3394_v38 = vpack.c.bf16 %v3372_v26, %v3371_v41  ;;  %3916 = vmatmul.mubr.bf16.gmra.mxu0 %v3392_v10 }
 0x424   : > { %v3075_v58 = vpop.f32.mrf.mxu0  ;;  %v3294_v50 = vpop.f32.mrf.mxu1 }
 0x425   : > { %v3540_v13 = vrot.slane %v3394_v38, 1  ;;  %v3429_v43 = vshll.u32 %v3394_v38, 16  ;;  %v3373_v3 = vmax.f32 %v3075_v58, %v3294_v50  ;;  %v3433_v54 = vshrl.u32 %v3394_v38, 16 }
 0x426   : > { %v3077_v11 = vpop.f32.mrf.mxu0  ;;  %v3296_v19 = vpop.f32.mrf.mxu1 }
 0x427   : > { %v3541_v40 = vsel %vm3534_vm5, %v3538_v35, %v3540_v13  ;;  %v3431_v14 = vrot.slane %v3429_v43, 1 }
 0x428   : > { %v3078_v7 = vpop.f32.mrf.mxu0  ;;  %v3297_v61 = vpop.f32.mrf.mxu1  ;;  %4089 = vmatmul.mubr.bf16.gmra.mxu1 %v3541_v40 }
 0x429   : > { %v3374_v30 = vmax.f32 %v3078_v7, %v3297_v61  ;;  %v3432_v25 = vsel %vm3404_vm6, %v3427_v24, %v3431_v14  ;;  %4098 = vmatprep.mubr.bf16.mxu1 %v9886_v62  ;;  %v3435_v8 = vor.u32 %v3433_v54, %v3431_v14 }
 0x42a   : > { %v3080_v33 = vpop.f32.mrf.mxu0  ;;  %v3299_v12 = vpop.f32.mrf.mxu1  ;;  %3925 = vmatprep.mubr.bf16.mxu0 %v3432_v25 }
 0x42b   : > { %v3395_v48 = vpack.c.bf16 %v3374_v30, %v3373_v3  ;;  %3926 = vmatmul.mubr.bf16.gmra.mxu0 %v3393_v36 }
 0x42c   : > { %v3083_v31 = vpop.f32.mrf.mxu0  ;;  %v3302_v28 = vpop.f32.mrf.mxu1 }
 0x42d   : > { %v3542_v53 = vrot.slane %v3395_v48, 1  ;;  %v3437_v21 = vshll.u32 %v3395_v48, 16  ;;  %v3375_v32 = vmax.f32 %v3083_v31, %v3302_v28  ;;  %v3441_v23 = vshrl.u32 %v3395_v48, 16 }
 0x42e   : > { %v3085_v44 = vpop.f32.mrf.mxu0  ;;  %v3304_v10 = vpop.f32.mrf.mxu1 }
 0x42f   : > { %v3543_v9 = vsel %vm3534_vm5, %v3540_v13, %v3542_v53  ;;  %v3439_v46 = vrot.slane %v3437_v21, 1 }
 0x430   : > { %v3086_v49 = vpop.f32.mrf.mxu0  ;;  %v3305_v37 = vpop.f32.mrf.mxu1  ;;  %4099 = vmatmul.mubr.bf16.gmra.mxu1 %v3543_v9 }
 0x431   : > { %v3376_v51 = vmax.f32 %v3086_v49, %v3305_v37  ;;  %v3440_v22 = vsel %vm3404_vm6, %v3435_v8, %v3439_v46  ;;  %4108 = vmatprep.mubr.bf16.mxu1 %v9886_v62  ;;  %v3443_v36 = vor.u32 %v3441_v23, %v3439_v46 }
 0x432   : > { %v3088_v55 = vpop.f32.mrf.mxu0  ;;  %v3307_v60 = vpop.f32.mrf.mxu1  ;;  %3935 = vmatprep.mubr.bf16.mxu0 %v3440_v22 }
 0x433   : > { %v3396_v57 = vpack.c.bf16 %v3376_v51, %v3375_v32  ;;  %3936 = vmatmul.mubr.bf16.gmra.mxu0 %v3394_v38 }
 0x434   : > { %v3091_v16 = vpop.f32.mrf.mxu0  ;;  %v3310_v59 = vpop.f32.mrf.mxu1 }
 0x435   : > { %v3544_v34 = vrot.slane %v3396_v57, 1  ;;  %v3445_v18 = vshll.u32 %v3396_v57, 16  ;;  %v3377_v2 = vmax.f32 %v3091_v16, %v3310_v59  ;;  %v3449_v41 = vshrl.u32 %v3396_v57, 16 }
 0x436   : > { %v3093_v27 = vpop.f32.mrf.mxu0  ;;  %v3312_v63 = vpop.f32.mrf.mxu1 }
 0x437   : > { %v3545_v47 = vsel %vm3534_vm5, %v3542_v53, %v3544_v34  ;;  %v3447_v52 = vrot.slane %v3445_v18, 1 }
 0x438   : > { %v3094_v20 = vpop.f32.mrf.mxu0  ;;  %v3313_v35 = vpop.f32.mrf.mxu1  ;;  %4109 = vmatmul.mubr.bf16.gmra.mxu1 %v3545_v47 }
 0x439   : > { %v3378_v6 = vmax.f32 %v3094_v20, %v3313_v35  ;;  %v3448_v17 = vsel %vm3404_vm6, %v3443_v36, %v3447_v52  ;;  %4118 = vmatprep.mubr.bf16.mxu1 %v9886_v62  ;;  %v3451_v38 = vor.u32 %v3449_v41, %v3447_v52 }
 0x43a   : > { %v3096_v29 = vpop.f32.mrf.mxu0  ;;  %v3315_v45 = vpop.f32.mrf.mxu1  ;;  %3945 = vmatprep.mubr.bf16.mxu0 %v3448_v17 }
 0x43b   : > { %v3397_v39 = vpack.c.bf16 %v3378_v6, %v3377_v2  ;;  %3946 = vmatmul.mubr.bf16.gmra.mxu0 %v3395_v48 }
 0x43c   : > { %v3099_v42 = vpop.f32.mrf.mxu0  ;;  %v3318_v4 = vpop.f32.mrf.mxu1 }
 0x43d   : > { %v3546_v5 = vrot.slane %v3397_v39, 1  ;;  %v3453_v26 = vshll.u32 %v3397_v39, 16  ;;  %v3379_v0 = vmax.f32 %v3099_v42, %v3318_v4  ;;  %v3457_v3 = vshrl.u32 %v3397_v39, 16 }
 0x43e   : > { %v3101_v1 = vpop.f32.mrf.mxu0  ;;  %v3320_v15 = vpop.f32.mrf.mxu1 }
 0x43f   : > { %v3547_v56 = vsel %vm3534_vm5, %v3544_v34, %v3546_v5  ;;  %v3455_v58 = vrot.slane %v3453_v26, 1 }
 0x440   : > { %v3102_v50 = vpop.f32.mrf.mxu0  ;;  %v3321_v13 = vpop.f32.mrf.mxu1  ;;  %4119 = vmatmul.mubr.bf16.gmra.mxu1 %v3547_v56 }
 0x441   : > { %v3380_v43 = vmax.f32 %v3102_v50, %v3321_v13  ;;  %v3456_v11 = vsel %vm3404_vm6, %v3451_v38, %v3455_v58  ;;  %4128 = vmatprep.mubr.bf16.mxu1 %v9886_v62  ;;  %v3459_v48 = vor.u32 %v3457_v3, %v3455_v58 }
 0x442   : > { %v3104_v19 = vpop.f32.mrf.mxu0  ;;  %v3323_v40 = vpop.f32.mrf.mxu1  ;;  %3955 = vmatprep.mubr.bf16.mxu0 %v3456_v11 }
 0x443   : > { %v3398_v24 = vpack.c.bf16 %v3380_v43, %v3379_v0  ;;  %3956 = vmatmul.mubr.bf16.gmra.mxu0 %v3396_v57 }
 0x444   : > { %v3107_v14 = vpop.f32.mrf.mxu0  ;;  %v3326_v7 = vpop.f32.mrf.mxu1 }
 0x445   : > { %v3548_v61 = vrot.slane %v3398_v24, 1  ;;  %v3461_v30 = vshll.u32 %v3398_v24, 16  ;;  %v3381_v54 = vmax.f32 %v3107_v14, %v3326_v7  ;;  %v3465_v32 = vshrl.u32 %v3398_v24, 16 }
 0x446   : > { %v3109_v25 = vpop.f32.mrf.mxu0  ;;  %v3328_v33 = vpop.f32.mrf.mxu1 }
 0x447   : > { %v3549_v12 = vsel %vm3534_vm5, %v3546_v5, %v3548_v61  ;;  %v3463_v31 = vrot.slane %v3461_v30, 1 }
 0x448   : > { %v3110_v28 = vpop.f32.mrf.mxu0  ;;  %v3329_v53 = vpop.f32.mrf.mxu1  ;;  %4129 = vmatmul.mubr.bf16.gmra.mxu1 %v3549_v12 }
 0x449   : > { %v3382_v21 = vmax.f32 %v3110_v28, %v3329_v53  ;;  %v3464_v44 = vsel %vm3404_vm6, %v3459_v48, %v3463_v31  ;;  %4138 = vmatprep.mubr.bf16.mxu1 %v9886_v62  ;;  %v3467_v57 = vor.u32 %v3465_v32, %v3463_v31 }
 0x44a   : > { %v3112_v10 = vpop.f32.mrf.mxu0  ;;  %v3331_v9 = vpop.f32.mrf.mxu1  ;;  %3965 = vmatprep.mubr.bf16.mxu0 %v3464_v44 }
 0x44b   : > { %v3399_v8 = vpack.c.bf16 %v3382_v21, %v3381_v54  ;;  %3966 = vmatmul.mubr.bf16.gmra.mxu0 %v3397_v39 }
 0x44c   : > { %v3115_v46 = vpop.f32.mrf.mxu0  ;;  %v3334_v49 = vpop.f32.mrf.mxu1 }
 0x44d   : > { %v3550_v37 = vrot.slane %v3399_v8, 1  ;;  %v3469_v51 = vshll.u32 %v3399_v8, 16  ;;  %v3383_v23 = vmax.f32 %v3115_v46, %v3334_v49  ;;  %v3473_v2 = vshrl.u32 %v3399_v8, 16 }
 0x44e   : > { %v3117_v22 = vpop.f32.mrf.mxu0  ;;  %v3336_v55 = vpop.f32.mrf.mxu1 }
 0x44f   : > { %v3551_v60 = vsel %vm3534_vm5, %v3548_v61, %v3550_v37  ;;  %v3471_v16 = vrot.slane %v3469_v51, 1 }
 0x450   : > { %v3118_v59 = vpop.f32.mrf.mxu0  ;;  %v3337_v34 = vpop.f32.mrf.mxu1  ;;  %4139 = vmatmul.mubr.bf16.gmra.mxu1 %v3551_v60 }
 0x451   : > { %v3384_v18 = vmax.f32 %v3118_v59, %v3337_v34  ;;  %v3472_v27 = vsel %vm3404_vm6, %v3467_v57, %v3471_v16  ;;  %4148 = vmatprep.mubr.bf16.mxu1 %v9886_v62  ;;  %v3475_v39 = vor.u32 %v3473_v2, %v3471_v16 }
 0x452   : > { %v3120_v63 = vpop.f32.mrf.mxu0  ;;  %v3339_v47 = vpop.f32.mrf.mxu1  ;;  %3975 = vmatprep.mubr.bf16.mxu0 %v3472_v27 }
 0x453   : > { %v3400_v36 = vpack.c.bf16 %v3384_v18, %v3383_v23  ;;  %3976 = vmatmul.mubr.bf16.gmra.mxu0 %v3398_v24 }
 0x454   : > { %v3123_v52 = vpop.f32.mrf.mxu0  ;;  %v3342_v20 = vpop.f32.mrf.mxu1 }
 0x455   : > { %v3552_v35 = vrot.slane %v3400_v36, 1  ;;  %v3477_v6 = vshll.u32 %v3400_v36, 16  ;;  %v3385_v41 = vmax.f32 %v3123_v52, %v3342_v20  ;;  %v3481_v0 = vshrl.u32 %v3400_v36, 16  ;;  %v3621_v52 = vld [vmem:[%s9668_s8] sm:$0x3] }
 0x456   : > { %v3125_v17 = vpop.f32.mrf.mxu0  ;;  %v3344_v29 = vpop.f32.mrf.mxu1 }
 0x457   : > { %v3553_v45 = vsel %vm3534_vm5, %v3550_v37, %v3552_v35  ;;  %v3479_v42 = vrot.slane %v3477_v6, 1 }
 0x458   : > { %v3126_v4 = vpop.f32.mrf.mxu0  ;;  %v3345_v5 = vpop.f32.mrf.mxu1  ;;  %4149 = vmatmul.mubr.bf16.gmra.mxu1 %v3553_v45 }
 0x459   : > { %v3386_v26 = vmax.f32 %v3126_v4, %v3345_v5  ;;  %v3480_v1 = vsel %vm3404_vm6, %v3475_v39, %v3479_v42  ;;  %4158 = vmatprep.mubr.bf16.mxu1 %v9886_v62  ;;  %v3483_v24 = vor.u32 %v3481_v0, %v3479_v42  ;;  %v6991_v42 = vld [vmem:[%s9669_s9 + $0x4] ss:$8 sps:$4 sm:$0xff]  }
 0x45a   : > { %v3128_v15 = vpop.f32.mrf.mxu0  ;;  %v3347_v56 = vpop.f32.mrf.mxu1  ;;  %3985 = vmatprep.mubr.bf16.mxu0 %v3480_v1 }
 0x45b   : > { %v3401_v38 = vpack.c.bf16 %v3386_v26, %v3385_v41  ;;  %3986 = vmatmul.mubr.bf16.gmra.mxu0 %v3399_v8  ;;  %v6994_v41 = vld [vmem:[%s9670_s10 + $0x4] ss:$8 sps:$4 sm:$0xff]  }
 0x45c   : > { %v3131_v58 = vpop.f32.mrf.mxu0  ;;  %v3350_v50 = vpop.f32.mrf.mxu1 }
 0x45d   : > { %v3554_v13 = vrot.slane %v3401_v38, 1  ;;  %v3485_v43 = vshll.u32 %v3401_v38, 16  ;;  %v3387_v3 = vmax.f32 %v3131_v58, %v3350_v50  ;;  %v3489_v54 = vshrl.u32 %v3401_v38, 16 }
 0x45e   : > { %v3133_v11 = vpop.f32.mrf.mxu0  ;;  %v3352_v19 = vpop.f32.mrf.mxu1 }
 0x45f   : > { %v3555_v40 = vsel %vm3534_vm5, %v3552_v35, %v3554_v13  ;;  %v3487_v14 = vrot.slane %v3485_v43, 1  ;;  %v9887_v35 = vld [vmem:[#allocation11_spill] sm:$0xff] }
 0x460   : > { %v3134_v7 = vpop.f32.mrf.mxu0  ;;  %v3353_v61 = vpop.f32.mrf.mxu1  ;;  %4159 = vmatmul.mubr.bf16.gmra.mxu1 %v3555_v40  ;;  %v9888_v2 = vsub.s32 0, %v9887_v35  ;;  %v9889_v29 = vsub.s32 1, %v9887_v35 }
 0x461   : > { %v3388_v30 = vmax.f32 %v3134_v7, %v3353_v61  ;;  %v3488_v25 = vsel %vm3404_vm6, %v3483_v24, %v3487_v14  ;;  %4168 = vmatprep.mubr.bf16.mxu1 %v9886_v62  ;;  %v3491_v8 = vor.u32 %v3489_v54, %v3487_v14 }
 0x462   : > { %v3136_v33 = vpop.f32.mrf.mxu0  ;;  %v3355_v12 = vpop.f32.mrf.mxu1  ;;  %3995 = vmatprep.mubr.bf16.mxu0 %v3488_v25  ;;  %v8915_v6 = vrot.slane %v3621_v52, %v9888_v2  ;;  %v8919_v45 = vrot.slane %v3621_v52, %v9889_v29 }
 0x463   : > { %v3402_v48 = vpack.c.bf16 %v3388_v30, %v3387_v3  ;;  %3996 = vmatmul.mubr.bf16.gmra.mxu0 %v3400_v36 }
 0x464   : > { %v3139_v31 = vpop.f32.mrf.mxu0  ;;  %v3358_v28 = vpop.f32.mrf.mxu1 }
 0x465   : > { %v3556_v53 = vrot.slane %v3402_v48, 1  ;;  %v3493_v21 = vshll.u32 %v3402_v48, 16  ;;  %v3389_v32 = vmax.f32 %v3139_v31, %v3358_v28  ;;  %v3497_v59 = vshrl.u32 %v3402_v48, 16 }
 0x466   : > { %v3141_v44 = vpop.f32.mrf.mxu0  ;;  %v3360_v10 = vpop.f32.mrf.mxu1 }
 0x467   : > { %v3557_v9 = vsel %vm3534_vm5, %v3554_v13, %v3556_v53  ;;  %v3495_v46 = vrot.slane %v3493_v21, 1 }
 0x468   : > { %v3142_v49 = vpop.f32.mrf.mxu0  ;;  %v3361_v37 = vpop.f32.mrf.mxu1  ;;  %4169 = vmatmul.mubr.bf16.gmra.mxu1 %v3557_v9 }
 0x469   : > { %v3390_v51 = vmax.f32 %v3142_v49, %v3361_v37  ;;  %v3496_v22 = vsel %vm3404_vm6, %v3491_v8, %v3495_v46  ;;  %4178 = vmatprep.mubr.bf16.mxu1 %v9886_v62  ;;  %v3499_v18 = vor.u32 %v3497_v59, %v3495_v46 }
 0x46a   : > { %v3144_v55 = vpop.f32.mrf.mxu0  ;;  %v3363_v60 = vpop.f32.mrf.mxu1  ;;  %4005 = vmatprep.mubr.bf16.mxu0 %v3496_v22 }
 0x46b   : > { %v3403_v57 = vpack.c.bf16 %v3390_v51, %v3389_v32  ;;  %4006 = vmatmul.mubr.bf16.gmra.mxu0 %v3401_v38 }
 0x46d   : > { %v3558_v16 = vrot.slane %v3403_v57, 1  ;;  %v3501_v34 = vshll.u32 %v3403_v57, 16  ;;  %v3505_v63 = vshrl.u32 %v3403_v57, 16 }
 0x46f   : > { %v3559_v23 = vsel %vm3534_vm5, %v3556_v53, %v3558_v16  ;;  %v3503_v27 = vrot.slane %v3501_v34, 1 }
 0x470   : > { %4179 = vmatmul.mubr.bf16.gmra.mxu1 %v3559_v23 }
 0x471   : > { %v3504_v47 = vsel %vm3404_vm6, %v3499_v18, %v3503_v27  ;;  %v3507_v36 = vor.u32 %v3505_v63, %v3503_v27  ;;  %4188 = vmatprep.mubr.bf16.mxu1 %v9886_v62 }
 0x472   : > { %4015 = vmatprep.mubr.bf16.mxu0 %v3504_v47 }
 0x473   : > { %4016 = vmatmul.mubr.bf16.gmra.mxu0 %v3402_v48 }
 0x474   : > { %4025 = vmatprep.mubr.bf16.mxu0 %v3507_v36 }
 0x478   : > { %4189 = vmatmul.mubr.bf16.gmra.mxu1 %v3558_v16 }
 0x479   : > { %6335 = vmatprep.mubr.msk.bf16.mxu1 %vm4332_vm7, %v6994_v41 }
 0x47b   : > { %4026 = vmatmul.mubr.bf16.gmra.mxu0 %v3403_v57 }
 0x47c   : > { %6319 = vmatprep.mubr.msk.bf16.mxu0 %vm4332_vm7, %v6991_v42 }
 0x4d8   : > { %v4070_v20 = vpop.f32.mrf.mxu1 }
 0x4da   : > { %v4072_v17 = vpop.f32.mrf.mxu1 }
 0x4db   : > { %v3907_v39 = vpop.f32.mrf.mxu0 }
 0x4dc   : > { %v3908_v4 = vadd.f32 %v3907_v39, %v8915_v6  ;;  %v4074_v5 = vpop.f32.mrf.mxu1 }
 0x4dd   : > { %v3909_v26 = vpop.f32.mrf.mxu0 }
 0x4de   : > { %v4071_v1 = vadd.f32 %v4070_v20, %v3908_v4  ;;  %v3910_v15 = vadd.f32 %v3909_v26, %v8919_v45  ;;  %v8930_v56 = vpop.f32.mrf.mxu1 }
 0x4df   : > { %9890 = vst [vmem:[#allocation13_spill] sm:$0xff] %v8930_v56  ;;  %v3911_v38 = vpop.f32.mrf.mxu0 }
 0x4e0   : > { %v8933_v58 = vadd.f32 %v4072_v17, %v3910_v15  ;;  %v3912_v50 = vadd.f32 %v3911_v38, %v8915_v6  ;;  %v4080_v13 = vpop.f32.mrf.mxu1  ;;  %v4199_v40 = vmax.f32 %v4071_v1, 0.0 }
 0x4e1   : > { %v8936_v0 = vpop.f32.mrf.mxu0 }
 0x4e2   : > { %9891 = vst [vmem:[#allocation48_spill] sm:$0xff] %v8933_v58  ;;  %v4075_v43 = vadd.f32 %v4074_v5, %v3912_v50  ;;  %v4082_v11 = vpop.f32.mrf.mxu1 }
 0x4e3   : > { %v3917_v19 = vpop.f32.mrf.mxu0 }
 0x4e4   : > { %v4201_v24 = vmax.f32 %v4075_v43, 0.0  ;;  %v3918_v14 = vadd.f32 %v3917_v19, %v8915_v6  ;;  %v4084_v7 = vpop.f32.mrf.mxu1 }
 0x4e5   : > { %v3919_v61 = vpop.f32.mrf.mxu0 }
 0x4e6   : > { %v8939_v3 = vpack.c.bf16 %v4201_v24, %v4199_v40  ;;  %v4081_v30 = vadd.f32 %v4080_v13, %v3918_v14  ;;  %v3920_v25 = vadd.f32 %v3919_v61, %v8919_v45  ;;  %v8942_v33 = vpop.f32.mrf.mxu1 }
 0x4e7   : > { %v3921_v12 = vpop.f32.mrf.mxu0 }
 0x4e8   : > { %9892 = vst [vmem:[#allocation66_spill] sm:$0xff] %v8939_v3  ;;  %v8944_v48 = vadd.f32 %v4082_v11, %v3920_v25  ;;  %v3922_v31 = vadd.f32 %v3921_v12, %v8915_v6  ;;  %v4090_v28 = vpop.f32.mrf.mxu1  ;;  %v4203_v10 = vmax.f32 %v4081_v30, 0.0 }
 0x4e9   : > { %v8947_v53 = vpop.f32.mrf.mxu0 }
 0x4ea   : > { %9893 = vst [vmem:[#allocation69_spill] sm:$0xff] %v8944_v48  ;;  %v4085_v54 = vadd.f32 %v4084_v7, %v3922_v31  ;;  %v8949_v21 = vpop.f32.mrf.mxu1 }
 0x4eb   : > { %v3927_v44 = vpop.f32.mrf.mxu0 }
 0x4ec   : > { %v4205_v9 = vmax.f32 %v4085_v54, 0.0  ;;  %v3928_v8 = vadd.f32 %v3927_v44, %v8915_v6  ;;  %v8952_v46 = vpop.f32.mrf.mxu1 }
 0x4ed   : > { %v8954_v49 = vpop.f32.mrf.mxu0 }
 0x4ee   : > { %v8956_v37 = vpack.c.bf16 %v4205_v9, %v4203_v10  ;;  %v8958_v32 = vadd.f32 %v4090_v28, %v3928_v8  ;;  %v8960_v51 = vpop.f32.mrf.mxu1 }
 0x4ef   : > { %v8962_v22 = vpop.f32.mrf.mxu0 }
 0x4f0   : > { %9894 = vst [vmem:[#allocation12_spill] sm:$0xff] %v8956_v37  ;;  %9895 = vst [vmem:[#allocation47_spill] sm:$0xff] %v8958_v32  ;;  %v8964_v55 = vpop.f32.mrf.mxu1 }
 0x4f1   : > { %v8966_v60 = vpop.f32.mrf.mxu0 }
 0x4f2   : > { %v8968_v57 = vpop.f32.mrf.mxu1 }
 0x4f3   : > { %v8970_v16 = vpop.f32.mrf.mxu0 }
 0x4f4   : > { %v8972_v59 = vpop.f32.mrf.mxu1 }
 0x4f5   : > { %v8974_v34 = vpop.f32.mrf.mxu0 }
 0x4f6   : > { %v8976_v23 = vpop.f32.mrf.mxu1 }
 0x4f7   : > { %v8978_v18 = vpop.f32.mrf.mxu0 }
 0x4f8   : > { %v8980_v27 = vpop.f32.mrf.mxu1 }
 0x4f9   : > { %v8982_v63 = vpop.f32.mrf.mxu0 }
 0x4fa   : > { %v8984_v47 = vpop.f32.mrf.mxu1 }
 0x4fb   : > { %v8986_v36 = vpop.f32.mrf.mxu0 }
 0x4fc   : > { %v8988_v52 = vpop.f32.mrf.mxu1 }
 0x4fd   : > { %v3949_v20 = vpop.f32.mrf.mxu0 }
 0x4fe   : > { %v8990_v35 = vpop.f32.mrf.mxu1 }
 0x4ff   : > { %v8992_v2 = vpop.f32.mrf.mxu0 }
 0x500   : > { %v8994_v17 = vpop.f32.mrf.mxu1 }
 0x501   : > { %v3953_v29 = vpop.f32.mrf.mxu0 }
 0x502   : > { %v4122_v39 = vpop.f32.mrf.mxu1 }
 0x503   : > { %v3957_v42 = vpop.f32.mrf.mxu0 }
 0x504   : > { %v4124_v4 = vpop.f32.mrf.mxu1 }
 0x505   : > { %v3959_v5 = vpop.f32.mrf.mxu0 }
 0x506   : > { %v4126_v41 = vpop.f32.mrf.mxu1 }
 0x507   : > { %v3961_v26 = vpop.f32.mrf.mxu0 }
 0x508   : > { %v4130_v1 = vpop.f32.mrf.mxu1 }
 0x509   : > { %v3963_v15 = vpop.f32.mrf.mxu0 }
 0x50a   : > { %v4132_v38 = vpop.f32.mrf.mxu1  ;;  %v3964_v8 = vadd.f32 %v3963_v15, %v8919_v45 }
 0x50b   : > { %v3967_v50 = vpop.f32.mrf.mxu0 }
 0x50c   : > { %v4134_v13 = vpop.f32.mrf.mxu1 }
 0x50d   : > { %v3969_v43 = vpop.f32.mrf.mxu0 }
 0x50e   : > { %v4136_v11 = vpop.f32.mrf.mxu1  ;;  %v3970_v44 = vadd.f32 %v3969_v43, %v8919_v45 }
 0x50f   : > { %v3971_v19 = vpop.f32.mrf.mxu0 }
 0x510   : > { %v4140_v40 = vpop.f32.mrf.mxu1  ;;  %v3972_v62 = vadd.f32 %v3971_v19, %v8915_v6  ;;  %v3954_v19 = vadd.f32 %v3953_v29, %v8919_v45  ;;  %v3950_v29 = vadd.f32 %v3949_v20, %v8919_v45 }
 0x511   : > { %v3973_v24 = vpop.f32.mrf.mxu0 }
 0x512   : > { %v4142_v14 = vpop.f32.mrf.mxu1  ;;  %v3974_v25 = vadd.f32 %v3973_v24, %v8919_v45 }
 0x513   : > { %v3977_v7 = vpop.f32.mrf.mxu0 }
 0x514   : > { %v4144_v61 = vpop.f32.mrf.mxu1  ;;  %v3978_v28 = vadd.f32 %v3977_v7, %v8915_v6  ;;  %v4137_v37 = vadd.f32 %v4136_v11, %v3974_v25  ;;  %v3968_v7 = vadd.f32 %v3967_v50, %v8915_v6  ;;  %v3962_v11 = vadd.f32 %v3961_v26, %v8915_v6 }
 0x515   : > { %v3979_v30 = vpop.f32.mrf.mxu0  ;;  %v4127_v25 = vadd.f32 %v4126_v41, %v3964_v8 }
 0x516   : > { %v3980_v12 = vadd.f32 %v3979_v30, %v8919_v45  ;;  %v4146_v31 = vpop.f32.mrf.mxu1  ;;  %v4141_v32 = vadd.f32 %v4140_v40, %v3978_v28 }
 0x517   : > { %v3981_v54 = vpop.f32.mrf.mxu0 }
 0x518   : > { %v3982_v10 = vadd.f32 %v3981_v54, %v8915_v6  ;;  %v9001_v9 = vpop.f32.mrf.mxu1  ;;  %v4143_v58 = vadd.f32 %v4142_v14, %v3980_v12  ;;  %v3960_v54 = vadd.f32 %v3959_v5, %v8919_v45  ;;  %v4135_v14 = vadd.f32 %v4134_v13, %v3972_v62 }
 0x519   : > { %9896 = vst [vmem:[#allocation14_spill] sm:$0xff] %v9001_v9  ;;  %v3983_v3 = vpop.f32.mrf.mxu0  ;;  %v4133_v9 = vadd.f32 %v4132_v38, %v3970_v44  ;;  %v4226_v12 = vmax.f32 %v4137_v37, 0.0  ;;  %v3958_v5 = vadd.f32 %v3957_v42, %v8915_v6  ;;  %v4131_v38 = vadd.f32 %v4130_v1, %v3968_v7 }
 0x51a   : > { %v4145_v24 = vadd.f32 %v4144_v61, %v3982_v10  ;;  %v3984_v30 = vadd.f32 %v3983_v3, %v8919_v45  ;;  %v9006_v48 = vpop.f32.mrf.mxu1  ;;  %v4228_v50 = vmax.f32 %v4143_v58, 0.0  ;;  %v4123_v10 = vadd.f32 %v4122_v39, %v3960_v54 }
 0x51b   : > { %v9009_v43 = vpop.f32.mrf.mxu0  ;;  %v4224_v26 = vmax.f32 %v4133_v9, 0.0  ;;  %v3952_v37 = vadd.f32 %v8992_v2, %v8915_v6  ;;  %v4125_v58 = vadd.f32 %v4124_v4, %v3962_v11  ;;  %v4117_v42 = vadd.f32 %v8990_v35, %v3954_v19 }
 0x51c   : > { %v4147_v56 = vadd.f32 %v4146_v31, %v3984_v30  ;;  %v9012_v15 = vpop.f32.mrf.mxu1  ;;  %v4229_v61 = vmax.f32 %v4145_v24, 0.0  ;;  %v4227_v31 = vmax.f32 %v4141_v32, 0.0  ;;  %v3944_v32 = vadd.f32 %v8982_v63, %v8919_v45 }
 0x51d   : > { %v9016_v3 = vpop.f32.mrf.mxu0  ;;  %v4222_v1 = vmax.f32 %v4127_v25, 0.0  ;;  %v4264_v39 = vpack.c.bf16 %v4226_v12, %v4224_v26  ;;  %v3948_v9 = vadd.f32 %v8986_v36, %v8915_v6  ;;  %v4121_v2 = vadd.f32 %v8994_v17, %v3958_v5 }
 0x51e   : > { %v4230_v40 = vmax.f32 %v4147_v56, 0.0  ;;  %v9018_v28 = vpop.f32.mrf.mxu1  ;;  %v4225_v56 = vmax.f32 %v4135_v14, 0.0  ;;  %v4265_v41 = vpack.c.bf16 %v4229_v61, %v4227_v31  ;;  %v4223_v4 = vmax.f32 %v4131_v38, 0.0 }
 0x51f   : > { %v9021_v44 = vpop.f32.mrf.mxu0  ;;  %v3940_v63 = vadd.f32 %v8974_v34, %v8919_v45  ;;  %v4113_v35 = vadd.f32 %v8984_v47, %v3950_v29  ;;  %v4220_v30 = vmax.f32 %v4123_v10, 0.0  ;;  %v3942_v36 = vadd.f32 %v8978_v18, %v8915_v6 }
 0x520   : > { %v9024_v62 = vpop.f32.mrf.mxu1  ;;  %v4266_v13 = vpack.c.bf16 %v4230_v40, %v4228_v50  ;;  %v4115_v17 = vadd.f32 %v8988_v52, %v3952_v37  ;;  %v4221_v54 = vmax.f32 %v4125_v58, 0.0  ;;  %v4263_v19 = vpack.c.bf16 %v4225_v56, %v4223_v4 }
 0x521   : > { %v9028_v8 = vpop.f32.mrf.mxu0  ;;  %v3934_v14 = vadd.f32 %v8966_v60, %v8919_v45  ;;  %v4107_v34 = vadd.f32 %v8976_v23, %v3944_v32  ;;  %v4218_v47 = vmax.f32 %v4117_v42, 0.0  ;;  %v4262_v25 = vpack.c.bf16 %v4222_v1, %v4220_v30 }
 0x522   : > { %v9033_v20 = vpop.f32.mrf.mxu1  ;;  %4355 = vmatprep.subr.bf16.mxu0 %v4266_v13  ;;  %4508 = vmatprep.subr.bf16.mxu1 %v4266_v13  ;;  %v3938_v12 = vadd.f32 %v8970_v16, %v8915_v6  ;;  %v4111_v18 = vadd.f32 %v8980_v27, %v3948_v9  ;;  %v4219_v50 = vmax.f32 %v4121_v2, 0.0  ;;  %v3930_v40 = vadd.f32 %v8954_v49, %v8919_v45 }
 0x523   : > { %v9038_v24 = vpop.f32.mrf.mxu0  ;;  %4356 = vmatpush1.bf16.msra.mxu0 %v4265_v41  ;;  %4509 = vmatpush1.bf16.msra.mxu1 %v4265_v41  ;;  %v4103_v60 = vadd.f32 %v8968_v57, %v3940_v63  ;;  %v4216_v23 = vmax.f32 %v4113_v35, 0.0  ;;  %v3932_v16 = vadd.f32 %v8962_v22, %v8915_v6  ;;  %v4105_v27 = vadd.f32 %v8972_v59, %v3942_v36 }
 0x524   : > { %v9043_v7 = vpop.f32.mrf.mxu1  ;;  %4357 = vmatprep.subr.bf16.mxu0 %v4264_v39  ;;  %4510 = vmatprep.subr.bf16.mxu1 %v4264_v39  ;;  %v4217_v38 = vmax.f32 %v4115_v17, 0.0  ;;  %v4261_v31 = vpack.c.bf16 %v4221_v54, %v4219_v50  ;;  %v3924_v10 = vadd.f32 %v8947_v53, %v8919_v45  ;;  %v4097_v49 = vadd.f32 %v8960_v51, %v3934_v14  ;;  %v9898_v14 = vld [vmem:[#allocation47_spill] sm:$0xff] }
 0x525   : > { %v9048_v11 = vpop.f32.mrf.mxu0  ;;  %v4214_v57 = vmax.f32 %v4107_v34, 0.0  ;;  %v4260_v13 = vpack.c.bf16 %v4218_v47, %v4216_v23  ;;  %v4101_v37 = vadd.f32 %v8964_v55, %v3938_v12  ;;  %v4215_v58 = vmax.f32 %v4111_v18, 0.0 }
 0x526   : > { %v9053_v61 = vpop.f32.mrf.mxu1  ;;  %v4093_v22 = vadd.f32 %v8949_v21, %v3930_v40  ;;  %v4212_v59 = vmax.f32 %v4103_v60, 0.0  ;;  %v4095_v53 = vadd.f32 %v8952_v46, %v3932_v16  ;;  %v4213_v51 = vmax.f32 %v4105_v27, 0.0 }
 0x527   : > { %v9058_v52 = vpop.f32.mrf.mxu0  ;;  %4358 = vmatpush1.bf16.msra.mxu0 %v4263_v19  ;;  %4511 = vmatpush1.bf16.msra.mxu1 %v4263_v19  ;;  %v4259_v32 = vpack.c.bf16 %v4217_v38, %v4215_v58  ;;  %v3914_v55 = vadd.f32 %v8936_v0, %v8919_v45  ;;  %v4087_v1 = vadd.f32 %v8942_v33, %v3924_v10  ;;  %v4210_v39 = vmax.f32 %v4097_v49, 0.0  ;;  %v9897_v0 = vld [vmem:[#allocation13_spill] sm:$0xff]  ;;  %v9900_v38 = vld [vmem:[#allocation48_spill] sm:$0xff] }
 0x528   : > { %v9063_v5 = vpop.f32.mrf.mxu1  ;;  %4359 = vmatprep.subr.bf16.mxu0 %v4262_v25  ;;  %4512 = vmatprep.subr.bf16.mxu1 %v4262_v25  ;;  %v4258_v21 = vpack.c.bf16 %v4214_v57, %v4212_v59  ;;  %v4211_v2 = vmax.f32 %v4101_v37, 0.0  ;;  %v4208_v63 = vmax.f32 %v4093_v22, 0.0  ;;  %v4209_v35 = vmax.f32 %v4095_v53, 0.0  ;;  %v9899_v25 = vld [vmem:[#allocation69_spill] sm:$0xff]  ;;  %v9901_v58 = vld [vmem:[#allocation12_spill] sm:$0xff] }
 0x529   : > { %v9068_v29 = vpop.f32.mrf.mxu0  ;;  %v4077_v17 = vadd.f32 %v9897_v0, %v3914_v55  ;;  %v4206_v33 = vmax.f32 %v4087_v1, 0.0  ;;  %v4207_v34 = vmax.f32 %v9898_v14, 0.0  ;;  %v4204_v12 = vmax.f32 %v9899_v25, 0.0  ;;  %v9902_v1 = vld [vmem:[#allocation66_spill] sm:$0xff] }
 0x52a   : > { %v9073_v26 = vpop.f32.mrf.mxu1  ;;  %v4257_v30 = vpack.c.bf16 %v4213_v51, %v4211_v2  ;;  %v4256_v19 = vpack.c.bf16 %v4210_v39, %v4208_v63 }
 0x52b   : > { %v9076_v56 = vpop.f32.mrf.mxu0  ;;  %4360 = vmatpush1.bf16.msra.mxu0 %v4261_v31  ;;  %4513 = vmatpush1.bf16.msra.mxu1 %v4261_v31  ;;  %v4255_v50 = vpack.c.bf16 %v4209_v35, %v4207_v34  ;;  %v4202_v60 = vmax.f32 %v4077_v17, 0.0  ;;  %v4254_v16 = vpack.c.bf16 %v4206_v33, %v4204_v12  ;;  %v4200_v31 = vmax.f32 %v9900_v38, 0.0 }
 0x52c   : > { %v9079_v41 = vpop.f32.mrf.mxu1  ;;  %4361 = vmatprep.subr.bf16.mxu0 %v4260_v13  ;;  %4514 = vmatprep.subr.bf16.mxu1 %v4260_v13 }
 0x52d   : > { %v9082_v42 = vpop.f32.mrf.mxu0  ;;  %v4252_v57 = vpack.c.bf16 %v4202_v60, %v4200_v31 }
 0x52e   : > { %v9087_v9 = vpop.f32.mrf.mxu1  ;;  %v4010_v14 = vadd.f32 %v9082_v42, %v8919_v45 }
 0x52f   : > { %v9089_v4 = vpop.f32.mrf.mxu0  ;;  %4362 = vmatpush1.bf16.msra.mxu0 %v4259_v32  ;;  %4515 = vmatpush1.bf16.msra.mxu1 %v4259_v32 }
 0x530   : > { %v9091_v46 = vpop.f32.mrf.mxu1  ;;  %4363 = vmatprep.subr.bf16.mxu0 %v4258_v21  ;;  %4516 = vmatprep.subr.bf16.mxu1 %v4258_v21 }
 0x531   : > { %v4013_v36 = vpop.f32.mrf.mxu0 }
 0x532   : > { %v4182_v54 = vpop.f32.mrf.mxu1  ;;  %v4014_v63 = vadd.f32 %v4013_v36, %v8919_v45  ;;  %v4004_v36 = vadd.f32 %v9068_v29, %v8919_v45  ;;  %v4173_v29 = vadd.f32 %v9073_v26, %v4010_v14  ;;  %v6997_v14 = vld [vmem:[%s9670_s10 + $0x14] ss:$8 sps:$4 sm:$0xff]  }
 0x533   : > { %v4017_v47 = vpop.f32.mrf.mxu0  ;;  %4364 = vmatpush1.bf16.msra.mxu0 %v4257_v30  ;;  %4517 = vmatpush1.bf16.msra.mxu1 %v4257_v30 }
 0x534   : > { %v4184_v18 = vpop.f32.mrf.mxu1  ;;  %4365 = vmatprep.subr.bf16.mxu0 %v4256_v19  ;;  %4518 = vmatprep.subr.bf16.mxu1 %v4256_v19  ;;  %v4018_v34 = vadd.f32 %v4017_v47, %v8915_v6  ;;  %v4008_v47 = vadd.f32 %v9076_v56, %v8915_v6  ;;  %v4167_v56 = vadd.f32 %v9053_v61, %v4004_v36  ;;  %v7000_v36 = vld [vmem:[%s9670_s10 + $0x10] ss:$8 sps:$4 sm:$0xff]  }
 0x535   : > { %v4019_v40 = vpop.f32.mrf.mxu0 }
 0x536   : > { %v4186_v23 = vpop.f32.mrf.mxu1  ;;  %v4020_v39 = vadd.f32 %v4019_v40, %v8919_v45 }
 0x537   : > { %v4021_v27 = vpop.f32.mrf.mxu0  ;;  %4366 = vmatpush1.bf16.msra.mxu0 %v4255_v50  ;;  %4519 = vmatpush1.bf16.msra.mxu1 %v4255_v50 }
 0x538   : > { %v4190_v10 = vpop.f32.mrf.mxu1  ;;  %4367 = vmatprep.subr.bf16.mxu0 %v4254_v16  ;;  %4520 = vmatprep.subr.bf16.mxu1 %v4254_v16  ;;  %v4022_v35 = vadd.f32 %v4021_v27, %v8915_v6  ;;  %v4183_v12 = vadd.f32 %v4182_v54, %v4020_v39  ;;  %v4177_v16 = vadd.f32 %v9087_v9, %v4014_v63  ;;  %v9903_v63 = vld [vmem:[#allocation14_spill] sm:$0xff] }
 0x539   : > { %v4023_v49 = vpop.f32.mrf.mxu0  ;;  %v4181_v54 = vadd.f32 %v9091_v46, %v4018_v34  ;;  %v3994_v9 = vadd.f32 %v9028_v8, %v8919_v45  ;;  %v3998_v46 = vadd.f32 %v9038_v24, %v8915_v6  ;;  %v4171_v8 = vadd.f32 %v9063_v5, %v4008_v47  ;;  %v7006_v47 = vld [vmem:[%s9670_s10 + $0x20] ss:$8 sps:$4 sm:$0xff]  }
 0x53a   : > { %v4192_v13 = vpop.f32.mrf.mxu1  ;;  %v4024_v53 = vadd.f32 %v4023_v49, %v8919_v45  ;;  %v4185_v27 = vadd.f32 %v4184_v18, %v4022_v35  ;;  %v4000_v49 = vadd.f32 %v9048_v11, %v8919_v45  ;;  %v9904_v34 = vmov 0  }
 0x53b   : > { %v4027_v37 = vpop.f32.mrf.mxu0  ;;  %4368 = vmatpush1.bf16.msra.mxu0 %v9901_v58  ;;  %4521 = vmatpush1.bf16.msra.mxu1 %v9901_v58  ;;  %v4242_v58 = vmax.f32 %v4177_v16, 0.0  ;;  %v4157_v5 = vadd.f32 %v9018_v28, %v3994_v9  ;;  %v7003_v16 = vld [vmem:[%s9670_s10 + $0x24] ss:$8 sps:$4 sm:$0xff]   ;;  %v7030_v9 = vld [vmem:[%s9672_s12 + $0x10] sm:$0xff]  }
 0x53c   : > { %v4028_v22 = vadd.f32 %v4027_v37, %v8915_v6  ;;  %4369 = vmatprep.subr.bf16.mxu0 %v4252_v57  ;;  %4522 = vmatprep.subr.bf16.mxu1 %v4252_v57  ;;  %v4194_v32 = vpop.f32.mrf.mxu1  ;;  %v4187_v0 = vadd.f32 %v4186_v23, %v4024_v53  ;;  %v4012_v23 = vadd.f32 %v9089_v4, %v8915_v6  ;;  %v4244_v57 = vmax.f32 %v4183_v12, 0.0  ;;  %v7020_v12 = vld [vmem:[%s9672_s12 + $0x38] sm:$0xff]  }
 0x53d   : > { %v4029_v59 = vpop.f32.mrf.mxu0  ;;  %v4002_v4 = vadd.f32 %v9058_v52, %v8915_v6  ;;  %v4245_v37 = vmax.f32 %v4185_v27, 0.0  ;;  %v3990_v52 = vadd.f32 %v9016_v3, %v8919_v45  ;;  %v4163_v61 = vadd.f32 %v9033_v20, %v4000_v49  ;;  %v7023_v27 = vld [vmem:[%s9671_s11 + $0x28] sm:$0xff]   ;;  %v7009_v49 = vld [vmem:[%s9670_s10 + $0x34] ss:$8 sps:$4 sm:$0xff]  }
 0x53e   : > { %v4030_v51 = vadd.f32 %v4029_v59, %v8919_v45  ;;  %v4191_v21 = vadd.f32 %v4190_v10, %v4028_v22  ;;  %v4196_v25 = vpop.f32.mrf.mxu1  ;;  %v4246_v38 = vmax.f32 %v4187_v0, 0.0  ;;  %v4175_v18 = vadd.f32 %v9079_v41, %v4012_v23  ;;  %v7001_v23 = vld [vmem:[%s9669_s9 + $0x24] ss:$8 sps:$4 sm:$0xff]  }
 0x53f   : > { %v4031_v55 = vpop.f32.mrf.mxu0  ;;  %4370 = vmatpush1.bf16.msra.mxu0 %v9902_v1  ;;  %4523 = vmatpush1.bf16.msra.mxu1 %v9902_v1  ;;  %v4243_v22 = vmax.f32 %v4181_v54, 0.0  ;;  %v4240_v41 = vmax.f32 %v4173_v29, 0.0  ;;  %v3992_v59 = vadd.f32 %v9021_v44, %v8915_v6  ;;  %v4165_v53 = vadd.f32 %v9043_v7, %v4002_v4  ;;  %v7007_v54 = vld [vmem:[%s9669_s9 + $0x34] ss:$8 sps:$4 sm:$0xff]   ;;  %v7011_v4 = vld [vmem:[%s9669_s9 + $0x30] ss:$8 sps:$4 sm:$0xff]  }
 0x540   : > { %v4032_v2 = vadd.f32 %v4031_v55, %v8915_v6  ;;  %v4193_v17 = vadd.f32 %v4192_v13, %v4030_v51  ;;  %v4247_v50 = vmax.f32 %v4191_v21, 0.0  ;;  %v4274_v26 = vpack.c.bf16 %v4246_v38, %v4244_v57  ;;  %v7024_v38 = vld [vmem:[%s9672_s12 + $0x28] sm:$0xff]   ;;  %v7027_v29 = vld [vmem:[%s9671_s11 + $0x18] sm:$0xff]  }
 0x541   : > { %v4033_v30 = vpop.f32.mrf.mxu0  ;;  %v4241_v51 = vmax.f32 %v4175_v18, 0.0  ;;  %v4273_v24 = vpack.c.bf16 %v4245_v37, %v4243_v22  ;;  %v4272_v55 = vpack.c.bf16 %v4242_v58, %v4240_v41  ;;  %v3988_v1 = vadd.f32 %v9009_v43, %v8915_v6  ;;  %v7028_v57 = vld [vmem:[%s9672_s12 + $0x18] sm:$0xff]   ;;  %v7013_v37 = vld [vmem:[%s9669_s9 + $0x44] ss:$8 sps:$4 sm:$0xff]   ;;  %v7018_v22 = vld [vmem:[%s9670_s10 + $0x40] ss:$8 sps:$4 sm:$0xff]  }
 0x542   : > { %v4195_v33 = vadd.f32 %v4194_v32, %v4032_v2  ;;  %v4034_v19 = vadd.f32 %v4033_v30, %v8919_v45  ;;  %v4248_v31 = vmax.f32 %v4193_v17, 0.0  ;;  %v4238_v32 = vmax.f32 %v4167_v56, 0.0  ;;  %v6989_v17 = vld [vmem:[%s9669_s9] ss:$8 sps:$4 sm:$0xff]   ;;  %v7012_v18 = vld [vmem:[%s9670_s10 + $0x30] ss:$8 sps:$4 sm:$0xff]  }
 0x543   : > { %v4161_v45 = vadd.f32 %v9024_v62, %v3998_v46  ;;  %v4239_v3 = vmax.f32 %v4171_v8, 0.0  ;;  %v4153_v20 = vadd.f32 %v9006_v48, %v3990_v52  ;;  %v4236_v39 = vmax.f32 %v4163_v61, 0.0  ;;  %v7015_v56 = vld [vmem:[%s9670_s10 + $0x44] ss:$8 sps:$4 sm:$0xff]   ;;  %v7017_v8 = vld [vmem:[%s9669_s9 + $0x40] ss:$8 sps:$4 sm:$0xff]  }
 0x544   : > { %v4249_v40 = vmax.f32 %v4195_v33, 0.0  ;;  %v4197_v60 = vadd.f32 %v4196_v25, %v4034_v19  ;;  %v4155_v44 = vadd.f32 %v9012_v15, %v3992_v59  ;;  %v4237_v7 = vmax.f32 %v4165_v53, 0.0  ;;  %v6992_v33 = vld [vmem:[%s9670_s10] ss:$8 sps:$4 sm:$0xff]   ;;  %v6995_v19 = vld [vmem:[%s9669_s9 + $0x14] ss:$8 sps:$4 sm:$0xff]  }
 0x545   : > { %v4271_v21 = vpack.c.bf16 %v4241_v51, %v4239_v3  ;;  %v4234_v28 = vmax.f32 %v4157_v5, 0.0  ;;  %v4270_v2 = vpack.c.bf16 %v4238_v32, %v4236_v39  ;;  %v4151_v35 = vadd.f32 %v9903_v63, %v3988_v1  ;;  %v7019_v25 = vld [vmem:[%s9671_s11 + $0x38] sm:$0xff]   ;;  %v7031_v58 = vld [vmem:[%s9671_s11 + $0x8] sm:$0xff]   ;;  %v7034_v46 = vld [vmem:[%s9672_s12] sm:$0xff]  }
 0x546   : > { %v4275_v10 = vpack.c.bf16 %v4249_v40, %v4247_v50  ;;  %v4250_v42 = vmax.f32 %v4197_v60, 0.0  ;;  %v4235_v30 = vmax.f32 %v4161_v45, 0.0  ;;  %v4232_v6 = vmax.f32 %v4153_v20, 0.0  ;;  %v7021_v50 = vld [vmem:[%s9671_s11 + $0x30] sm:$0xff]   ;;  %v7037_v41 = vld [vmem:[%s9671_s11 + $0x48] sm:$0xff]   ;;  %v7039_v53 = vld [vmem:[%s9671_s11 + $0x40] sm:$0xff]  }
 0x547   : > { %v4233_v43 = vmax.f32 %v4155_v44, 0.0  ;;  %v4231_v0 = vmax.f32 %v4151_v35, 0.0  ;;  %v7022_v40 = vld [vmem:[%s9672_s12 + $0x30] sm:$0xff]   ;;  %v7038_v59 = vld [vmem:[%s9672_s12 + $0x48] sm:$0xff]   ;;  %v7040_v51 = vld [vmem:[%s9672_s12 + $0x40] sm:$0xff]  }
 0x548   : > { %v4276_v13 = vpack.c.bf16 %v4250_v42, %v4248_v31  ;;  %v4350_v11 = vsel %vm3534_vm5, %v4275_v10, 0  ;;  %v4269_v62 = vpack.c.bf16 %v4237_v7, %v4235_v30  ;;  %v4268_v48 = vpack.c.bf16 %v4234_v28, %v4232_v6  ;;  %v6999_v60 = vld [vmem:[%s9669_s9 + $0x10] ss:$8 sps:$4 sm:$0xff]   ;;  %v7025_v31 = vld [vmem:[%s9671_s11 + $0x20] sm:$0xff]  }
 0x549   : > { %v4267_v15 = vpack.c.bf16 %v4233_v43, %v4231_v0  ;;  %v7026_v10 = vld [vmem:[%s9672_s12 + $0x20] sm:$0xff]   ;;  %v7035_v52 = vld [vmem:[%s9671_s11 + $0x50] sm:$0xff]   ;;  %v7043_v5 = vld [vmem:[%s9673_s13 + $0xf8] sm:$0xff]  }
 0x54a   : > { %6318 = vmatprep.subr.msk.bf16.mxu0 %vm3534_vm5, %v4276_v13  ;;  %6334 = vmatprep.subr.msk.bf16.mxu1 %vm3534_vm5, %v4276_v13  ;;  %v7005_v42 = vld [vmem:[%s9669_s9 + $0x20] ss:$8 sps:$4 sm:$0xff]   ;;  %v7029_v13 = vld [vmem:[%s9671_s11 + $0x10] sm:$0xff]   ;;  %v7042_v6 = vld [vmem:[%s9673_s13 + $0x38] sm:$0xff]  }
 0x54b   : > { %4378 = vmatpush2.bf16.msra.mxu0 %v4350_v11  ;;  %4531 = vmatpush2.bf16.msra.mxu1 %v4350_v11  ;;  %v7032_v11 = vld [vmem:[%s9672_s12 + $0x8] sm:$0xff]   ;;  %v7036_v61 = vld [vmem:[%s9672_s12 + $0x50] sm:$0xff]   ;;  %v7044_v43 = vld [vmem:[%s9673_s13 + $0xb8] sm:$0xff]  }
 0x54c   : > { %4379 = vmatprep.subr.bf16.mxu0 %v4274_v26  ;;  %4532 = vmatprep.subr.bf16.mxu1 %v4274_v26  ;;  %v7033_v26 = vld [vmem:[%s9671_s11] sm:$0xff]  }
 0x54f   : > { %4380 = vmatpush2.bf16.msra.mxu0 %v4273_v24  ;;  %4533 = vmatpush2.bf16.msra.mxu1 %v4273_v24  ;;  %v7041_v24 = vld [vmem:[%s9673_s13 + $0x78] sm:$0xff]  }
 0x550   : > { %4381 = vmatprep.subr.bf16.mxu0 %v4272_v55  ;;  %4534 = vmatprep.subr.bf16.mxu1 %v4272_v55 }
 0x553   : > { %4382 = vmatpush2.bf16.msra.mxu0 %v4271_v21  ;;  %4535 = vmatpush2.bf16.msra.mxu1 %v4271_v21 }
 0x554   : > { %4383 = vmatprep.subr.bf16.mxu0 %v4270_v2  ;;  %4536 = vmatprep.subr.bf16.mxu1 %v4270_v2 }
 0x557   : > { %4384 = vmatpush2.bf16.msra.mxu0 %v4269_v62  ;;  %4537 = vmatpush2.bf16.msra.mxu1 %v4269_v62 }
 0x558   : > { %4385 = vmatprep.subr.bf16.mxu0 %v4268_v48  ;;  %4538 = vmatprep.subr.bf16.mxu1 %v4268_v48 }
 0x55b   : > { %4386 = vmatpush2.bf16.msra.mxu0 %v4267_v15  ;;  %4539 = vmatpush2.bf16.msra.mxu1 %v4267_v15  ;;  %v7045_v15 = vld [vmem:[%s9673_s13 + $0x70] sm:$0xff]  }
 0x55c   : > { %4725 = vmatprep.subr.bf16.mxu0 %v9904_v34  ;;  %4886 = vmatprep.subr.bf16.mxu1 %v9904_v34 }
 0x55e   : > { %4388 = vmatmul.mubr.bf16.vlgmr.msra.gmra.mxu0 %v6989_v17  ;;  %4541 = vmatmul.mubr.bf16.vlgmr.msra.gmra.mxu1 %v6992_v33  ;;  %v7047_v17 = vld [vmem:[%s9673_s13 + $0xf0] sm:$0xff]  }
 0x55f   : > { %6320 = vmatprep.mubr.msk.bf16.mxu0 %vm4332_vm7, %v6995_v19  ;;  %6336 = vmatprep.mubr.msk.bf16.mxu1 %vm4332_vm7, %v6997_v14  ;;  %v7046_v14 = vld [vmem:[%s9673_s13 + $0x30] sm:$0xff]  }
 0x560   : > { %4726 = vmatpush1.bf16.msra.mxu0 %v7019_v25  ;;  %4887 = vmatpush1.bf16.msra.mxu1 %v7020_v12 }
 0x561   : > { %4727 = vmatprep.subr.bf16.mxu0 %v9904_v34  ;;  %4888 = vmatprep.subr.bf16.mxu1 %v9904_v34 }
 0x564   : > { %4728 = vmatpush1.bf16.msra.mxu0 %v7021_v50  ;;  %4889 = vmatpush1.bf16.msra.mxu1 %v7022_v40  ;;  %v7049_v40 = vld [vmem:[%s9673_s13 + $0x68] sm:$0xff]  }
 0x565   : > { %4729 = vmatprep.subr.bf16.mxu0 %v9904_v34  ;;  %4890 = vmatprep.subr.bf16.mxu1 %v9904_v34 }
 0x566   : > { %4398 = vmatmul.mubr.bf16.gmra.mxu0 %v6999_v60  ;;  %4551 = vmatmul.mubr.bf16.gmra.mxu1 %v7000_v36 }
 0x567   : > { %6321 = vmatprep.mubr.msk.bf16.mxu0 %vm4332_vm7, %v7001_v23  ;;  %6337 = vmatprep.mubr.msk.bf16.mxu1 %vm4332_vm7, %v7003_v16 }
 0x568   : > { %4730 = vmatpush1.bf16.msra.mxu0 %v7023_v27  ;;  %4891 = vmatpush1.bf16.msra.mxu1 %v7024_v38 }
 0x569   : > { %4731 = vmatprep.subr.bf16.mxu0 %v9904_v34  ;;  %4892 = vmatprep.subr.bf16.mxu1 %v9904_v34 }
 0x56c   : > { %4732 = vmatpush1.bf16.msra.mxu0 %v7025_v31  ;;  %4893 = vmatpush1.bf16.msra.mxu1 %v7026_v10 }
 0x56d   : > { %4733 = vmatprep.subr.bf16.mxu0 %v9904_v34  ;;  %4894 = vmatprep.subr.bf16.mxu1 %v9904_v34 }
 0x56e   : > { %4408 = vmatmul.mubr.bf16.gmra.mxu0 %v7005_v42  ;;  %4561 = vmatmul.mubr.bf16.gmra.mxu1 %v7006_v47 }
 0x56f   : > { %6322 = vmatprep.mubr.msk.bf16.mxu0 %vm4332_vm7, %v7007_v54  ;;  %6338 = vmatprep.mubr.msk.bf16.mxu1 %vm4332_vm7, %v7009_v49 }
 0x570   : > { %4734 = vmatpush1.bf16.msra.mxu0 %v7027_v29  ;;  %4895 = vmatpush1.bf16.msra.mxu1 %v7028_v57 }
 0x571   : > { %4735 = vmatprep.subr.bf16.mxu0 %v9904_v34  ;;  %4896 = vmatprep.subr.bf16.mxu1 %v9904_v34 }
 0x574   : > { %4736 = vmatpush1.bf16.msra.mxu0 %v7029_v13  ;;  %4897 = vmatpush1.bf16.msra.mxu1 %v7030_v9 }
 0x575   : > { %4737 = vmatprep.subr.bf16.mxu0 %v9904_v34  ;;  %4898 = vmatprep.subr.bf16.mxu1 %v9904_v34 }
 0x576   : > { %4418 = vmatmul.mubr.bf16.gmra.mxu0 %v7011_v4  ;;  %4571 = vmatmul.mubr.bf16.gmra.mxu1 %v7012_v18 }
 0x577   : > { %6323 = vmatprep.mubr.msk.bf16.mxu0 %vm4332_vm7, %v7013_v37  ;;  %6339 = vmatprep.mubr.msk.bf16.mxu1 %vm4332_vm7, %v7015_v56 }
 0x578   : > { %4738 = vmatpush1.bf16.msra.mxu0 %v7031_v58  ;;  %4899 = vmatpush1.bf16.msra.mxu1 %v7032_v11 }
 0x579   : > { %4739 = vmatprep.subr.bf16.mxu0 %v9904_v34  ;;  %4900 = vmatprep.subr.bf16.mxu1 %v9904_v34 }
 0x57c   : > { %4740 = vmatpush1.bf16.msra.mxu0 %v7033_v26  ;;  %4901 = vmatpush1.bf16.msra.mxu1 %v7034_v46 }
 0x57d   : > { %4751 = vmatprep.subr.bf16.mxu0 %v9904_v34  ;;  %4912 = vmatprep.subr.bf16.mxu1 %v9904_v34 }
 0x57e   : > { %4428 = vmatmul.mubr.bf16.gmra.mxu0 %v7017_v8  ;;  %4581 = vmatmul.mubr.bf16.gmra.mxu1 %v7018_v22 }
 0x580   : > { %4752 = vmatpush2.bf16.msra.mxu0 %v7035_v52  ;;  %4913 = vmatpush2.bf16.msra.mxu1 %v7036_v61 }
 0x581   : > { %4753 = vmatprep.subr.bf16.mxu0 %v9904_v34  ;;  %4914 = vmatprep.subr.bf16.mxu1 %v9904_v34 }
 0x584   : > { %4754 = vmatpush2.bf16.msra.mxu0 %v7037_v41  ;;  %4915 = vmatpush2.bf16.msra.mxu1 %v7038_v59 }
 0x585   : > { %4755 = vmatprep.subr.bf16.mxu0 %v9904_v34  ;;  %4916 = vmatprep.subr.bf16.mxu1 %v9904_v34  ;;  %v7048_v34 = vld [vmem:[%s9673_s13 + $0xb0] sm:$0xff]  }
 0x588   : > { %4756 = vmatpush2.bf16.msra.mxu0 %v7039_v53  ;;  %4917 = vmatpush2.bf16.msra.mxu1 %v7040_v51 }
 0x589   : > { %6439 = vmatprep.subr.bf16.mxu0 %v7041_v24  ;;  %6485 = vmatprep.subr.bf16.mxu1 %v7043_v5 }
 0x61e   : > { %v4389_v32 = vpop.f32.mrf.mxu0  ;;  %v4542_v55 = vpop.f32.mrf.mxu1 }
 0x61f   : > { %v4591_v2 = vmax.f32 %v4389_v32, %v4542_v55 }
 0x620   : > { %v4391_v1 = vpop.f32.mrf.mxu0  ;;  %v4544_v45 = vpop.f32.mrf.mxu1 }
 0x621   : > { %v4592_v21 = vmax.f32 %v4391_v1, %v4544_v45 }
 0x622   : > { %v4393_v3 = vpop.f32.mrf.mxu0  ;;  %v4546_v20 = vpop.f32.mrf.mxu1 }
 0x623   : > { %v4593_v39 = vmax.f32 %v4393_v3, %v4546_v20 }
 0x624   : > { %v4395_v44 = vpop.f32.mrf.mxu0  ;;  %v4548_v7 = vpop.f32.mrf.mxu1 }
 0x625   : > { %v4594_v28 = vmax.f32 %v4395_v44, %v4548_v7  ;;  %v4611_v62 = vpack.c.bf16 %v4593_v39, %v4591_v2 }
 0x626   : > { %v4399_v63 = vpop.f32.mrf.mxu0  ;;  %v4552_v35 = vpop.f32.mrf.mxu1 }
 0x627   : > { %v4612_v30 = vpack.c.bf16 %v4594_v28, %v4592_v21  ;;  %v4595_v23 = vmax.f32 %v4399_v63, %v4552_v35  ;;  %v7050_v35 = vld [vmem:[%s9673_s13 + $0x28] sm:$0xff]  }
 0x628   : > { %v4401_v48 = vpop.f32.mrf.mxu0  ;;  %v4554_v0 = vpop.f32.mrf.mxu1 }
 0x629   : > { %6351 = vmatprep.mubr.msk.bf16.mxu0 %vm4709_vm8, %v4612_v30  ;;  %6367 = vmatprep.mubr.msk.bf16.mxu1 %vm4709_vm8, %v4612_v30  ;;  %v4596_v60 = vmax.f32 %v4401_v48, %v4554_v0  ;;  %v7051_v30 = vld [vmem:[%s9673_s13 + $0xe8] sm:$0xff]   ;;  %v7055_v48 = vld [vmem:[%s9673_s13 + $0xe0] sm:$0xff]  }
 0x62a   : > { %v4403_v33 = vpop.f32.mrf.mxu0  ;;  %v4556_v19 = vpop.f32.mrf.mxu1  ;;  %4758 = vmatmul.mubr.bf16.vlgmr.msra.gmra.mxu0 %v4611_v62  ;;  %4919 = vmatmul.mubr.bf16.vlgmr.msra.gmra.mxu1 %v4611_v62  ;;  %v7054_v62 = vld [vmem:[%s9673_s13 + $0x20] sm:$0xff]  }
 0x62b   : > { %6440 = vmatpush3.bf16.msra.mxu0 %v7042_v6  ;;  %6486 = vmatpush3.bf16.msra.mxu1 %v7044_v43  ;;  %v4597_v25 = vmax.f32 %v4403_v33, %v4556_v19  ;;  %v7052_v6 = vld [vmem:[%s9673_s13 + $0xa8] sm:$0xff]   ;;  %v7053_v43 = vld [vmem:[%s9673_s13 + $0x60] sm:$0xff]   ;;  %v7059_v33 = vld [vmem:[%s9673_s13 + $0xd8] sm:$0xff]  }
 0x62c   : > { %v4405_v12 = vpop.f32.mrf.mxu0  ;;  %v4558_v50 = vpop.f32.mrf.mxu1  ;;  %6441 = vmatprep.subr.bf16.mxu0 %v7045_v15  ;;  %6487 = vmatprep.subr.bf16.mxu1 %v7047_v17  ;;  %v7056_v0 = vld [vmem:[%s9673_s13 + $0xa0] sm:$0xff]   ;;  %v7057_v15 = vld [vmem:[%s9673_s13 + $0x58] sm:$0xff]  }
 0x62d   : > { %v4598_v36 = vmax.f32 %v4405_v12, %v4558_v50  ;;  %v4613_v31 = vpack.c.bf16 %v4597_v25, %v4595_v23  ;;  %v7058_v17 = vld [vmem:[%s9673_s13 + $0x18] sm:$0xff]   ;;  %v7063_v25 = vld [vmem:[%s9673_s13 + $0xd0] sm:$0xff]   ;;  %v7065_v50 = vld [vmem:[%s9673_s13 + $0x48] sm:$0xff]  }
 0x62e   : > { %v4409_v16 = vpop.f32.mrf.mxu0  ;;  %v4562_v27 = vpop.f32.mrf.mxu1  ;;  %v7060_v19 = vld [vmem:[%s9673_s13 + $0x98] sm:$0xff]   ;;  %v7064_v12 = vld [vmem:[%s9673_s13 + $0x90] sm:$0xff]   ;;  %v7069_v23 = vld [vmem:[%s9673_s13 + $0x40] sm:$0xff]  }
 0x62f   : > { %v4614_v38 = vpack.c.bf16 %v4598_v36, %v4596_v60  ;;  %6442 = vmatpush3.bf16.msra.mxu0 %v7046_v14  ;;  %6488 = vmatpush3.bf16.msra.mxu1 %v7048_v34  ;;  %v4599_v4 = vmax.f32 %v4409_v16, %v4562_v27  ;;  %v7061_v14 = vld [vmem:[%s9673_s13 + $0x50] sm:$0xff]   ;;  %v7067_v60 = vld [vmem:[%s9673_s13 + $0xc8] sm:$0xff]   ;;  %v7070_v16 = vld [vmem:[%s9673_s13] sm:$0xff]  }
 0x630   : > { %v4411_v10 = vpop.f32.mrf.mxu0  ;;  %v4564_v42 = vpop.f32.mrf.mxu1  ;;  %6443 = vmatprep.subr.bf16.mxu0 %v7049_v40  ;;  %6489 = vmatprep.subr.bf16.mxu1 %v7051_v30  ;;  %v7062_v34 = vld [vmem:[%s9673_s13 + $0x10] sm:$0xff]   ;;  %v7066_v40 = vld [vmem:[%s9673_s13 + $0x8] sm:$0xff]   ;;  %v7071_v27 = vld [vmem:[%s9673_s13 + $0xc0] sm:$0xff]  }
 0x631   : > { %6352 = vmatprep.mubr.msk.bf16.mxu0 %vm4709_vm8, %v4614_v38  ;;  %6368 = vmatprep.mubr.msk.bf16.mxu1 %vm4709_vm8, %v4614_v38  ;;  %v4600_v13 = vmax.f32 %v4411_v10, %v4564_v42  ;;  %v7068_v36 = vld [vmem:[%s9673_s13 + $0x88] sm:$0xff]   ;;  %v7072_v38 = vld [vmem:[%s9673_s13 + $0x80] sm:$0xff]   ;;  %v7073_v30 = vld [vmem:[%s9673_s13 + $0x138] sm:$0xff]  }
 0x632   : > { %v4413_v47 = vpop.f32.mrf.mxu0  ;;  %v4566_v54 = vpop.f32.mrf.mxu1  ;;  %4766 = vmatmul.mubr.bf16.gmra.mxu0 %v4613_v31  ;;  %4927 = vmatmul.mubr.bf16.gmra.mxu1 %v4613_v31  ;;  %v7167_v31 = vmov 0.0  }
 0x633   : > { %v4601_v49 = vmax.f32 %v4413_v47, %v4566_v54  ;;  %6444 = vmatpush3.bf16.msra.mxu0 %v7050_v35  ;;  %6490 = vmatpush3.bf16.msra.mxu1 %v7052_v6 }
 0x634   : > { %v4415_v29 = vpop.f32.mrf.mxu0  ;;  %v4568_v57 = vpop.f32.mrf.mxu1  ;;  %6445 = vmatprep.subr.bf16.mxu0 %v7053_v43  ;;  %6491 = vmatprep.subr.bf16.mxu1 %v7055_v48 }
 0x635   : > { %v4602_v9 = vmax.f32 %v4415_v29, %v4568_v57  ;;  %v4615_v58 = vpack.c.bf16 %v4601_v49, %v4599_v4 }
 0x636   : > { %v4419_v18 = vpop.f32.mrf.mxu0  ;;  %v4572_v37 = vpop.f32.mrf.mxu1 }
 0x637   : > { %v4616_v56 = vpack.c.bf16 %v4602_v9, %v4600_v13  ;;  %v4603_v53 = vmax.f32 %v4419_v18, %v4572_v37  ;;  %6446 = vmatpush3.bf16.msra.mxu0 %v7054_v62  ;;  %6492 = vmatpush3.bf16.msra.mxu1 %v7056_v0 }
 0x638   : > { %v4421_v11 = vpop.f32.mrf.mxu0  ;;  %v4574_v26 = vpop.f32.mrf.mxu1  ;;  %6447 = vmatprep.subr.bf16.mxu0 %v7057_v15  ;;  %6493 = vmatprep.subr.bf16.mxu1 %v7059_v33 }
 0x639   : > { %6353 = vmatprep.mubr.msk.bf16.mxu0 %vm4709_vm8, %v4616_v56  ;;  %6369 = vmatprep.mubr.msk.bf16.mxu1 %vm4709_vm8, %v4616_v56  ;;  %v4604_v41 = vmax.f32 %v4421_v11, %v4574_v26 }
 0x63a   : > { %v4423_v46 = vpop.f32.mrf.mxu0  ;;  %v4576_v8 = vpop.f32.mrf.mxu1  ;;  %4774 = vmatmul.mubr.bf16.gmra.mxu0 %v4615_v58  ;;  %4935 = vmatmul.mubr.bf16.gmra.mxu1 %v4615_v58 }
 0x63b   : > { %v4605_v22 = vmax.f32 %v4423_v46, %v4576_v8  ;;  %6448 = vmatpush3.bf16.msra.mxu0 %v7058_v17  ;;  %6494 = vmatpush3.bf16.msra.mxu1 %v7060_v19 }
 0x63c   : > { %v4425_v52 = vpop.f32.mrf.mxu0  ;;  %v4578_v61 = vpop.f32.mrf.mxu1  ;;  %6449 = vmatprep.subr.bf16.mxu0 %v7061_v14  ;;  %6495 = vmatprep.subr.bf16.mxu1 %v7063_v25 }
 0x63d   : > { %v4606_v59 = vmax.f32 %v4425_v52, %v4578_v61  ;;  %v4617_v32 = vpack.c.bf16 %v4605_v22, %v4603_v53 }
 0x63e   : > { %v4429_v51 = vpop.f32.mrf.mxu0  ;;  %v4582_v24 = vpop.f32.mrf.mxu1 }
 0x63f   : > { %v4618_v5 = vpack.c.bf16 %v4606_v59, %v4604_v41  ;;  %v4607_v28 = vmax.f32 %v4429_v51, %v4582_v24  ;;  %6450 = vmatpush3.bf16.msra.mxu0 %v7062_v34  ;;  %6496 = vmatpush3.bf16.msra.mxu1 %v7064_v12  ;;  %v7074_v12 = vld [vmem:[%s9673_s13 + $0x130] sm:$0xff]  }
 0x640   : > { %v4431_v55 = vpop.f32.mrf.mxu0  ;;  %v4584_v1 = vpop.f32.mrf.mxu1  ;;  %6451 = vmatprep.subr.bf16.mxu0 %v7065_v50  ;;  %6497 = vmatprep.subr.bf16.mxu1 %v7067_v60 }
 0x641   : > { %6354 = vmatprep.mubr.msk.bf16.mxu0 %vm4709_vm8, %v4618_v5  ;;  %6370 = vmatprep.mubr.msk.bf16.mxu1 %vm4709_vm8, %v4618_v5  ;;  %v4608_v7 = vmax.f32 %v4431_v55, %v4584_v1 }
 0x642   : > { %v4433_v45 = vpop.f32.mrf.mxu0  ;;  %v4586_v3 = vpop.f32.mrf.mxu1  ;;  %4782 = vmatmul.mubr.bf16.gmra.mxu0 %v4617_v32  ;;  %4943 = vmatmul.mubr.bf16.gmra.mxu1 %v4617_v32 }
 0x643   : > { %v4609_v20 = vmax.f32 %v4433_v45, %v4586_v3  ;;  %6452 = vmatpush3.bf16.msra.mxu0 %v7066_v40  ;;  %6498 = vmatpush3.bf16.msra.mxu1 %v7068_v36 }
 0x644   : > { %v4435_v39 = vpop.f32.mrf.mxu0  ;;  %v4588_v44 = vpop.f32.mrf.mxu1  ;;  %6453 = vmatprep.subr.bf16.mxu0 %v7069_v23  ;;  %6499 = vmatprep.subr.bf16.mxu1 %v7071_v27 }
 0x645   : > { %v4610_v21 = vmax.f32 %v4435_v39, %v4588_v44  ;;  %v4619_v63 = vpack.c.bf16 %v4609_v20, %v4607_v28 }
 0x647   : > { %v4620_v2 = vpack.c.bf16 %v4610_v21, %v4608_v7  ;;  %6454 = vmatpush3.bf16.msra.mxu0 %v7070_v16  ;;  %6500 = vmatpush3.bf16.msra.mxu1 %v7072_v38 }
 0x648   : > { %6566 = vmatprep.subr.bf16.mxu0 %v7167_v31  ;;  %6602 = vmatprep.subr.bf16.mxu1 %v7167_v31 }
 0x649   : > { %6355 = vmatprep.mubr.msk.bf16.mxu0 %vm4709_vm8, %v4620_v2  ;;  %6371 = vmatprep.mubr.msk.bf16.mxu1 %vm4709_vm8, %v4620_v2 }
 0x64a   : > { %4790 = vmatmul.mubr.bf16.gmra.mxu0 %v4619_v63  ;;  %4951 = vmatmul.mubr.bf16.gmra.mxu1 %v4619_v63 }
 0x6ea   : > { %v4759_v10 = vpop.f32.mrf.mxu0  ;;  %v4920_v42 = vpop.f32.mrf.mxu1 }
 0x6eb   : > { %v4959_v57 = vmax.f32 %v4759_v10, %v4920_v42 }
 0x6ec   : > { %v4761_v47 = vpop.f32.mrf.mxu0  ;;  %v4922_v54 = vpop.f32.mrf.mxu1 }
 0x6ed   : > { %v7075_v54 = vld [vmem:[%s9673_s13 + $0x128] sm:$0xff]  }
 0x6ee   : > { %v4762_v49 = vpop.f32.mrf.mxu0  ;;  %v4923_v29 = vpop.f32.mrf.mxu1 }
 0x6ef   : > { %v4960_v13 = vmax.f32 %v4762_v49, %v4923_v29 }
 0x6f0   : > { %v4764_v9 = vpop.f32.mrf.mxu0  ;;  %v4925_v4 = vpop.f32.mrf.mxu1 }
 0x6f1   : > { %v9406_v18 = vpack.c.bf16 %v4960_v13, %v4959_v57 }
 0x6f2   : > { %v4767_v37 = vpop.f32.mrf.mxu0  ;;  %v4928_v56 = vpop.f32.mrf.mxu1 }
 0x6f3   : > { %v4977_v26 = vshll.u32 %v9406_v18, 16  ;;  %v4975_v22 = vshrl.u32 %v9406_v18, 16  ;;  %v4961_v52 = vmax.f32 %v4767_v37, %v4928_v56  ;;  %v5023_v17 = vrot.slane %v9406_v18, 1 }
 0x6f4   : > { %v4769_v58 = vpop.f32.mrf.mxu0  ;;  %v4930_v11 = vpop.f32.mrf.mxu1 }
 0x6f5   : > { %v4979_v51 = vrot.slane %v4977_v26, 1  ;;  %v5038_v32 = vrot.slane %v4975_v22, 1  ;;  %v5039_v55 = vrot.slane %v4977_v26, 2 }
 0x6f6   : > { %v4770_v46 = vpop.f32.mrf.mxu0  ;;  %v4931_v8 = vpop.f32.mrf.mxu1 }
 0x6f7   : > { %v4962_v61 = vmax.f32 %v4770_v46, %v4931_v8  ;;  %v4980_v39 = vor.u32 %v4979_v51, %v4975_v22  ;;  %v5040_v63 = vor.u32 %v5039_v55, %v5038_v32  ;;  %v7076_v46 = vld [vmem:[%s9673_s13 + $0x120] sm:$0xff]  }
 0x6f8   : > { %v4772_v41 = vpop.f32.mrf.mxu0  ;;  %v4933_v59 = vpop.f32.mrf.mxu1 }
 0x6f9   : > { %v9410_v53 = vpack.c.bf16 %v4962_v61, %v4961_v52 }
 0x6fa   : > { %v4775_v24 = vpop.f32.mrf.mxu0  ;;  %v4936_v5 = vpop.f32.mrf.mxu1 }
 0x6fb   : > { %v4982_v1 = vshll.u32 %v9410_v53, 16  ;;  %v4986_v45 = vshrl.u32 %v9410_v53, 16  ;;  %v5024_v35 = vrot.slane %v9410_v53, 1  ;;  %v4963_v6 = vmax.f32 %v4775_v24, %v4936_v5 }
 0x6fc   : > { %v4777_v3 = vpop.f32.mrf.mxu0  ;;  %v4938_v20 = vpop.f32.mrf.mxu1 }
 0x6fd   : > { %v4984_v44 = vrot.slane %v4982_v1, 1  ;;  %v5041_v7 = vrot.slane %v4986_v45, 1  ;;  %v5042_v21 = vrot.slane %v4982_v1, 2  ;;  %v5025_v25 = vsel %vm3534_vm5, %v5023_v17, %v5024_v35  ;;  %v7077_v1 = vld [vmem:[%s9673_s13 + $0x118] sm:$0xff]  }
 0x6fe   : > { %v4778_v28 = vpop.f32.mrf.mxu0  ;;  %v4939_v2 = vpop.f32.mrf.mxu1 }
 0x6ff   : > { %v4964_v43 = vmax.f32 %v4778_v28, %v4939_v2  ;;  %v4985_v62 = vsel %vm3404_vm6, %v4980_v39, %v4984_v44  ;;  %v5043_v48 = vor.u32 %v5042_v21, %v5041_v7  ;;  %v4988_v23 = vor.u32 %v4986_v45, %v4984_v44 }
 0x700   : > { %v4780_v0 = vpop.f32.mrf.mxu0  ;;  %v4941_v15 = vpop.f32.mrf.mxu1  ;;  %5436 = vmatprep.mubr.bf16.mxu0 %v4985_v62 }
 0x701   : > { %v9420_v33 = vpack.c.bf16 %v4964_v43, %v4963_v6  ;;  %5437 = vmatmul.mubr.bf16.vlgmr.msra.gmra.mxu0 %v9406_v18  ;;  %v5044_v19 = vsel %vm5037_vm9, %v5040_v63, %v5043_v48  ;;  %v7078_v63 = vld [vmem:[%s9673_s13 + $0x110] sm:$0xff]  }
 0x702   : > { %v4783_v14 = vpop.f32.mrf.mxu0  ;;  %v4944_v34 = vpop.f32.mrf.mxu1  ;;  %5509 = vmatprep.mubr.bf16.mxu1 %v5044_v19  ;;  %6567 = vmatpush3.bf16.msra.mxu0 %v7073_v30 }
 0x703   : > { %5510 = vmatmul.mubr.bf16.vlgmr.msra.gmra.mxu1 %v5025_v25  ;;  %v4990_v50 = vshll.u32 %v9420_v33, 16  ;;  %v4994_v40 = vshrl.u32 %v9420_v33, 16  ;;  %6568 = vmatprep.subr.bf16.mxu0 %v7167_v31  ;;  %v5026_v47 = vrot.slane %v9420_v33, 1  ;;  %v4965_v49 = vmax.f32 %v4783_v14, %v4944_v34  ;;  %v7079_v14 = vld [vmem:[%s9673_s13 + $0x108] sm:$0xff]  }
 0x704   : > { %v4785_v60 = vpop.f32.mrf.mxu0  ;;  %v4946_v36 = vpop.f32.mrf.mxu1 }
 0x705   : > { %v4992_v16 = vrot.slane %v4990_v50, 1  ;;  %v5045_v27 = vrot.slane %v4994_v40, 1  ;;  %v5046_v38 = vrot.slane %v4990_v50, 2  ;;  %v5027_v26 = vsel %vm3534_vm5, %v5024_v35, %v5026_v47 }
 0x706   : > { %v4786_v10 = vpop.f32.mrf.mxu0  ;;  %v4947_v42 = vpop.f32.mrf.mxu1  ;;  %6569 = vmatpush3.bf16.msra.mxu0 %v7074_v12  ;;  %v7080_v12 = vld [vmem:[%s9673_s13 + $0x100] sm:$0xff]   ;;  %v5064_v50 = vrot.slane %v9410_v53, 2  ;;  %v5066_v36 = vrot.slane %v9420_v33, 2 }
 0x707   : > { %v4966_v29 = vmax.f32 %v4786_v10, %v4947_v42  ;;  %v4993_v57 = vsel %vm3404_vm6, %v4988_v23, %v4992_v16  ;;  %v5047_v13 = vor.u32 %v5046_v38, %v5045_v27  ;;  %6570 = vmatprep.subr.bf16.mxu0 %v7167_v31  ;;  %v4996_v41 = vor.u32 %v4994_v40, %v4992_v16  ;;  %v7083_v10 = vld [vmem:[%s9676_s16 + $0x30] sm:$0xff]   ;;  %v7084_v42 = vld [vmem:[%s9676_s16 + $0x28] sm:$0xff]  }
 0x708   : > { %v4788_v9 = vpop.f32.mrf.mxu0  ;;  %v4949_v4 = vpop.f32.mrf.mxu1  ;;  %5444 = vmatprep.mubr.bf16.mxu0 %v4993_v57  ;;  %v5063_v40 = vrot.slane %v9406_v18, 2  ;;  %v5067_v23 = vsel %vm3005_vm3, %v5064_v50, %v5066_v36 }
 0x709   : > { %v9437_v37 = vpack.c.bf16 %v4966_v29, %v4965_v49  ;;  %5445 = vmatmul.mubr.bf16.gmra.mxu0 %v9410_v53  ;;  %v5048_v56 = vsel %vm5037_vm9, %v5043_v48, %v5047_v13  ;;  %v7087_v49 = vld [vmem:[%s9676_s16 + $0x10] sm:$0xff]  }
 0x70a   : > { %v4791_v58 = vpop.f32.mrf.mxu0  ;;  %v4952_v11 = vpop.f32.mrf.mxu1  ;;  %5517 = vmatprep.mubr.bf16.mxu1 %v5048_v56  ;;  %6571 = vmatpush3.bf16.msra.mxu0 %v7075_v54  ;;  %v5065_v60 = vsel %vm3005_vm3, %v5063_v40, %v5064_v50  ;;  %v7086_v54 = vld [vmem:[%s9676_s16 + $0x18] sm:$0xff]  }
 0x70b   : > { %5518 = vmatmul.mubr.bf16.gmra.mxu1 %v5027_v26  ;;  %v4998_v8 = vshll.u32 %v9437_v37, 16  ;;  %v5002_v22 = vshrl.u32 %v9437_v37, 16  ;;  %6572 = vmatprep.subr.bf16.mxu0 %v7167_v31  ;;  %v5028_v55 = vrot.slane %v9437_v37, 1  ;;  %v4967_v45 = vmax.f32 %v4791_v58, %v4952_v11 }
 0x70c   : > { %v4793_v52 = vpop.f32.mrf.mxu0  ;;  %v4954_v61 = vpop.f32.mrf.mxu1  ;;  %v5068_v53 = vrot.slane %v9437_v37, 2 }
 0x70d   : > { %v5000_v59 = vrot.slane %v4998_v8, 1  ;;  %v5049_v51 = vrot.slane %v5002_v22, 1  ;;  %v5050_v24 = vrot.slane %v4998_v8, 2  ;;  %v5029_v2 = vsel %vm3534_vm5, %v5026_v47, %v5028_v55  ;;  %v7085_v47 = vld [vmem:[%s9676_s16 + $0x20] sm:$0xff]  }
 0x70e   : > { %v4794_v5 = vpop.f32.mrf.mxu0  ;;  %v4955_v32 = vpop.f32.mrf.mxu1  ;;  %6573 = vmatpush3.bf16.msra.mxu0 %v7076_v46  ;;  %v5069_v16 = vsel %vm3005_vm3, %v5066_v36, %v5068_v53 }
 0x70f   : > { %v4968_v3 = vmax.f32 %v4794_v5, %v4955_v32  ;;  %v5001_v20 = vsel %vm3404_vm6, %v4996_v41, %v5000_v59  ;;  %v5051_v39 = vor.u32 %v5050_v24, %v5049_v51  ;;  %6574 = vmatprep.subr.bf16.mxu0 %v7167_v31  ;;  %v5004_v6 = vor.u32 %v5002_v22, %v5000_v59 }
 0x710   : > { %5452 = vmatprep.mubr.bf16.mxu0 %v5001_v20  ;;  %v4796_v44 = vpop.f32.mrf.mxu0  ;;  %v4957_v7 = vpop.f32.mrf.mxu1 }
 0x711   : > { %v4973_v21 = vpack.c.bf16 %v4968_v3, %v4967_v45  ;;  %5453 = vmatmul.mubr.bf16.gmra.mxu0 %v9420_v33  ;;  %v5052_v28 = vsel %vm5037_vm9, %v5047_v13, %v5051_v39  ;;  %v7082_v33 = vld [vmem:[%s9676_s16 + $0x38] ss:$0 sps:$4 sm:$0xff]  }
 0x712   : > { %5525 = vmatprep.mubr.bf16.mxu1 %v5052_v28  ;;  %6575 = vmatpush3.bf16.msra.mxu0 %v7077_v1  ;;  %v5767_v38 = vsel %vm5765_vm11, %v7082_v33, 0 }
 0x713   : > { %5526 = vmatmul.mubr.bf16.gmra.mxu1 %v5029_v2  ;;  %v5006_v35 = vshll.u32 %v4973_v21, 16  ;;  %v5010_v30 = vshrl.u32 %v4973_v21, 16  ;;  %6576 = vmatprep.subr.bf16.mxu0 %v7167_v31  ;;  %v5030_v0 = vrot.slane %v4973_v21, 1  ;;  %v5070_v18 = vrot.slane %v4973_v21, 2 }
 0x715   : > { %v5008_v43 = vrot.slane %v5006_v35, 1  ;;  %v5053_v62 = vrot.slane %v5010_v30, 1  ;;  %v5054_v48 = vrot.slane %v5006_v35, 2  ;;  %v5031_v25 = vsel %vm3534_vm5, %v5028_v55, %v5030_v0 }
 0x716   : > { %6577 = vmatpush3.bf16.msra.mxu0 %v7078_v63  ;;  %v5071_v27 = vsel %vm3005_vm3, %v5068_v53, %v5070_v18  ;;  %v9537_v63 = vld [vmem:[%s9674_s14] ss:$0 sm:$0xff] }
 0x717   : > { %v5009_v15 = vsel %vm3404_vm6, %v5004_v6, %v5008_v43  ;;  %v5055_v17 = vor.u32 %v5054_v48, %v5053_v62  ;;  %v5012_v19 = vor.u32 %v5010_v30, %v5008_v43  ;;  %6578 = vmatprep.subr.bf16.mxu0 %v7167_v31 }
 0x718   : > { %5460 = vmatprep.mubr.bf16.mxu0 %v5009_v15 }
 0x719   : > { %5461 = vmatmul.mubr.bf16.gmra.mxu0 %v9437_v37  ;;  %v5056_v34 = vsel %vm5037_vm9, %v5051_v39, %v5055_v17 }
 0x71a   : > { %5533 = vmatprep.mubr.bf16.mxu1 %v5056_v34  ;;  %5468 = vmatprep.mubr.bf16.mxu0 %v5012_v19 }
 0x71b   : > { %5534 = vmatmul.mubr.bf16.gmra.mxu1 %v5031_v25  ;;  %6579 = vmatpush3.bf16.msra.mxu0 %v7079_v14 }
 0x71c   : > { %5541 = vmatprep.mubr.bf16.mxu1 %v5055_v17  ;;  %6580 = vmatprep.subr.bf16.mxu0 %v7167_v31 }
 0x71f   : > { %6581 = vmatpush3.bf16.msra.mxu0 %v7080_v12 }
 0x720   : > { %6616 = vmatprep.subr.bf16.mxu0 %v7167_v31 }
 0x721   : > { %5469 = vmatmul.mubr.bf16.gmra.mxu0 %v4973_v21 }
 0x722   : > { %6582 = vmatprep.mubr.msk.bf16.mxu0 %vm7168_vm10, %v7167_v31 }
 0x723   : > { %5542 = vmatmul.mubr.bf16.gmra.mxu1 %v5030_v0 }
 0x724   : > { %6612 = vmatprep.mubr.msk.bf16.mxu1 %vm7168_vm10, %v7167_v31 }
 0x729   : > { %6583 = vmatmul.mubr.bf16.vlgmr.msra.gmra.mxu0 %v5065_v60 }
 0x72a   : > { %6586 = vmatprep.mubr.msk.bf16.mxu0 %vm7168_vm10, %v7167_v31  ;;  %6617 = vmatpush3.bf16.msra.mxu0 %v5767_v38 }
 0x72b   : > { %6618 = vmatprep.subr.bf16.mxu0 %v7167_v31 }
 0x72e   : > { %6619 = vmatpush3.bf16.msra.mxu0 %v7083_v10 }
 0x72f   : > { %6620 = vmatprep.subr.bf16.mxu0 %v7167_v31 }
 0x731   : > { %6587 = vmatmul.mubr.bf16.gmra.mxu0 %v5067_v23 }
 0x732   : > { %6590 = vmatprep.mubr.msk.bf16.mxu0 %vm7168_vm10, %v7167_v31  ;;  %6621 = vmatpush3.bf16.msra.mxu0 %v7084_v42 }
 0x733   : > { %6622 = vmatprep.subr.bf16.mxu0 %v7167_v31 }
 0x736   : > { %6623 = vmatpush3.bf16.msra.mxu0 %v7085_v47 }
 0x737   : > { %6624 = vmatprep.subr.bf16.mxu0 %v7167_v31 }
 0x739   : > { %6591 = vmatmul.mubr.bf16.gmra.mxu0 %v5069_v16 }
 0x73a   : > { %6594 = vmatprep.mubr.msk.bf16.mxu0 %vm7168_vm10, %v7167_v31  ;;  %6625 = vmatpush3.bf16.msra.mxu0 %v7086_v54 }
 0x73b   : > { %6626 = vmatprep.subr.bf16.mxu0 %v7167_v31 }
 0x73e   : > { %6627 = vmatpush3.bf16.msra.mxu0 %v7087_v49 }
 0x73f   : > { %6628 = vmatprep.subr.bf16.mxu0 %v7167_v31 }
 0x741   : > { %6595 = vmatmul.mubr.bf16.gmra.mxu0 %v5071_v27 }
 0x742   : > { %6598 = vmatprep.mubr.msk.bf16.mxu0 %vm7168_vm10, %v7167_v31 }
 0x749   : > { %6599 = vmatmul.mubr.bf16.gmra.mxu0 %v5070_v18 }
 0x74a   : > { %6632 = vmatprep.mubr.msk.bf16.mxu0 %vm7168_vm10, %v7167_v31 }
 0x7c1   : > { %v6455_v29 = vpop.f32.mrf.mxu0 }
 0x7c3   : > { %v6456_v57 = vpop.f32.mrf.mxu0  ;;  %v6501_v13 = vpop.f32.mrf.mxu1 }
 0x7c4   : > { %v6457_v9 = vadd.f32 %v6456_v57, %v6455_v29 }
 0x7c5   : > { %v6458_v4 = vpop.f32.mrf.mxu0  ;;  %v6502_v37 = vpop.f32.mrf.mxu1 }
 0x7c6   : > { %v5439_v43 = vadd.f32 %v6457_v9, %v9537_v63  ;;  %v6503_v62 = vadd.f32 %v6502_v37, %v6501_v13 }
 0x7c7   : > { %v6459_v56 = vpop.f32.mrf.mxu0  ;;  %v6504_v58 = vpop.f32.mrf.mxu1 }
 0x7c8   : > { %v6460_v11 = vadd.f32 %v6459_v56, %v6458_v4  ;;  %v5512_v14 = vadd.f32 %v6503_v62, %v5439_v43 }
 0x7c9   : > { %v6461_v26 = vpop.f32.mrf.mxu0  ;;  %v6505_v46 = vpop.f32.mrf.mxu1 }
 0x7ca   : > { %v5442_v0 = vadd.f32 %v6460_v11, %v9537_v63  ;;  %v6506_v15 = vadd.f32 %v6505_v46, %v6504_v58 }
 0x7cb   : > { %v6462_v8 = vpop.f32.mrf.mxu0  ;;  %v6507_v22 = vpop.f32.mrf.mxu1 }
 0x7cc   : > { %v6463_v52 = vadd.f32 %v6462_v8, %v6461_v26  ;;  %v5515_v12 = vadd.f32 %v6506_v15, %v5442_v0 }
 0x7cd   : > { %v6464_v61 = vpop.f32.mrf.mxu0  ;;  %v6508_v41 = vpop.f32.mrf.mxu1 }
 0x7ce   : > { %v5447_v60 = vadd.f32 %v6463_v52, %v9537_v63  ;;  %v6509_v36 = vadd.f32 %v6508_v41, %v6507_v22 }
 0x7cf   : > { %v6465_v59 = vpop.f32.mrf.mxu0  ;;  %v6510_v24 = vpop.f32.mrf.mxu1 }
 0x7d0   : > { %v6466_v51 = vadd.f32 %v6465_v59, %v6464_v61  ;;  %v5520_v47 = vadd.f32 %v6509_v36, %v5447_v60 }
 0x7d1   : > { %v9520_v5 = vpop.f32.mrf.mxu0  ;;  %v6511_v55 = vpop.f32.mrf.mxu1 }
 0x7d2   : > { %v5450_v16 = vadd.f32 %v6466_v51, %v9537_v63  ;;  %v6512_v18 = vadd.f32 %v6511_v55, %v6510_v24 }
 0x7d3   : > { %v9522_v32 = vpop.f32.mrf.mxu0  ;;  %v9528_v3 = vpop.f32.mrf.mxu1 }
 0x7d4   : > { %v5523_v29 = vadd.f32 %v6512_v18, %v5450_v16 }
 0x7d5   : > { %v9524_v1 = vpop.f32.mrf.mxu0  ;;  %v9530_v44 = vpop.f32.mrf.mxu1 }
 0x7d6   : > { %v6515_v18 = vadd.f32 %v9530_v44, %v9528_v3 }
 0x7d7   : > { %v9526_v45 = vpop.f32.mrf.mxu0  ;;  %v9532_v28 = vpop.f32.mrf.mxu1 }
 0x7d9   : > { %v6473_v20 = vpop.f32.mrf.mxu0  ;;  %v9539_v30 = vpop.f32.mrf.mxu1 }
 0x7db   : > { %v6474_v39 = vpop.f32.mrf.mxu0  ;;  %v6519_v17 = vpop.f32.mrf.mxu1 }
 0x7dd   : > { %v6476_v7 = vpop.f32.mrf.mxu0  ;;  %v6520_v50 = vpop.f32.mrf.mxu1 }
 0x7df   : > { %v6477_v21 = vpop.f32.mrf.mxu0  ;;  %v6522_v38 = vpop.f32.mrf.mxu1 }
 0x7e0   : > { %v6478_v55 = vadd.f32 %v6477_v21, %v6476_v7  ;;  %v6469_v7 = vadd.f32 %v9522_v32, %v9520_v5 }
 0x7e1   : > { %v6479_v2 = vpop.f32.mrf.mxu0  ;;  %v6523_v57 = vpop.f32.mrf.mxu1 }
 0x7e2   : > { %v6524_v60 = vadd.f32 %v6523_v57, %v6522_v38  ;;  %v5455_v16 = vadd.f32 %v6469_v7, %v9537_v63 }
 0x7e3   : > { %v6480_v35 = vpop.f32.mrf.mxu0  ;;  %v6525_v58 = vpop.f32.mrf.mxu1 }
 0x7e4   : > { %v6481_v59 = vadd.f32 %v6480_v35, %v6479_v2 }
 0x7e5   : > { %v6482_v6 = vpop.f32.mrf.mxu0  ;;  %v6526_v8 = vpop.f32.mrf.mxu1 }
 0x7e6   : > { %v5471_v0 = vadd.f32 %v6481_v59, %v9537_v63  ;;  %v6527_v15 = vadd.f32 %v6526_v8, %v6525_v58  ;;  %v7092_v58 = vld [vmem:[%s9678_s18 + $0x18] sm:$0xff]   ;;  %v6415_v59 = vld [vmem:[%s9677_s17] ss:$0 sm:$0xff] }
 0x7e7   : > { %v6483_v48 = vpop.f32.mrf.mxu0  ;;  %v6528_v61 = vpop.f32.mrf.mxu1 }
 0x7e8   : > { %v6484_v24 = vadd.f32 %v6483_v48, %v6482_v6  ;;  %v5544_v35 = vadd.f32 %v6527_v15, %v5471_v0  ;;  %v6521_v6 = vadd.f32 %v6520_v50, %v6519_v17 }
 0x7e9   : > { %v5584_v19 = vpop.f32.mrf.mxu0  ;;  %v6529_v43 = vpop.f32.mrf.mxu1 }
 0x7ea   : > { %v5585_v25 = vadd.f32 %v5584_v19, %v5512_v14  ;;  %v6475_v19 = vadd.f32 %v6474_v39, %v6473_v20 }
 0x7eb   : > { %v6584_v34 = vpop.f32.mrf.mxu0 }
 0x7ec   : > { %v5623_v27 = vmax.f32 %v5585_v25, 0.0  ;;  %v5474_v34 = vadd.f32 %v6484_v24, %v9537_v63  ;;  %v6530_v25 = vadd.f32 %v6529_v43, %v6528_v61  ;;  %v5463_v21 = vadd.f32 %v6475_v19, %v9537_v63  ;;  %v7094_v61 = vld [vmem:[%s9678_s18 + $0x8] sm:$0xff]  }
 0x7ed   : > { %v5587_v40 = vpop.f32.mrf.mxu0 }
 0x7ee   : > { %v5588_v23 = vadd.f32 %v5587_v40, %v5515_v12  ;;  %v6472_v12 = vadd.f32 %v9526_v45, %v9524_v1  ;;  %v5466_v40 = vadd.f32 %v6478_v55, %v9537_v63  ;;  %v5547_v39 = vadd.f32 %v6530_v25, %v5474_v34 }
 0x7ef   : > { %v6585_v53 = vpop.f32.mrf.mxu0  ;;  %v5536_v5 = vadd.f32 %v6521_v6, %v5463_v21 }
 0x7f0   : > { %v5624_v33 = vmax.f32 %v5588_v23, 0.0  ;;  %v5458_v36 = vadd.f32 %v6472_v12, %v9537_v63  ;;  %v6518_v23 = vadd.f32 %v9539_v30, %v9532_v28  ;;  %v5539_v1 = vadd.f32 %v6524_v60, %v5466_v40 }
 0x7f1   : > { %v5592_v10 = vpop.f32.mrf.mxu0 }
 0x7f2   : > { %v9545_v42 = vpack.c.bf16 %v5624_v33, %v5623_v27  ;;  %v5593_v49 = vadd.f32 %v5592_v10, %v5520_v47  ;;  %v5531_v33 = vadd.f32 %v6518_v23, %v5458_v36  ;;  %v5528_v47 = vadd.f32 %v6515_v18, %v5455_v16 }
 0x7f3   : > { %v6588_v54 = vpop.f32.mrf.mxu0 }
 0x7f4   : > { %v5625_v37 = vmax.f32 %v5593_v49, 0.0 }
 0x7f5   : > { %v5595_v13 = vpop.f32.mrf.mxu0 }
 0x7f6   : > { %v5596_v9 = vadd.f32 %v5595_v13, %v5523_v29  ;;  %v7081_v13 = vld [vmem:[%s9675_s15] sm:$0xff]  }
 0x7f7   : > { %v6589_v4 = vpop.f32.mrf.mxu0 }
 0x7f8   : > { %v5626_v56 = vmax.f32 %v5596_v9, 0.0  ;;  %v7088_v9 = vld [vmem:[%s9676_s16 + $0x8] sm:$0xff]   ;;  %v7089_v4 = vld [vmem:[%s9676_s16] sm:$0xff]  }
 0x7f9   : > { %v5600_v11 = vpop.f32.mrf.mxu0  ;;  %6629 = vmatpush3.bf16.msra.mxu0 %v7088_v9 }
 0x7fa   : > { %v5636_v26 = vpack.c.bf16 %v5626_v56, %v5625_v37  ;;  %v5601_v30 = vadd.f32 %v5600_v11, %v5528_v47  ;;  %6630 = vmatprep.subr.bf16.mxu0 %v7167_v31  ;;  %v7091_v56 = vld [vmem:[%s9678_s18 + $0x20] sm:$0xff]  }
 0x7fb   : > { %v6592_v46 = vpop.f32.mrf.mxu0 }
 0x7fc   : > { %v5627_v44 = vmax.f32 %v5601_v30, 0.0 }
 0x7fd   : > { %v5603_v22 = vpop.f32.mrf.mxu0  ;;  %6631 = vmatpush3.bf16.msra.mxu0 %v7089_v4 }
 0x7fe   : > { %v5604_v54 = vadd.f32 %v5603_v22, %v5531_v33 }
 0x7ff   : > { %v6593_v52 = vpop.f32.mrf.mxu0 }
 0x800   : > { %v5628_v63 = vmax.f32 %v5604_v54, 0.0  ;;  %v7093_v52 = vld [vmem:[%s9678_s18 + $0x10] sm:$0xff]  }
 0x801   : > { %v5608_v41 = vpop.f32.mrf.mxu0 }
 0x802   : > { %v5609_v38 = vadd.f32 %v5608_v41, %v5536_v5  ;;  %v5637_v57 = vpack.c.bf16 %v5628_v63, %v5627_v44  ;;  %v7095_v41 = vld [vmem:[%s9678_s18] sm:$0xff]  }
 0x803   : > { %v6596_v51 = vpop.f32.mrf.mxu0 }
 0x804   : > { %v5629_v29 = vmax.f32 %v5609_v38, 0.0 }
 0x805   : > { %v5611_v62 = vpop.f32.mrf.mxu0 }
 0x806   : > { %v5612_v32 = vadd.f32 %v5611_v62, %v5539_v1 }
 0x807   : > { %v6597_v14 = vpop.f32.mrf.mxu0 }
 0x808   : > { %v5630_v49 = vmax.f32 %v5612_v32, 0.0 }
 0x809   : > { %v5616_v2 = vpop.f32.mrf.mxu0 }
 0x80a   : > { %v5617_v20 = vadd.f32 %v5616_v2, %v5544_v35  ;;  %v5638_v3 = vpack.c.bf16 %v5630_v49, %v5629_v29 }
 0x80b   : > { %v6600_v48 = vpop.f32.mrf.mxu0 }
 0x80c   : > { %v5631_v17 = vmax.f32 %v5617_v20, 0.0 }
 0x80d   : > { %v5619_v45 = vpop.f32.mrf.mxu0 }
 0x80e   : > { %v5620_v53 = vadd.f32 %v5619_v45, %v5547_v39 }
 0x80f   : > { %v6601_v27 = vpop.f32.mrf.mxu0 }
 0x810   : > { %v5632_v50 = vmax.f32 %v5620_v53, 0.0 }
 0x812   : > { %v5639_v10 = vpack.c.bf16 %v5632_v50, %v5631_v17 }
 0x814   : > { %v5650_v28 = vsel %vm3005_vm3, %v5639_v10, 0 }
 0x815   : > { %6603 = vmatpush3.bf16.msra.mxu1 %v5650_v28 }
 0x816   : > { %6604 = vmatprep.subr.bf16.mxu1 %v7167_v31 }
 0x819   : > { %6605 = vmatpush3.bf16.msra.mxu1 %v5638_v3 }
 0x81a   : > { %6606 = vmatprep.subr.bf16.mxu1 %v7167_v31 }
 0x81d   : > { %6607 = vmatpush3.bf16.msra.mxu1 %v5637_v57 }
 0x81e   : > { %6608 = vmatprep.subr.bf16.mxu1 %v7167_v31 }
 0x821   : > { %6609 = vmatpush3.bf16.msra.mxu1 %v5636_v26 }
 0x822   : > { %6610 = vmatprep.subr.bf16.mxu1 %v7167_v31 }
 0x825   : > { %6611 = vmatpush3.bf16.msra.mxu1 %v9545_v42  ;;  %v7090_v42 = vld [vmem:[%s9678_s18 + $0x28] ss:$0 sps:$4 sm:$0x33]  }
 0x826   : > { %6636 = vmatprep.subr.bf16.mxu1 %v7167_v31  ;;  %v5868_v37 = vsel %vm991_vm0, %v7090_v42, 0 }
 0x828   : > { %6613 = vmatmul.mubr.msk.bf16.vlgmr.msra.gmra.mxu1 %vm5645_vm12, %v7081_v13 }
 0x829   : > { %6648 = vmatprep.mubr.msk.bf16.mxu1 %vm7168_vm10, %v7167_v31  ;;  %6637 = vmatpush3.bf16.msra.mxu1 %v5868_v37 }
 0x82a   : > { %6638 = vmatprep.subr.bf16.mxu1 %v7167_v31 }
 0x82d   : > { %6639 = vmatpush3.bf16.msra.mxu1 %v7091_v56 }
 0x82e   : > { %6640 = vmatprep.subr.bf16.mxu1 %v7167_v31 }
 0x831   : > { %6641 = vmatpush3.bf16.msra.mxu1 %v7092_v58 }
 0x832   : > { %6642 = vmatprep.subr.bf16.mxu1 %v7167_v31 }
 0x835   : > { %6643 = vmatpush3.bf16.msra.mxu1 %v7093_v52 }
 0x836   : > { %6644 = vmatprep.subr.bf16.mxu1 %v7167_v31 }
 0x839   : > { %6645 = vmatpush3.bf16.msra.mxu1 %v7094_v61 }
 0x83a   : > { %6646 = vmatprep.subr.bf16.mxu1 %v7167_v31  ;;  %v6425_v31 = vld [vmem:[%s9679_s19] ss:$0 sm:$0xff] }
 0x83d   : > { %6647 = vmatpush3.bf16.msra.mxu1 %v7095_v41 }
 0x8e8   : > { %v5686_v11 = vpop.f32.mrf.mxu1 }
 0x8ea   : > { %v6614_v26 = vpop.f32.mrf.mxu1 }
 0x8ec   : > { %v5689_v46 = vpop.f32.mrf.mxu1 }
 0x8ed   : > { %v5693_v8 = vpack.c.bf16 %v5689_v46, %v5686_v11 }
 0x8ee   : > { %v6615_v22 = vpop.f32.mrf.mxu1 }
 0x8ef   : > { %6633 = vmatmul.mubr.msk.bf16.vlgmr.msra.gmra.mxu0 %vm5761_vm13, %v5693_v8 }
 0x9af   : > { %v5803_v51 = vpop.f32.mrf.mxu0 }
 0x9b0   : > { %v5804_v55 = vadd.f32 %v6415_v59, %v5803_v51 }
 0x9b1   : > { %v6634_v24 = vpop.f32.mrf.mxu0 }
 0x9b2   : > { %v5810_v15 = vmax.f32 %v5804_v55, 0.0 }
 0x9b3   : > { %v5806_v43 = vpop.f32.mrf.mxu0 }
 0x9b4   : > { %v5807_v62 = vadd.f32 %v6415_v59, %v5806_v43 }
 0x9b5   : > { %v6635_v0 = vpop.f32.mrf.mxu0 }
 0x9b6   : > { %v5811_v19 = vmax.f32 %v5807_v62, 0.0 }
 0x9b8   : > { %v5812_v14 = vpack.c.bf16 %v5811_v19, %v5810_v15 }
 0x9ba   : > { %6649 = vmatmul.mubr.msk.bf16.vlgmr.msra.gmra.mxu1 %vm906_vm1, %v5812_v14 }
 0xa7a   : > { %v5904_v34 = vpop.f32.mrf.mxu1 }
 0xa7b   : > { %v5905_v25 = vadd.f32 %v6425_v31, %v5904_v34 }
 0xa7c   : > { %v6650_v12 = vpop.f32.mrf.mxu1 }
 0xa7d   : > { %5911 = vmax.xlane.f32.xlu0 %v5905_v25 }
 0xa7e   : > { %v5907_v40 = vpop.f32.mrf.mxu1 }
 0xa7f   : > { %v5908_v60 = vadd.f32 %v6425_v31, %v5907_v40 }
 0xa80   : > { %v6651_v2 = vpop.f32.mrf.mxu1 }
 0xa81   : > { %5913 = vmax.xlane.f32.xlu0 %v5908_v60 }
 0xb06   : > { %v5912_v35 = vpop.xlane.xlu0 %5911 }
 0xb07   : > { %v5915_v7 = vsub.f32 %v5905_v25, %v5912_v35 }
 0xb09   : > { %v5917_v21 = vmul.f32 1.442695, %v5915_v7 }
 0xb0a   : > { %v5914_v6 = vpop.xlane.xlu0 %5913 }
 0xb0b   : > { %v5916_v48 = vsub.f32 %v5908_v60, %v5914_v6  ;;  %7096 = vpow2.f32 %v5917_v21 }
 0xb0d   : > { %v5919_v20 = vmul.f32 1.442695, %v5916_v48 }
 0xb0f   : > { %7098 = vpow2.f32 %v5919_v20 }
 0xb18   : > { %v7097_v39 = vpop.eup %7096 }
 0xb19   : > { %5921 = vadd.xlane.f32.xlu1 %v7097_v39 }
 0xb1c   : > { %v7099_v36 = vpop.eup %7098 }
 0xb1d   : > { %5923 = vadd.xlane.f32.xlu1 %v7099_v36 }
 0xba2   : > { %v5922_v23 = vpop.xlane.xlu1 %5921 }
 0xba3   : > { %7100 = vlog2.f32 %v5922_v23 }
 0xba6   : > { %v5924_v1 = vpop.xlane.xlu1 %5923 }
 0xba7   : > { %7102 = vlog2.f32 %v5924_v1 }
 0xbb0   : > { %v7101_v45 = vpop.eup %7100 }
 0xbb1   : > { %v5926_v53 = vmul.f32 0.6931472, %v7101_v45 }
 0xbb3   : > { %v5929_v16 = vsub.f32 %v5915_v7, %v5926_v53 }
 0xbb4   : > { %v7103_v18 = vpop.eup %7102 }
 0xbb5   : > { %5931 = vst [vmem:[%s623_s30] sm:$0xff] %v5929_v16  ;;  %v5928_v5 = vmul.f32 0.6931472, %v7103_v18 }
 0xbb7   : > { %v5930_v32 = vsub.f32 %v5916_v48, %v5928_v5 }
 0xbb9   : > { %5932 = vst [vmem:[%s623_s30 + $0x8] sm:$0xff] %v5930_v32 }
 0xbba   : > { %7117 = shalt.err (!%p7114_p3)
}
 0xbbb   : > { %s7118_s24 = scalar_lea.hbm %s9616_s1, 256  ;;  %s7122_s28 = scalar_lea.hbm %s9905_s27, 512 }
 0xbbc   : > { %p7119_p4 = scmp.ne.s32.totalorder %s9616_s1, %s7118_s24  ;;  %p7123_p9 = scmp.lt.s32.totalorder %s9616_s1, %s9905_s27 }
 0xbbd   : > { %p7124_p10 = scmp.lt.s32.totalorder %s7122_s28, %s7118_s24 }
 0xbbe   : > { %p7120_p7 = pnand %p7119_p4, %p7315_p5 }
 0xbbf   : > { %p7125_p11 = por %p7124_p10, %p7123_p9 }
 0xbc0   : > { %p7121_p8 = pneg %p7120_p7 }
 0xbc2   : > { %p7126_p12 = pnand %p7125_p11, %p7121_p8 }
 0xbc4   : > { %7129 = shalt.err (!%p7126_p12)
}
 0xbc5   : > { %s7170_s3 = smov 128   ;;  %s7171_s2 = smov 8  }
 0xbc6   : > { %6652 = dma.vmem_to_hbm [thread:$0]  (%p7315_p5), %s9618_s0, 256, %s9616_s1, %s9620_s20, %s7170_s3, %s7170_s3, %s7171_s2  }
 0xbc7 PF: > { %s9906_s23 = sld [smem:[#allocation7_spill]] }
 0xbc8   : > { %s9907_s26 = sld [smem:[#allocation5_spill]] }
 0xbcd   : > { %p6658_p13 = scmp.ge.s32.totalorder %s9906_s23, 2 }
 0xbce   : > { %s5962_s6 = sand.u32 1, %s9907_s26  }
 0xbcf   : > { %p6655_p0 = pnand %p6658_p13, %p7319_p6  ;;  %s5963_s5 = scalar_lea.sflag [#allocation3], %s5962_s6 }
 0xbd1   : > { %p6656_p1 = pneg %p6655_p0 }
 0xbd3   : > { %7147 = dma.done.wait (%p6656_p1), %s5963_s5, 256  }
 0xbd4   : > { %7149 = vsyncadd (%p6656_p1), %s5963_s5, 4294967040  ;;  %s9909_s24 = sld [smem:[#allocation8_spill]]  ;;  %s9912_s1 = smov %s7156_s22 }
 0xbd5   : > { %s9910_s28 = sld [smem:[#allocation6_spill]] }
 0xbd6   : > { %s9911_s23 = sld [smem:[#allocation9_spill]] }
 0xbda   : > { %p30_p2 = scmp.ge.s32.totalorder %s9909_s24, 4  }
 0xbdb   : > { %s9913_s22 = smov %s9910_s28 }
 0xbdc   :  { %32 = sbr.rel (!%p30_p2) target bundleno = 12 (0xc), region = 135 }
 0xbe1   :  { %5968 = vsyncpa [#allocation3], 1 }
 0xbe2   :  { %5970 = vsyncpa [#allocation3 + $0x1], 1 }

</bundles_post_ra>
